<compile_context>
chip_gen: v6e
topology: v6e:2x2x1
jax: 0.10.0
libtpu: 0.0.40
codegen_flags: <defaults>
</compile_context>

<pallas_src>
import functools

import jax
import jax.numpy as jnp
from jax import lax
from jax.experimental import pallas as pl
from jax.experimental.pallas import tpu as pltpu

_LANE = 128      # vreg lane width
_SUBLANE = 8     # f32 sublane tile


def _ceil_to(n, m):
    return ((n + m - 1) // m) * m


# ----------------------------------------------------------------------------
# Fused kernel: [LSTM layer 0 -> LSTM layer 1 -> ... -> FC head] in one call.
# ----------------------------------------------------------------------------
def _char_rnn_kernel(*refs, n_layers):
    """Ref layout:
      inputs : x (T*Bp, Ip), h0 (L,Bp,Hp), c0 (L,Bp,Hp),
               [w_ih (in,4Hp), w_hh (Hp,4Hp), b (1,4Hp)] * L,
               w_fc (Hp,Cp), b_fc (1,Cp)
      outputs: logits (T*Bp, Cp), h_n (L,Bp,Hp), c_n (L,Bp,Hp)
      scratch: g_sc (T*Bp, 4Hp), y_sc (T*Bp, Hp)
    Gate order along the 4Hp axis follows PyTorch: [i, f, g, o].
    """
    n_in = 3 + 3 * n_layers + 2
    x_ref, h0_ref, c0_ref = refs[:3]
    layer_refs = [refs[3 + 3 * l: 6 + 3 * l] for l in range(n_layers)]
    wfc_ref, bfc_ref = refs[n_in - 2: n_in]
    logits_ref, hn_ref, cn_ref = refs[n_in: n_in + 3]
    g_sc, y_sc = refs[n_in + 3: n_in + 5]

    Bp = h0_ref.shape[1]
    Hp = h0_ref.shape[2]
    T = x_ref.shape[0] // Bp

    # Current layer input (flattened over time x batch) for the hoisted matmul.
    inp_all = x_ref[...]                                   # (T*Bp, Ip)

    for layer in range(n_layers):
        w_ih_ref, w_hh_ref, b_ref = layer_refs[layer]

        # ---- hoisted input projection: one big MXU matmul for ALL timesteps ----
        g_sc[...] = (
            jnp.dot(inp_all, w_ih_ref[...], preferred_element_type=jnp.float32)
            + b_ref[...])

        # ---- serial recurrence: only h @ W_hh remains on the critical path ----
        def step(t, carry):
            h, c = carry
            row = t * Bp                                   # sublane-aligned (Bp=8)
            gates = (g_sc[pl.ds(row, Bp), :]
                     + jnp.dot(h, w_hh_ref[...],
                               preferred_element_type=jnp.float32))
            # Hp is a multiple of 128, so every gate slice is lane-aligned.
            i_g = jax.nn.sigmoid(gates[:, 0 * Hp:1 * Hp])
            f_g = jax.nn.sigmoid(gates[:, 1 * Hp:2 * Hp])
            g_g = jnp.tanh(gates[:, 2 * Hp:3 * Hp])
            o_g = jax.nn.sigmoid(gates[:, 3 * Hp:4 * Hp])
            c_new = f_g * c + i_g * g_g
            h_new = o_g * jnp.tanh(c_new)
            y_sc[pl.ds(row, Bp), :] = h_new
            return h_new, c_new

        h_fin, c_fin = lax.fori_loop(
            0, T, step, (h0_ref[layer], c0_ref[layer]), unroll=True)
        hn_ref[layer] = h_fin
        cn_ref[layer] = c_fin

        # Layer output stays resident in VMEM scratch and feeds the next layer.
        inp_all = y_sc[...]                                # (T*Bp, Hp)

    # nn.Dropout in eval mode == identity (torch.no_grad() inference semantics).
    # TODO(synk): train-mode stochastic dropout (drop_prob=0.5) not implemented.

    # ---- FC head: one matmul over all (T*Bp) rows, lane-dense Cp=128 output ----
    logits_ref[...] = (
        jnp.dot(inp_all, wfc_ref[...], preferred_element_type=jnp.float32)
        + bfc_ref[...])


# ----------------------------------------------------------------------------
# Wrapper: pad/transpose at the boundary, slice padding back off afterwards.
# ----------------------------------------------------------------------------
def char_rnn_forward(x, hidden, params, *, n_hidden, n_chars):
    """x: (B, T, n_chars) f32; hidden = (h0, c0), each (n_layers, B, n_hidden)."""
    h0, c0 = hidden
    B, T, I = x.shape
    n_layers = len(params["lstm"])
    H, C = n_hidden, n_chars

    Ip = params["lstm"][0][0].shape[0]        # padded input width
    Hp = params["lstm"][0][1].shape[0]        # padded hidden width
    Cp = params["fc"][0].shape[1]             # padded vocab width
    Bp = max(_ceil_to(B, _SUBLANE), _SUBLANE)

    # Time-major, pad batch/feature dims with zeros, flatten (time, batch).
    x_tm = jnp.transpose(x, (1, 0, 2)).astype(jnp.float32)          # (T, B, I)
    x_flat = jnp.pad(x_tm, ((0, 0), (0, Bp - B), (0, Ip - I))).reshape(T * Bp, Ip)
    h0_p = jnp.pad(h0.astype(jnp.float32), ((0, 0), (0, Bp - B), (0, Hp - H)))
    c0_p = jnp.pad(c0.astype(jnp.float32), ((0, 0), (0, Bp - B), (0, Hp - H)))

    flat_w = []
    for w_ih, w_hh, b in params["lstm"]:
        flat_w += [w_ih, w_hh, b]
    w_fc, b_fc = params["fc"]

    out_shape = (
        jax.ShapeDtypeStruct((T * Bp, Cp), jnp.float32),             # logits (time-major)
        jax.ShapeDtypeStruct((n_layers, Bp, Hp), jnp.float32),       # h_n
        jax.ShapeDtypeStruct((n_layers, Bp, Hp), jnp.float32),       # c_n
    )
    logits_flat, h_n_p, c_n_p = pl.pallas_call(
        functools.partial(_char_rnn_kernel, n_layers=n_layers),
        out_shape=out_shape,
        scratch_shapes=[
            pltpu.VMEM((T * Bp, 4 * Hp), jnp.float32),   # hoisted gate projections
            pltpu.VMEM((T * Bp, Hp), jnp.float32),       # per-layer hidden outputs
        ],
    )(x_flat, h0_p, c0_p, *flat_w, w_fc, b_fc)

    logits = jnp.transpose(logits_flat.reshape(T, Bp, Cp)[:, :B, :C], (1, 0, 2))
    h_n = h_n_p[:, :B, :H]
    c_n = c_n_p[:, :B, :H]
    return logits, (h_n, c_n)


# ----------------------------------------------------------------------------
# Parameter construction: PyTorch-layout init + packing (pad per-gate to Hp).
# ----------------------------------------------------------------------------
def init_raw_params(key, n_chars, n_hidden, n_layers):
    """PyTorch-style uniform(-1/sqrt(H), 1/sqrt(H)) init, PyTorch layouts."""
    k = 1.0 / float(n_hidden) ** 0.5
    lstm = []
    for layer in range(n_layers):
        in_dim = n_chars if layer == 0 else n_hidden
        key, k1, k2, k3, k4 = jax.random.split(key, 5)
        w_ih = jax.random.uniform(k1, (4 * n_hidden, in_dim), jnp.float32, -k, k)
        w_hh = jax.random.uniform(k2, (4 * n_hidden, n_hidden), jnp.float32, -k, k)
        b_ih = jax.random.uniform(k3, (4 * n_hidden,), jnp.float32, -k, k)
        b_hh = jax.random.uniform(k4, (4 * n_hidden,), jnp.float32, -k, k)
        lstm.append((w_ih, w_hh, b_ih, b_hh))
    key, k1, k2 = jax.random.split(key, 3)
    w_fc = jax.random.uniform(k1, (n_chars, n_hidden), jnp.float32, -k, k)
    b_fc = jax.random.uniform(k2, (n_chars,), jnp.float32, -k, k)
    return {"lstm": lstm, "fc": (w_fc, b_fc)}


def _pad_gates_mat(w, in_pad, H, Hp):
    """(4H, in) PyTorch weight -> (in_pad, 4Hp), each gate block padded separately."""
    in_dim = w.shape[1]
    w_t = w.T.reshape(in_dim, 4, H)
    w_t = jnp.pad(w_t, ((0, in_pad - in_dim), (0, 0), (0, Hp - H)))
    return w_t.reshape(in_pad, 4 * Hp)


def _pad_gates_vec(b, H, Hp):
    b = b.reshape(4, H)
    b = jnp.pad(b, ((0, 0), (0, Hp - H)))
    return b.reshape(1, 4 * Hp)


def pack_params(raw, n_chars, n_hidden):
    H, C = n_hidden, n_chars
    Hp = _ceil_to(H, _LANE)
    Cp = _ceil_to(C, _LANE)
    packed = {"lstm": []}
    for w_ih, w_hh, b_ih, b_hh in raw["lstm"]:
        in_pad = _ceil_to(w_ih.shape[1], _LANE)
        packed["lstm"].append((
            _pad_gates_mat(w_ih, in_pad, H, Hp),          # (in_pad, 4Hp)
            _pad_gates_mat(w_hh, Hp, H, Hp),              # (Hp, 4Hp)
            _pad_gates_vec(b_ih + b_hh, H, Hp),           # (1, 4Hp)
        ))
    w_fc, b_fc = raw["fc"]
    packed["fc"] = (jnp.pad(w_fc.T, ((0, Hp - H), (0, Cp - C))),   # (Hp, Cp)
                    jnp.pad(b_fc, (0, Cp - C))[None, :])           # (1, Cp)
    return packed


# ----------------------------------------------------------------------------
# Pure-JAX reference (eval-mode CharRNN forward) for correctness checking.
# ----------------------------------------------------------------------------
def _reference_forward(x, hidden, raw):
    h0, c0 = hidden
    B, T, _ = x.shape
    hs = [h0[l] for l in range(h0.shape[0])]
    cs = [c0[l] for l in range(c0.shape[0])]
    inp = x
    for l, (w_ih, w_hh, b_ih, b_hh) in enumerate(raw["lstm"]):
        H = w_hh.shape[1]
        h, c = hs[l], cs[l]
        outs = []
        for t in range(T):
            g = inp[:, t, :] @ w_ih.T + h @ w_hh.T + b_ih + b_hh
            i = jax.nn.sigmoid(g[:, 0 * H:1 * H])
            f = jax.nn.sigmoid(g[:, 1 * H:2 * H])
            gg = jnp.tanh(g[:, 2 * H:3 * H])
            o = jax.nn.sigmoid(g[:, 3 * H:4 * H])
            c = f * c + i * gg
            h = o * jnp.tanh(c)
            outs.append(h)
        inp = jnp.stack(outs, axis=1)
        hs[l], cs[l] = h, c
    w_fc, b_fc = raw["fc"]
    logits = inp @ w_fc.T + b_fc
    return logits, (jnp.stack(hs), jnp.stack(cs))


if __name__ == "__main__":
    # Small, module-consistent shapes: len(tokens)=16, n_hidden=32, n_layers=2.
    n_chars, n_hidden, n_layers = 16, 32, 2
    B, T = 2, 8

    key = jax.random.PRNGKey(0)
    key, kp, kx = jax.random.split(key, 3)
    raw = init_raw_params(kp, n_chars, n_hidden, n_layers)
    params = pack_params(raw, n_chars, n_hidden)

    # One-hot style input (B, T, n_chars), like one_hot_encode output.
    idx = jax.random.randint(kx, (B, T), 0, n_chars)
    x = jax.nn.one_hot(idx, n_chars, dtype=jnp.float32)
    h0 = jnp.zeros((n_layers, B, n_hidden), jnp.float32)
    c0 = jnp.zeros((n_layers, B, n_hidden), jnp.float32)

    fwd = jax.jit(functools.partial(char_rnn_forward,
                                    n_hidden=n_hidden, n_chars=n_chars))
    logits, (h_n, c_n) = fwd(x, (h0, c0), params)
    jax.block_until_ready((logits, h_n, c_n))

    assert logits.shape == (B, T, n_chars)
    assert h_n.shape == (n_layers, B, n_hidden)
    assert c_n.shape == (n_layers, B, n_hidden)

    # Correctness vs a pure-JAX reference of the same torch module (eval mode).
    with jax.default_matmul_precision("highest"):
        ref_logits, (ref_hn, ref_cn) = _reference_forward(x, (h0, c0), raw)
    err = max(float(jnp.max(jnp.abs(logits - ref_logits))),
              float(jnp.max(jnp.abs(h_n - ref_hn))),
              float(jnp.max(jnp.abs(c_n - ref_cn))))
    assert err < 2e-3, f"mismatch vs reference: max abs err = {err}"

    print("KERNEL_OK")
</pallas_src>

<mosaic_0001>
module attributes {stable_mosaic.version = 11 : i64} {
  func.func @_char_rnn_kernel(%arg0: memref<64x128xf32, #tpu.memory_space<vmem>>, %arg1: memref<2x8x128xf32, #tpu.memory_space<vmem>>, %arg2: memref<2x8x128xf32, #tpu.memory_space<vmem>>, %arg3: memref<128x512xf32, #tpu.memory_space<vmem>>, %arg4: memref<128x512xf32, #tpu.memory_space<vmem>>, %arg5: memref<1x512xf32, #tpu.memory_space<vmem>>, %arg6: memref<128x512xf32, #tpu.memory_space<vmem>>, %arg7: memref<128x512xf32, #tpu.memory_space<vmem>>, %arg8: memref<1x512xf32, #tpu.memory_space<vmem>>, %arg9: memref<128x128xf32, #tpu.memory_space<vmem>>, %arg10: memref<1x128xf32, #tpu.memory_space<vmem>>, %arg11: memref<64x128xf32, #tpu.memory_space<vmem>>, %arg12: memref<2x8x128xf32, #tpu.memory_space<vmem>>, %arg13: memref<2x8x128xf32, #tpu.memory_space<vmem>>, %arg14: memref<64x512xf32, #tpu.memory_space<vmem>>, %arg15: memref<64x128xf32, #tpu.memory_space<vmem>>) attributes {dimension_semantics = [], scalar_prefetch = 0 : i64, scratch_operands = 2 : i64, tpu.core_type = #tpu.core_type<tc>} {
    %c0 = arith.constant 0 : index
    %c0_0 = arith.constant 0 : index
    %0 = vector.load %arg0[%c0, %c0_0] : memref<64x128xf32, #tpu.memory_space<vmem>>, vector<64x128xf32>
    %c0_1 = arith.constant 0 : index
    %c0_2 = arith.constant 0 : index
    %1 = vector.load %arg3[%c0_1, %c0_2] : memref<128x512xf32, #tpu.memory_space<vmem>>, vector<128x512xf32>
    %cst = arith.constant dense<0.000000e+00> : vector<64x512xf32>
    %2 = tpu.matmul %0, %1, %cst {dimension_numbers = #tpu.dot_dimension_numbers<[1], [0], [0], [1], [0, 0, 1, 1], [], []>} : vector<64x128xf32>, vector<128x512xf32>, vector<64x512xf32> -> vector<64x512xf32>
    %c0_3 = arith.constant 0 : index
    %c0_4 = arith.constant 0 : index
    %3 = vector.load %arg5[%c0_3, %c0_4] : memref<1x512xf32, #tpu.memory_space<vmem>>, vector<1x512xf32>
    %4 = vector.broadcast %3 : vector<1x512xf32> to vector<64x512xf32>
    %5 = arith.addf %2, %4 : vector<64x512xf32>
    %c0_5 = arith.constant 0 : index
    %c0_6 = arith.constant 0 : index
    %6 = vector.load %arg14[%c0_5, %c0_6] : memref<64x512xf32, #tpu.memory_space<vmem>>, vector<64x512xf32>
    tpu.vector_store %arg14[%c0_5, %c0_6], %5 {strides = array<i32>} : memref<64x512xf32, #tpu.memory_space<vmem>>, vector<64x512xf32>,
    %c0_7 = arith.constant 0 : index
    %c0_8 = arith.constant 0 : index
    %c0_9 = arith.constant 0 : index
    %7 = vector.load %arg1[%c0_7, %c0_8, %c0_9] : memref<2x8x128xf32, #tpu.memory_space<vmem>>, vector<1x8x128xf32>
    %8 = vector.shape_cast %7 : vector<1x8x128xf32> to vector<8x128xf32>
    %c0_10 = arith.constant 0 : index
    %c0_11 = arith.constant 0 : index
    %c0_12 = arith.constant 0 : index
    %9 = vector.load %arg2[%c0_10, %c0_11, %c0_12] : memref<2x8x128xf32, #tpu.memory_space<vmem>>, vector<1x8x128xf32>
    %10 = vector.shape_cast %9 : vector<1x8x128xf32> to vector<8x128xf32>
    %c0_i32 = arith.constant 0 : i32
    %c8_i32 = arith.constant 8 : i32
    %11 = arith.muli %c0_i32, %c8_i32 : i32
    %12 = arith.index_cast %11 : i32 to index
    %c0_13 = arith.constant 0 : index
    %13 = vector.load %arg14[%12, %c0_13] : memref<64x512xf32, #tpu.memory_space<vmem>>, vector<8x512xf32>
    %c0_14 = arith.constant 0 : index
    %c0_15 = arith.constant 0 : index
    %14 = vector.load %arg4[%c0_14, %c0_15] : memref<128x512xf32, #tpu.memory_space<vmem>>, vector<128x512xf32>
    %cst_16 = arith.constant dense<0.000000e+00> : vector<8x512xf32>
    %15 = tpu.matmul %8, %14, %cst_16 {dimension_numbers = #tpu.dot_dimension_numbers<[1], [0], [0], [1], [0, 0, 1, 1], [], []>} : vector<8x128xf32>, vector<128x512xf32>, vector<8x512xf32> -> vector<8x512xf32>
    %16 = arith.addf %13, %15 : vector<8x512xf32>
    %17 = vector.extract_strided_slice %16 {offsets = [0, 0], sizes = [8, 128], strides = [1, 1]} : vector<8x512xf32> to vector<8x128xf32>
    %18 = arith.negf %17 : vector<8x128xf32>
    %19 = math.exp %18 : vector<8x128xf32>
    %cst_17 = arith.constant 1.000000e+00 : f32
    %20 = vector.broadcast %cst_17 : f32 to vector<8x128xf32>
    %21 = arith.addf %20, %19 : vector<8x128xf32>
    %22 = arith.divf %20, %21 : vector<8x128xf32>
    %23 = vector.extract_strided_slice %16 {offsets = [0, 128], sizes = [8, 128], strides = [1, 1]} : vector<8x512xf32> to vector<8x128xf32>
    %24 = arith.negf %23 : vector<8x128xf32>
    %25 = math.exp %24 : vector<8x128xf32>
    %cst_18 = arith.constant 1.000000e+00 : f32
    %26 = vector.broadcast %cst_18 : f32 to vector<8x128xf32>
    %27 = arith.addf %26, %25 : vector<8x128xf32>
    %28 = arith.divf %26, %27 : vector<8x128xf32>
    %29 = vector.extract_strided_slice %16 {offsets = [0, 256], sizes = [8, 128], strides = [1, 1]} : vector<8x512xf32> to vector<8x128xf32>
    %30 = math.tanh %29 : vector<8x128xf32>
    %31 = vector.extract_strided_slice %16 {offsets = [0, 384], sizes = [8, 128], strides = [1, 1]} : vector<8x512xf32> to vector<8x128xf32>
    %32 = arith.negf %31 : vector<8x128xf32>
    %33 = math.exp %32 : vector<8x128xf32>
    %cst_19 = arith.constant 1.000000e+00 : f32
    %34 = vector.broadcast %cst_19 : f32 to vector<8x128xf32>
    %35 = arith.addf %34, %33 : vector<8x128xf32>
    %36 = arith.divf %34, %35 : vector<8x128xf32>
    %37 = arith.mulf %28, %10 : vector<8x128xf32>
    %38 = arith.mulf %22, %30 : vector<8x128xf32>
    %39 = arith.addf %37, %38 : vector<8x128xf32>
    %40 = math.tanh %39 : vector<8x128xf32>
    %41 = arith.mulf %36, %40 : vector<8x128xf32>
    %42 = arith.index_cast %11 : i32 to index
    %c0_20 = arith.constant 0 : index
    %43 = vector.load %arg15[%42, %c0_20] : memref<64x128xf32, #tpu.memory_space<vmem>>, vector<8x128xf32>
    tpu.vector_store %arg15[%42, %c0_20], %41 {strides = array<i32>} : memref<64x128xf32, #tpu.memory_space<vmem>>, vector<8x128xf32>,
    %c1_i32 = arith.constant 1 : i32
    %c8_i32_21 = arith.constant 8 : i32
    %44 = arith.muli %c1_i32, %c8_i32_21 : i32
    %45 = arith.index_cast %44 : i32 to index
    %c0_22 = arith.constant 0 : index
    %46 = vector.load %arg14[%45, %c0_22] : memref<64x512xf32, #tpu.memory_space<vmem>>, vector<8x512xf32>
    %c0_23 = arith.constant 0 : index
    %c0_24 = arith.constant 0 : index
    %47 = vector.load %arg4[%c0_23, %c0_24] : memref<128x512xf32, #tpu.memory_space<vmem>>, vector<128x512xf32>
    %cst_25 = arith.constant dense<0.000000e+00> : vector<8x512xf32>
    %48 = tpu.matmul %41, %47, %cst_25 {dimension_numbers = #tpu.dot_dimension_numbers<[1], [0], [0], [1], [0, 0, 1, 1], [], []>} : vector<8x128xf32>, vector<128x512xf32>, vector<8x512xf32> -> vector<8x512xf32>
    %49 = arith.addf %46, %48 : vector<8x512xf32>
    %50 = vector.extract_strided_slice %49 {offsets = [0, 0], sizes = [8, 128], strides = [1, 1]} : vector<8x512xf32> to vector<8x128xf32>
    %51 = arith.negf %50 : vector<8x128xf32>
    %52 = math.exp %51 : vector<8x128xf32>
    %cst_26 = arith.constant 1.000000e+00 : f32
    %53 = vector.broadcast %cst_26 : f32 to vector<8x128xf32>
    %54 = arith.addf %53, %52 : vector<8x128xf32>
    %55 = arith.divf %53, %54 : vector<8x128xf32>
    %56 = vector.extract_strided_slice %49 {offsets = [0, 128], sizes = [8, 128], strides = [1, 1]} : vector<8x512xf32> to vector<8x128xf32>
    %57 = arith.negf %56 : vector<8x128xf32>
    %58 = math.exp %57 : vector<8x128xf32>
    %cst_27 = arith.constant 1.000000e+00 : f32
    %59 = vector.broadcast %cst_27 : f32 to vector<8x128xf32>
    %60 = arith.addf %59, %58 : vector<8x128xf32>
    %61 = arith.divf %59, %60 : vector<8x128xf32>
    %62 = vector.extract_strided_slice %49 {offsets = [0, 256], sizes = [8, 128], strides = [1, 1]} : vector<8x512xf32> to vector<8x128xf32>
    %63 = math.tanh %62 : vector<8x128xf32>
    %64 = vector.extract_strided_slice %49 {offsets = [0, 384], sizes = [8, 128], strides = [1, 1]} : vector<8x512xf32> to vector<8x128xf32>
    %65 = arith.negf %64 : vector<8x128xf32>
    %66 = math.exp %65 : vector<8x128xf32>
    %cst_28 = arith.constant 1.000000e+00 : f32
    %67 = vector.broadcast %cst_28 : f32 to vector<8x128xf32>
    %68 = arith.addf %67, %66 : vector<8x128xf32>
    %69 = arith.divf %67, %68 : vector<8x128xf32>
    %70 = arith.mulf %61, %39 : vector<8x128xf32>
    %71 = arith.mulf %55, %63 : vector<8x128xf32>
    %72 = arith.addf %70, %71 : vector<8x128xf32>
    %73 = math.tanh %72 : vector<8x128xf32>
    %74 = arith.mulf %69, %73 : vector<8x128xf32>
    %75 = arith.index_cast %44 : i32 to index
    %c0_29 = arith.constant 0 : index
    %76 = vector.load %arg15[%75, %c0_29] : memref<64x128xf32, #tpu.memory_space<vmem>>, vector<8x128xf32>
    tpu.vector_store %arg15[%75, %c0_29], %74 {strides = array<i32>} : memref<64x128xf32, #tpu.memory_space<vmem>>, vector<8x128xf32>,
    %c2_i32 = arith.constant 2 : i32
    %c8_i32_30 = arith.constant 8 : i32
    %77 = arith.muli %c2_i32, %c8_i32_30 : i32
    %78 = arith.index_cast %77 : i32 to index
    %c0_31 = arith.constant 0 : index
    %79 = vector.load %arg14[%78, %c0_31] : memref<64x512xf32, #tpu.memory_space<vmem>>, vector<8x512xf32>
    %c0_32 = arith.constant 0 : index
    %c0_33 = arith.constant 0 : index
    %80 = vector.load %arg4[%c0_32, %c0_33] : memref<128x512xf32, #tpu.memory_space<vmem>>, vector<128x512xf32>
    %cst_34 = arith.constant dense<0.000000e+00> : vector<8x512xf32>
    %81 = tpu.matmul %74, %80, %cst_34 {dimension_numbers = #tpu.dot_dimension_numbers<[1], [0], [0], [1], [0, 0, 1, 1], [], []>} : vector<8x128xf32>, vector<128x512xf32>, vector<8x512xf32> -> vector<8x512xf32>
    %82 = arith.addf %79, %81 : vector<8x512xf32>
    %83 = vector.extract_strided_slice %82 {offsets = [0, 0], sizes = [8, 128], strides = [1, 1]} : vector<8x512xf32> to vector<8x128xf32>
    %84 = arith.negf %83 : vector<8x128xf32>
    %85 = math.exp %84 : vector<8x128xf32>
    %cst_35 = arith.constant 1.000000e+00 : f32
    %86 = vector.broadcast %cst_35 : f32 to vector<8x128xf32>
    %87 = arith.addf %86, %85 : vector<8x128xf32>
    %88 = arith.divf %86, %87 : vector<8x128xf32>
    %89 = vector.extract_strided_slice %82 {offsets = [0, 128], sizes = [8, 128], strides = [1, 1]} : vector<8x512xf32> to vector<8x128xf32>
    %90 = arith.negf %89 : vector<8x128xf32>
    %91 = math.exp %90 : vector<8x128xf32>
    %cst_36 = arith.constant 1.000000e+00 : f32
    %92 = vector.broadcast %cst_36 : f32 to vector<8x128xf32>
    %93 = arith.addf %92, %91 : vector<8x128xf32>
    %94 = arith.divf %92, %93 : vector<8x128xf32>
    %95 = vector.extract_strided_slice %82 {offsets = [0, 256], sizes = [8, 128], strides = [1, 1]} : vector<8x512xf32> to vector<8x128xf32>
    %96 = math.tanh %95 : vector<8x128xf32>
    %97 = vector.extract_strided_slice %82 {offsets = [0, 384], sizes = [8, 128], strides = [1, 1]} : vector<8x512xf32> to vector<8x128xf32>
    %98 = arith.negf %97 : vector<8x128xf32>
    %99 = math.exp %98 : vector<8x128xf32>
    %cst_37 = arith.constant 1.000000e+00 : f32
    %100 = vector.broadcast %cst_37 : f32 to vector<8x128xf32>
    %101 = arith.addf %100, %99 : vector<8x128xf32>
    %102 = arith.divf %100, %101 : vector<8x128xf32>
    %103 = arith.mulf %94, %72 : vector<8x128xf32>
    %104 = arith.mulf %88, %96 : vector<8x128xf32>
    %105 = arith.addf %103, %104 : vector<8x128xf32>
    %106 = math.tanh %105 : vector<8x128xf32>
    %107 = arith.mulf %102, %106 : vector<8x128xf32>
    %108 = arith.index_cast %77 : i32 to index
    %c0_38 = arith.constant 0 : index
    %109 = vector.load %arg15[%108, %c0_38] : memref<64x128xf32, #tpu.memory_space<vmem>>, vector<8x128xf32>
    tpu.vector_store %arg15[%108, %c0_38], %107 {strides = array<i32>} : memref<64x128xf32, #tpu.memory_space<vmem>>, vector<8x128xf32>,
    %c3_i32 = arith.constant 3 : i32
    %c8_i32_39 = arith.constant 8 : i32
    %110 = arith.muli %c3_i32, %c8_i32_39 : i32
    %111 = arith.index_cast %110 : i32 to index
    %c0_40 = arith.constant 0 : index
    %112 = vector.load %arg14[%111, %c0_40] : memref<64x512xf32, #tpu.memory_space<vmem>>, vector<8x512xf32>
    %c0_41 = arith.constant 0 : index
    %c0_42 = arith.constant 0 : index
    %113 = vector.load %arg4[%c0_41, %c0_42] : memref<128x512xf32, #tpu.memory_space<vmem>>, vector<128x512xf32>
    %cst_43 = arith.constant dense<0.000000e+00> : vector<8x512xf32>
    %114 = tpu.matmul %107, %113, %cst_43 {dimension_numbers = #tpu.dot_dimension_numbers<[1], [0], [0], [1], [0, 0, 1, 1], [], []>} : vector<8x128xf32>, vector<128x512xf32>, vector<8x512xf32> -> vector<8x512xf32>
    %115 = arith.addf %112, %114 : vector<8x512xf32>
    %116 = vector.extract_strided_slice %115 {offsets = [0, 0], sizes = [8, 128], strides = [1, 1]} : vector<8x512xf32> to vector<8x128xf32>
    %117 = arith.negf %116 : vector<8x128xf32>
    %118 = math.exp %117 : vector<8x128xf32>
    %cst_44 = arith.constant 1.000000e+00 : f32
    %119 = vector.broadcast %cst_44 : f32 to vector<8x128xf32>
    %120 = arith.addf %119, %118 : vector<8x128xf32>
    %121 = arith.divf %119, %120 : vector<8x128xf32>
    %122 = vector.extract_strided_slice %115 {offsets = [0, 128], sizes = [8, 128], strides = [1, 1]} : vector<8x512xf32> to vector<8x128xf32>
    %123 = arith.negf %122 : vector<8x128xf32>
    %124 = math.exp %123 : vector<8x128xf32>
    %cst_45 = arith.constant 1.000000e+00 : f32
    %125 = vector.broadcast %cst_45 : f32 to vector<8x128xf32>
    %126 = arith.addf %125, %124 : vector<8x128xf32>
    %127 = arith.divf %125, %126 : vector<8x128xf32>
    %128 = vector.extract_strided_slice %115 {offsets = [0, 256], sizes = [8, 128], strides = [1, 1]} : vector<8x512xf32> to vector<8x128xf32>
    %129 = math.tanh %128 : vector<8x128xf32>
    %130 = vector.extract_strided_slice %115 {offsets = [0, 384], sizes = [8, 128], strides = [1, 1]} : vector<8x512xf32> to vector<8x128xf32>
    %131 = arith.negf %130 : vector<8x128xf32>
    %132 = math.exp %131 : vector<8x128xf32>
    %cst_46 = arith.constant 1.000000e+00 : f32
    %133 = vector.broadcast %cst_46 : f32 to vector<8x128xf32>
    %134 = arith.addf %133, %132 : vector<8x128xf32>
    %135 = arith.divf %133, %134 : vector<8x128xf32>
    %136 = arith.mulf %127, %105 : vector<8x128xf32>
    %137 = arith.mulf %121, %129 : vector<8x128xf32>
    %138 = arith.addf %136, %137 : vector<8x128xf32>
    %139 = math.tanh %138 : vector<8x128xf32>
    %140 = arith.mulf %135, %139 : vector<8x128xf32>
    %141 = arith.index_cast %110 : i32 to index
    %c0_47 = arith.constant 0 : index
    %142 = vector.load %arg15[%141, %c0_47] : memref<64x128xf32, #tpu.memory_space<vmem>>, vector<8x128xf32>
    tpu.vector_store %arg15[%141, %c0_47], %140 {strides = array<i32>} : memref<64x128xf32, #tpu.memory_space<vmem>>, vector<8x128xf32>,
    %c4_i32 = arith.constant 4 : i32
    %c8_i32_48 = arith.constant 8 : i32
    %143 = arith.muli %c4_i32, %c8_i32_48 : i32
    %144 = arith.index_cast %143 : i32 to index
    %c0_49 = arith.constant 0 : index
    %145 = vector.load %arg14[%144, %c0_49] : memref<64x512xf32, #tpu.memory_space<vmem>>, vector<8x512xf32>
    %c0_50 = arith.constant 0 : index
    %c0_51 = arith.constant 0 : index
    %146 = vector.load %arg4[%c0_50, %c0_51] : memref<128x512xf32, #tpu.memory_space<vmem>>, vector<128x512xf32>
    %cst_52 = arith.constant dense<0.000000e+00> : vector<8x512xf32>
    %147 = tpu.matmul %140, %146, %cst_52 {dimension_numbers = #tpu.dot_dimension_numbers<[1], [0], [0], [1], [0, 0, 1, 1], [], []>} : vector<8x128xf32>, vector<128x512xf32>, vector<8x512xf32> -> vector<8x512xf32>
    %148 = arith.addf %145, %147 : vector<8x512xf32>
    %149 = vector.extract_strided_slice %148 {offsets = [0, 0], sizes = [8, 128], strides = [1, 1]} : vector<8x512xf32> to vector<8x128xf32>
    %150 = arith.negf %149 : vector<8x128xf32>
    %151 = math.exp %150 : vector<8x128xf32>
    %cst_53 = arith.constant 1.000000e+00 : f32
    %152 = vector.broadcast %cst_53 : f32 to vector<8x128xf32>
    %153 = arith.addf %152, %151 : vector<8x128xf32>
    %154 = arith.divf %152, %153 : vector<8x128xf32>
    %155 = vector.extract_strided_slice %148 {offsets = [0, 128], sizes = [8, 128], strides = [1, 1]} : vector<8x512xf32> to vector<8x128xf32>
    %156 = arith.negf %155 : vector<8x128xf32>
    %157 = math.exp %156 : vector<8x128xf32>
    %cst_54 = arith.constant 1.000000e+00 : f32
    %158 = vector.broadcast %cst_54 : f32 to vector<8x128xf32>
    %159 = arith.addf %158, %157 : vector<8x128xf32>
    %160 = arith.divf %158, %159 : vector<8x128xf32>
    %161 = vector.extract_strided_slice %148 {offsets = [0, 256], sizes = [8, 128], strides = [1, 1]} : vector<8x512xf32> to vector<8x128xf32>
    %162 = math.tanh %161 : vector<8x128xf32>
    %163 = vector.extract_strided_slice %148 {offsets = [0, 384], sizes = [8, 128], strides = [1, 1]} : vector<8x512xf32> to vector<8x128xf32>
    %164 = arith.negf %163 : vector<8x128xf32>
    %165 = math.exp %164 : vector<8x128xf32>
    %cst_55 = arith.constant 1.000000e+00 : f32
    %166 = vector.broadcast %cst_55 : f32 to vector<8x128xf32>
    %167 = arith.addf %166, %165 : vector<8x128xf32>
    %168 = arith.divf %166, %167 : vector<8x128xf32>
    %169 = arith.mulf %160, %138 : vector<8x128xf32>
    %170 = arith.mulf %154, %162 : vector<8x128xf32>
    %171 = arith.addf %169, %170 : vector<8x128xf32>
    %172 = math.tanh %171 : vector<8x128xf32>
    %173 = arith.mulf %168, %172 : vector<8x128xf32>
    %174 = arith.index_cast %143 : i32 to index
    %c0_56 = arith.constant 0 : index
    %175 = vector.load %arg15[%174, %c0_56] : memref<64x128xf32, #tpu.memory_space<vmem>>, vector<8x128xf32>
    tpu.vector_store %arg15[%174, %c0_56], %173 {strides = array<i32>} : memref<64x128xf32, #tpu.memory_space<vmem>>, vector<8x128xf32>,
    %c5_i32 = arith.constant 5 : i32
    %c8_i32_57 = arith.constant 8 : i32
    %176 = arith.muli %c5_i32, %c8_i32_57 : i32
    %177 = arith.index_cast %176 : i32 to index
    %c0_58 = arith.constant 0 : index
    %178 = vector.load %arg14[%177, %c0_58] : memref<64x512xf32, #tpu.memory_space<vmem>>, vector<8x512xf32>
    %c0_59 = arith.constant 0 : index
    %c0_60 = arith.constant 0 : index
    %179 = vector.load %arg4[%c0_59, %c0_60] : memref<128x512xf32, #tpu.memory_space<vmem>>, vector<128x512xf32>
    %cst_61 = arith.constant dense<0.000000e+00> : vector<8x512xf32>
    %180 = tpu.matmul %173, %179, %cst_61 {dimension_numbers = #tpu.dot_dimension_numbers<[1], [0], [0], [1], [0, 0, 1, 1], [], []>} : vector<8x128xf32>, vector<128x512xf32>, vector<8x512xf32> -> vector<8x512xf32>
    %181 = arith.addf %178, %180 : vector<8x512xf32>
    %182 = vector.extract_strided_slice %181 {offsets = [0, 0], sizes = [8, 128], strides = [1, 1]} : vector<8x512xf32> to vector<8x128xf32>
    %183 = arith.negf %182 : vector<8x128xf32>
    %184 = math.exp %183 : vector<8x128xf32>
    %cst_62 = arith.constant 1.000000e+00 : f32
    %185 = vector.broadcast %cst_62 : f32 to vector<8x128xf32>
    %186 = arith.addf %185, %184 : vector<8x128xf32>
    %187 = arith.divf %185, %186 : vector<8x128xf32>
    %188 = vector.extract_strided_slice %181 {offsets = [0, 128], sizes = [8, 128], strides = [1, 1]} : vector<8x512xf32> to vector<8x128xf32>
    %189 = arith.negf %188 : vector<8x128xf32>
    %190 = math.exp %189 : vector<8x128xf32>
    %cst_63 = arith.constant 1.000000e+00 : f32
    %191 = vector.broadcast %cst_63 : f32 to vector<8x128xf32>
    %192 = arith.addf %191, %190 : vector<8x128xf32>
    %193 = arith.divf %191, %192 : vector<8x128xf32>
    %194 = vector.extract_strided_slice %181 {offsets = [0, 256], sizes = [8, 128], strides = [1, 1]} : vector<8x512xf32> to vector<8x128xf32>
    %195 = math.tanh %194 : vector<8x128xf32>
    %196 = vector.extract_strided_slice %181 {offsets = [0, 384], sizes = [8, 128], strides = [1, 1]} : vector<8x512xf32> to vector<8x128xf32>
    %197 = arith.negf %196 : vector<8x128xf32>
    %198 = math.exp %197 : vector<8x128xf32>
    %cst_64 = arith.constant 1.000000e+00 : f32
    %199 = vector.broadcast %cst_64 : f32 to vector<8x128xf32>
    %200 = arith.addf %199, %198 : vector<8x128xf32>
    %201 = arith.divf %199, %200 : vector<8x128xf32>
    %202 = arith.mulf %193, %171 : vector<8x128xf32>
    %203 = arith.mulf %187, %195 : vector<8x128xf32>
    %204 = arith.addf %202, %203 : vector<8x128xf32>
    %205 = math.tanh %204 : vector<8x128xf32>
    %206 = arith.mulf %201, %205 : vector<8x128xf32>
    %207 = arith.index_cast %176 : i32 to index
    %c0_65 = arith.constant 0 : index
    %208 = vector.load %arg15[%207, %c0_65] : memref<64x128xf32, #tpu.memory_space<vmem>>, vector<8x128xf32>
    tpu.vector_store %arg15[%207, %c0_65], %206 {strides = array<i32>} : memref<64x128xf32, #tpu.memory_space<vmem>>, vector<8x128xf32>,
    %c6_i32 = arith.constant 6 : i32
    %c8_i32_66 = arith.constant 8 : i32
    %209 = arith.muli %c6_i32, %c8_i32_66 : i32
    %210 = arith.index_cast %209 : i32 to index
    %c0_67 = arith.constant 0 : index
    %211 = vector.load %arg14[%210, %c0_67] : memref<64x512xf32, #tpu.memory_space<vmem>>, vector<8x512xf32>
    %c0_68 = arith.constant 0 : index
    %c0_69 = arith.constant 0 : index
    %212 = vector.load %arg4[%c0_68, %c0_69] : memref<128x512xf32, #tpu.memory_space<vmem>>, vector<128x512xf32>
    %cst_70 = arith.constant dense<0.000000e+00> : vector<8x512xf32>
    %213 = tpu.matmul %206, %212, %cst_70 {dimension_numbers = #tpu.dot_dimension_numbers<[1], [0], [0], [1], [0, 0, 1, 1], [], []>} : vector<8x128xf32>, vector<128x512xf32>, vector<8x512xf32> -> vector<8x512xf32>
    %214 = arith.addf %211, %213 : vector<8x512xf32>
    %215 = vector.extract_strided_slice %214 {offsets = [0, 0], sizes = [8, 128], strides = [1, 1]} : vector<8x512xf32> to vector<8x128xf32>
    %216 = arith.negf %215 : vector<8x128xf32>
    %217 = math.exp %216 : vector<8x128xf32>
    %cst_71 = arith.constant 1.000000e+00 : f32
    %218 = vector.broadcast %cst_71 : f32 to vector<8x128xf32>
    %219 = arith.addf %218, %217 : vector<8x128xf32>
    %220 = arith.divf %218, %219 : vector<8x128xf32>
    %221 = vector.extract_strided_slice %214 {offsets = [0, 128], sizes = [8, 128], strides = [1, 1]} : vector<8x512xf32> to vector<8x128xf32>
    %222 = arith.negf %221 : vector<8x128xf32>
    %223 = math.exp %222 : vector<8x128xf32>
    %cst_72 = arith.constant 1.000000e+00 : f32
    %224 = vector.broadcast %cst_72 : f32 to vector<8x128xf32>
    %225 = arith.addf %224, %223 : vector<8x128xf32>
    %226 = arith.divf %224, %225 : vector<8x128xf32>
    %227 = vector.extract_strided_slice %214 {offsets = [0, 256], sizes = [8, 128], strides = [1, 1]} : vector<8x512xf32> to vector<8x128xf32>
    %228 = math.tanh %227 : vector<8x128xf32>
    %229 = vector.extract_strided_slice %214 {offsets = [0, 384], sizes = [8, 128], strides = [1, 1]} : vector<8x512xf32> to vector<8x128xf32>
    %230 = arith.negf %229 : vector<8x128xf32>
    %231 = math.exp %230 : vector<8x128xf32>
    %cst_73 = arith.constant 1.000000e+00 : f32
    %232 = vector.broadcast %cst_73 : f32 to vector<8x128xf32>
    %233 = arith.addf %232, %231 : vector<8x128xf32>
    %234 = arith.divf %232, %233 : vector<8x128xf32>
    %235 = arith.mulf %226, %204 : vector<8x128xf32>
    %236 = arith.mulf %220, %228 : vector<8x128xf32>
    %237 = arith.addf %235, %236 : vector<8x128xf32>
    %238 = math.tanh %237 : vector<8x128xf32>
    %239 = arith.mulf %234, %238 : vector<8x128xf32>
    %240 = arith.index_cast %209 : i32 to index
    %c0_74 = arith.constant 0 : index
    %241 = vector.load %arg15[%240, %c0_74] : memref<64x128xf32, #tpu.memory_space<vmem>>, vector<8x128xf32>
    tpu.vector_store %arg15[%240, %c0_74], %239 {strides = array<i32>} : memref<64x128xf32, #tpu.memory_space<vmem>>, vector<8x128xf32>,
    %c7_i32 = arith.constant 7 : i32
    %c8_i32_75 = arith.constant 8 : i32
    %242 = arith.muli %c7_i32, %c8_i32_75 : i32
    %243 = arith.index_cast %242 : i32 to index
    %c0_76 = arith.constant 0 : index
    %244 = vector.load %arg14[%243, %c0_76] : memref<64x512xf32, #tpu.memory_space<vmem>>, vector<8x512xf32>
    %c0_77 = arith.constant 0 : index
    %c0_78 = arith.constant 0 : index
    %245 = vector.load %arg4[%c0_77, %c0_78] : memref<128x512xf32, #tpu.memory_space<vmem>>, vector<128x512xf32>
    %cst_79 = arith.constant dense<0.000000e+00> : vector<8x512xf32>
    %246 = tpu.matmul %239, %245, %cst_79 {dimension_numbers = #tpu.dot_dimension_numbers<[1], [0], [0], [1], [0, 0, 1, 1], [], []>} : vector<8x128xf32>, vector<128x512xf32>, vector<8x512xf32> -> vector<8x512xf32>
    %247 = arith.addf %244, %246 : vector<8x512xf32>
    %248 = vector.extract_strided_slice %247 {offsets = [0, 0], sizes = [8, 128], strides = [1, 1]} : vector<8x512xf32> to vector<8x128xf32>
    %249 = arith.negf %248 : vector<8x128xf32>
    %250 = math.exp %249 : vector<8x128xf32>
    %cst_80 = arith.constant 1.000000e+00 : f32
    %251 = vector.broadcast %cst_80 : f32 to vector<8x128xf32>
    %252 = arith.addf %251, %250 : vector<8x128xf32>
    %253 = arith.divf %251, %252 : vector<8x128xf32>
    %254 = vector.extract_strided_slice %247 {offsets = [0, 128], sizes = [8, 128], strides = [1, 1]} : vector<8x512xf32> to vector<8x128xf32>
    %255 = arith.negf %254 : vector<8x128xf32>
    %256 = math.exp %255 : vector<8x128xf32>
    %cst_81 = arith.constant 1.000000e+00 : f32
    %257 = vector.broadcast %cst_81 : f32 to vector<8x128xf32>
    %258 = arith.addf %257, %256 : vector<8x128xf32>
    %259 = arith.divf %257, %258 : vector<8x128xf32>
    %260 = vector.extract_strided_slice %247 {offsets = [0, 256], sizes = [8, 128], strides = [1, 1]} : vector<8x512xf32> to vector<8x128xf32>
    %261 = math.tanh %260 : vector<8x128xf32>
    %262 = vector.extract_strided_slice %247 {offsets = [0, 384], sizes = [8, 128], strides = [1, 1]} : vector<8x512xf32> to vector<8x128xf32>
    %263 = arith.negf %262 : vector<8x128xf32>
    %264 = math.exp %263 : vector<8x128xf32>
    %cst_82 = arith.constant 1.000000e+00 : f32
    %265 = vector.broadcast %cst_82 : f32 to vector<8x128xf32>
    %266 = arith.addf %265, %264 : vector<8x128xf32>
    %267 = arith.divf %265, %266 : vector<8x128xf32>
    %268 = arith.mulf %259, %237 : vector<8x128xf32>
    %269 = arith.mulf %253, %261 : vector<8x128xf32>
    %270 = arith.addf %268, %269 : vector<8x128xf32>
    %271 = math.tanh %270 : vector<8x128xf32>
    %272 = arith.mulf %267, %271 : vector<8x128xf32>
    %273 = arith.index_cast %242 : i32 to index
    %c0_83 = arith.constant 0 : index
    %274 = vector.load %arg15[%273, %c0_83] : memref<64x128xf32, #tpu.memory_space<vmem>>, vector<8x128xf32>
    tpu.vector_store %arg15[%273, %c0_83], %272 {strides = array<i32>} : memref<64x128xf32, #tpu.memory_space<vmem>>, vector<8x128xf32>,
    %c8_i32_84 = arith.constant 8 : i32
    %c0_85 = arith.constant 0 : index
    %c0_86 = arith.constant 0 : index
    %c0_87 = arith.constant 0 : index
    %275 = vector.load %arg12[%c0_85, %c0_86, %c0_87] : memref<2x8x128xf32, #tpu.memory_space<vmem>>, vector<1x8x128xf32>
    %276 = vector.shape_cast %275 : vector<1x8x128xf32> to vector<8x128xf32>
    %277 = vector.shape_cast %272 : vector<8x128xf32> to vector<1x8x128xf32>
    tpu.vector_store %arg12[%c0_85, %c0_86, %c0_87], %277 {strides = array<i32>} : memref<2x8x128xf32, #tpu.memory_space<vmem>>, vector<1x8x128xf32>,
    %c0_88 = arith.constant 0 : index
    %c0_89 = arith.constant 0 : index
    %c0_90 = arith.constant 0 : index
    %278 = vector.load %arg13[%c0_88, %c0_89, %c0_90] : memref<2x8x128xf32, #tpu.memory_space<vmem>>, vector<1x8x128xf32>
    %279 = vector.shape_cast %278 : vector<1x8x128xf32> to vector<8x128xf32>
    %280 = vector.shape_cast %270 : vector<8x128xf32> to vector<1x8x128xf32>
    tpu.vector_store %arg13[%c0_88, %c0_89, %c0_90], %280 {strides = array<i32>} : memref<2x8x128xf32, #tpu.memory_space<vmem>>, vector<1x8x128xf32>,
    %c0_91 = arith.constant 0 : index
    %c0_92 = arith.constant 0 : index
    %281 = vector.load %arg15[%c0_91, %c0_92] : memref<64x128xf32, #tpu.memory_space<vmem>>, vector<64x128xf32>
    %c0_93 = arith.constant 0 : index
    %c0_94 = arith.constant 0 : index
    %282 = vector.load %arg6[%c0_93, %c0_94] : memref<128x512xf32, #tpu.memory_space<vmem>>, vector<128x512xf32>
    %cst_95 = arith.constant dense<0.000000e+00> : vector<64x512xf32>
    %283 = tpu.matmul %281, %282, %cst_95 {dimension_numbers = #tpu.dot_dimension_numbers<[1], [0], [0], [1], [0, 0, 1, 1], [], []>} : vector<64x128xf32>, vector<128x512xf32>, vector<64x512xf32> -> vector<64x512xf32>
    %c0_96 = arith.constant 0 : index
    %c0_97 = arith.constant 0 : index
    %284 = vector.load %arg8[%c0_96, %c0_97] : memref<1x512xf32, #tpu.memory_space<vmem>>, vector<1x512xf32>
    %285 = vector.broadcast %284 : vector<1x512xf32> to vector<64x512xf32>
    %286 = arith.addf %283, %285 : vector<64x512xf32>
    %c0_98 = arith.constant 0 : index
    %c0_99 = arith.constant 0 : index
    %287 = vector.load %arg14[%c0_98, %c0_99] : memref<64x512xf32, #tpu.memory_space<vmem>>, vector<64x512xf32>
    tpu.vector_store %arg14[%c0_98, %c0_99], %286 {strides = array<i32>} : memref<64x512xf32, #tpu.memory_space<vmem>>, vector<64x512xf32>,
    %c1 = arith.constant 1 : index
    %c0_100 = arith.constant 0 : index
    %c0_101 = arith.constant 0 : index
    %288 = vector.load %arg1[%c1, %c0_100, %c0_101] : memref<2x8x128xf32, #tpu.memory_space<vmem>>, vector<1x8x128xf32>
    %289 = vector.shape_cast %288 : vector<1x8x128xf32> to vector<8x128xf32>
    %c1_102 = arith.constant 1 : index
    %c0_103 = arith.constant 0 : index
    %c0_104 = arith.constant 0 : index
    %290 = vector.load %arg2[%c1_102, %c0_103, %c0_104] : memref<2x8x128xf32, #tpu.memory_space<vmem>>, vector<1x8x128xf32>
    %291 = vector.shape_cast %290 : vector<1x8x128xf32> to vector<8x128xf32>
    %c0_i32_105 = arith.constant 0 : i32
    %c8_i32_106 = arith.constant 8 : i32
    %292 = arith.muli %c0_i32_105, %c8_i32_106 : i32
    %293 = arith.index_cast %292 : i32 to index
    %c0_107 = arith.constant 0 : index
    %294 = vector.load %arg14[%293, %c0_107] : memref<64x512xf32, #tpu.memory_space<vmem>>, vector<8x512xf32>
    %c0_108 = arith.constant 0 : index
    %c0_109 = arith.constant 0 : index
    %295 = vector.load %arg7[%c0_108, %c0_109] : memref<128x512xf32, #tpu.memory_space<vmem>>, vector<128x512xf32>
    %cst_110 = arith.constant dense<0.000000e+00> : vector<8x512xf32>
    %296 = tpu.matmul %289, %295, %cst_110 {dimension_numbers = #tpu.dot_dimension_numbers<[1], [0], [0], [1], [0, 0, 1, 1], [], []>} : vector<8x128xf32>, vector<128x512xf32>, vector<8x512xf32> -> vector<8x512xf32>
    %297 = arith.addf %294, %296 : vector<8x512xf32>
    %298 = vector.extract_strided_slice %297 {offsets = [0, 0], sizes = [8, 128], strides = [1, 1]} : vector<8x512xf32> to vector<8x128xf32>
    %299 = arith.negf %298 : vector<8x128xf32>
    %300 = math.exp %299 : vector<8x128xf32>
    %cst_111 = arith.constant 1.000000e+00 : f32
    %301 = vector.broadcast %cst_111 : f32 to vector<8x128xf32>
    %302 = arith.addf %301, %300 : vector<8x128xf32>
    %303 = arith.divf %301, %302 : vector<8x128xf32>
    %304 = vector.extract_strided_slice %297 {offsets = [0, 128], sizes = [8, 128], strides = [1, 1]} : vector<8x512xf32> to vector<8x128xf32>
    %305 = arith.negf %304 : vector<8x128xf32>
    %306 = math.exp %305 : vector<8x128xf32>
    %cst_112 = arith.constant 1.000000e+00 : f32
    %307 = vector.broadcast %cst_112 : f32 to vector<8x128xf32>
    %308 = arith.addf %307, %306 : vector<8x128xf32>
    %309 = arith.divf %307, %308 : vector<8x128xf32>
    %310 = vector.extract_strided_slice %297 {offsets = [0, 256], sizes = [8, 128], strides = [1, 1]} : vector<8x512xf32> to vector<8x128xf32>
    %311 = math.tanh %310 : vector<8x128xf32>
    %312 = vector.extract_strided_slice %297 {offsets = [0, 384], sizes = [8, 128], strides = [1, 1]} : vector<8x512xf32> to vector<8x128xf32>
    %313 = arith.negf %312 : vector<8x128xf32>
    %314 = math.exp %313 : vector<8x128xf32>
    %cst_113 = arith.constant 1.000000e+00 : f32
    %315 = vector.broadcast %cst_113 : f32 to vector<8x128xf32>
    %316 = arith.addf %315, %314 : vector<8x128xf32>
    %317 = arith.divf %315, %316 : vector<8x128xf32>
    %318 = arith.mulf %309, %291 : vector<8x128xf32>
    %319 = arith.mulf %303, %311 : vector<8x128xf32>
    %320 = arith.addf %318, %319 : vector<8x128xf32>
    %321 = math.tanh %320 : vector<8x128xf32>
    %322 = arith.mulf %317, %321 : vector<8x128xf32>
    %323 = arith.index_cast %292 : i32 to index
    %c0_114 = arith.constant 0 : index
    %324 = vector.load %arg15[%323, %c0_114] : memref<64x128xf32, #tpu.memory_space<vmem>>, vector<8x128xf32>
    tpu.vector_store %arg15[%323, %c0_114], %322 {strides = array<i32>} : memref<64x128xf32, #tpu.memory_space<vmem>>, vector<8x128xf32>,
    %c1_i32_115 = arith.constant 1 : i32
    %c8_i32_116 = arith.constant 8 : i32
    %325 = arith.muli %c1_i32_115, %c8_i32_116 : i32
    %326 = arith.index_cast %325 : i32 to index
    %c0_117 = arith.constant 0 : index
    %327 = vector.load %arg14[%326, %c0_117] : memref<64x512xf32, #tpu.memory_space<vmem>>, vector<8x512xf32>
    %c0_118 = arith.constant 0 : index
    %c0_119 = arith.constant 0 : index
    %328 = vector.load %arg7[%c0_118, %c0_119] : memref<128x512xf32, #tpu.memory_space<vmem>>, vector<128x512xf32>
    %cst_120 = arith.constant dense<0.000000e+00> : vector<8x512xf32>
    %329 = tpu.matmul %322, %328, %cst_120 {dimension_numbers = #tpu.dot_dimension_numbers<[1], [0], [0], [1], [0, 0, 1, 1], [], []>} : vector<8x128xf32>, vector<128x512xf32>, vector<8x512xf32> -> vector<8x512xf32>
    %330 = arith.addf %327, %329 : vector<8x512xf32>
    %331 = vector.extract_strided_slice %330 {offsets = [0, 0], sizes = [8, 128], strides = [1, 1]} : vector<8x512xf32> to vector<8x128xf32>
    %332 = arith.negf %331 : vector<8x128xf32>
    %333 = math.exp %332 : vector<8x128xf32>
    %cst_121 = arith.constant 1.000000e+00 : f32
    %334 = vector.broadcast %cst_121 : f32 to vector<8x128xf32>
    %335 = arith.addf %334, %333 : vector<8x128xf32>
    %336 = arith.divf %334, %335 : vector<8x128xf32>
    %337 = vector.extract_strided_slice %330 {offsets = [0, 128], sizes = [8, 128], strides = [1, 1]} : vector<8x512xf32> to vector<8x128xf32>
    %338 = arith.negf %337 : vector<8x128xf32>
    %339 = math.exp %338 : vector<8x128xf32>
    %cst_122 = arith.constant 1.000000e+00 : f32
    %340 = vector.broadcast %cst_122 : f32 to vector<8x128xf32>
    %341 = arith.addf %340, %339 : vector<8x128xf32>
    %342 = arith.divf %340, %341 : vector<8x128xf32>
    %343 = vector.extract_strided_slice %330 {offsets = [0, 256], sizes = [8, 128], strides = [1, 1]} : vector<8x512xf32> to vector<8x128xf32>
    %344 = math.tanh %343 : vector<8x128xf32>
    %345 = vector.extract_strided_slice %330 {offsets = [0, 384], sizes = [8, 128], strides = [1, 1]} : vector<8x512xf32> to vector<8x128xf32>
    %346 = arith.negf %345 : vector<8x128xf32>
    %347 = math.exp %346 : vector<8x128xf32>
    %cst_123 = arith.constant 1.000000e+00 : f32
    %348 = vector.broadcast %cst_123 : f32 to vector<8x128xf32>
    %349 = arith.addf %348, %347 : vector<8x128xf32>
    %350 = arith.divf %348, %349 : vector<8x128xf32>
    %351 = arith.mulf %342, %320 : vector<8x128xf32>
    %352 = arith.mulf %336, %344 : vector<8x128xf32>
    %353 = arith.addf %351, %352 : vector<8x128xf32>
    %354 = math.tanh %353 : vector<8x128xf32>
    %355 = arith.mulf %350, %354 : vector<8x128xf32>
    %356 = arith.index_cast %325 : i32 to index
    %c0_124 = arith.constant 0 : index
    %357 = vector.load %arg15[%356, %c0_124] : memref<64x128xf32, #tpu.memory_space<vmem>>, vector<8x128xf32>
    tpu.vector_store %arg15[%356, %c0_124], %355 {strides = array<i32>} : memref<64x128xf32, #tpu.memory_space<vmem>>, vector<8x128xf32>,
    %c2_i32_125 = arith.constant 2 : i32
    %c8_i32_126 = arith.constant 8 : i32
    %358 = arith.muli %c2_i32_125, %c8_i32_126 : i32
    %359 = arith.index_cast %358 : i32 to index
    %c0_127 = arith.constant 0 : index
    %360 = vector.load %arg14[%359, %c0_127] : memref<64x512xf32, #tpu.memory_space<vmem>>, vector<8x512xf32>
    %c0_128 = arith.constant 0 : index
    %c0_129 = arith.constant 0 : index
    %361 = vector.load %arg7[%c0_128, %c0_129] : memref<128x512xf32, #tpu.memory_space<vmem>>, vector<128x512xf32>
    %cst_130 = arith.constant dense<0.000000e+00> : vector<8x512xf32>
    %362 = tpu.matmul %355, %361, %cst_130 {dimension_numbers = #tpu.dot_dimension_numbers<[1], [0], [0], [1], [0, 0, 1, 1], [], []>} : vector<8x128xf32>, vector<128x512xf32>, vector<8x512xf32> -> vector<8x512xf32>
    %363 = arith.addf %360, %362 : vector<8x512xf32>
    %364 = vector.extract_strided_slice %363 {offsets = [0, 0], sizes = [8, 128], strides = [1, 1]} : vector<8x512xf32> to vector<8x128xf32>
    %365 = arith.negf %364 : vector<8x128xf32>
    %366 = math.exp %365 : vector<8x128xf32>
    %cst_131 = arith.constant 1.000000e+00 : f32
    %367 = vector.broadcast %cst_131 : f32 to vector<8x128xf32>
    %368 = arith.addf %367, %366 : vector<8x128xf32>
    %369 = arith.divf %367, %368 : vector<8x128xf32>
    %370 = vector.extract_strided_slice %363 {offsets = [0, 128], sizes = [8, 128], strides = [1, 1]} : vector<8x512xf32> to vector<8x128xf32>
    %371 = arith.negf %370 : vector<8x128xf32>
    %372 = math.exp %371 : vector<8x128xf32>
    %cst_132 = arith.constant 1.000000e+00 : f32
    %373 = vector.broadcast %cst_132 : f32 to vector<8x128xf32>
    %374 = arith.addf %373, %372 : vector<8x128xf32>
    %375 = arith.divf %373, %374 : vector<8x128xf32>
    %376 = vector.extract_strided_slice %363 {offsets = [0, 256], sizes = [8, 128], strides = [1, 1]} : vector<8x512xf32> to vector<8x128xf32>
    %377 = math.tanh %376 : vector<8x128xf32>
    %378 = vector.extract_strided_slice %363 {offsets = [0, 384], sizes = [8, 128], strides = [1, 1]} : vector<8x512xf32> to vector<8x128xf32>
    %379 = arith.negf %378 : vector<8x128xf32>
    %380 = math.exp %379 : vector<8x128xf32>
    %cst_133 = arith.constant 1.000000e+00 : f32
    %381 = vector.broadcast %cst_133 : f32 to vector<8x128xf32>
    %382 = arith.addf %381, %380 : vector<8x128xf32>
    %383 = arith.divf %381, %382 : vector<8x128xf32>
    %384 = arith.mulf %375, %353 : vector<8x128xf32>
    %385 = arith.mulf %369, %377 : vector<8x128xf32>
    %386 = arith.addf %384, %385 : vector<8x128xf32>
    %387 = math.tanh %386 : vector<8x128xf32>
    %388 = arith.mulf %383, %387 : vector<8x128xf32>
    %389 = arith.index_cast %358 : i32 to index
    %c0_134 = arith.constant 0 : index
    %390 = vector.load %arg15[%389, %c0_134] : memref<64x128xf32, #tpu.memory_space<vmem>>, vector<8x128xf32>
    tpu.vector_store %arg15[%389, %c0_134], %388 {strides = array<i32>} : memref<64x128xf32, #tpu.memory_space<vmem>>, vector<8x128xf32>,
    %c3_i32_135 = arith.constant 3 : i32
    %c8_i32_136 = arith.constant 8 : i32
    %391 = arith.muli %c3_i32_135, %c8_i32_136 : i32
    %392 = arith.index_cast %391 : i32 to index
    %c0_137 = arith.constant 0 : index
    %393 = vector.load %arg14[%392, %c0_137] : memref<64x512xf32, #tpu.memory_space<vmem>>, vector<8x512xf32>
    %c0_138 = arith.constant 0 : index
    %c0_139 = arith.constant 0 : index
    %394 = vector.load %arg7[%c0_138, %c0_139] : memref<128x512xf32, #tpu.memory_space<vmem>>, vector<128x512xf32>
    %cst_140 = arith.constant dense<0.000000e+00> : vector<8x512xf32>
    %395 = tpu.matmul %388, %394, %cst_140 {dimension_numbers = #tpu.dot_dimension_numbers<[1], [0], [0], [1], [0, 0, 1, 1], [], []>} : vector<8x128xf32>, vector<128x512xf32>, vector<8x512xf32> -> vector<8x512xf32>
    %396 = arith.addf %393, %395 : vector<8x512xf32>
    %397 = vector.extract_strided_slice %396 {offsets = [0, 0], sizes = [8, 128], strides = [1, 1]} : vector<8x512xf32> to vector<8x128xf32>
    %398 = arith.negf %397 : vector<8x128xf32>
    %399 = math.exp %398 : vector<8x128xf32>
    %cst_141 = arith.constant 1.000000e+00 : f32
    %400 = vector.broadcast %cst_141 : f32 to vector<8x128xf32>
    %401 = arith.addf %400, %399 : vector<8x128xf32>
    %402 = arith.divf %400, %401 : vector<8x128xf32>
    %403 = vector.extract_strided_slice %396 {offsets = [0, 128], sizes = [8, 128], strides = [1, 1]} : vector<8x512xf32> to vector<8x128xf32>
    %404 = arith.negf %403 : vector<8x128xf32>
    %405 = math.exp %404 : vector<8x128xf32>
    %cst_142 = arith.constant 1.000000e+00 : f32
    %406 = vector.broadcast %cst_142 : f32 to vector<8x128xf32>
    %407 = arith.addf %406, %405 : vector<8x128xf32>
    %408 = arith.divf %406, %407 : vector<8x128xf32>
    %409 = vector.extract_strided_slice %396 {offsets = [0, 256], sizes = [8, 128], strides = [1, 1]} : vector<8x512xf32> to vector<8x128xf32>
    %410 = math.tanh %409 : vector<8x128xf32>
    %411 = vector.extract_strided_slice %396 {offsets = [0, 384], sizes = [8, 128], strides = [1, 1]} : vector<8x512xf32> to vector<8x128xf32>
    %412 = arith.negf %411 : vector<8x128xf32>
    %413 = math.exp %412 : vector<8x128xf32>
    %cst_143 = arith.constant 1.000000e+00 : f32
    %414 = vector.broadcast %cst_143 : f32 to vector<8x128xf32>
    %415 = arith.addf %414, %413 : vector<8x128xf32>
    %416 = arith.divf %414, %415 : vector<8x128xf32>
    %417 = arith.mulf %408, %386 : vector<8x128xf32>
    %418 = arith.mulf %402, %410 : vector<8x128xf32>
    %419 = arith.addf %417, %418 : vector<8x128xf32>
    %420 = math.tanh %419 : vector<8x128xf32>
    %421 = arith.mulf %416, %420 : vector<8x128xf32>
    %422 = arith.index_cast %391 : i32 to index
    %c0_144 = arith.constant 0 : index
    %423 = vector.load %arg15[%422, %c0_144] : memref<64x128xf32, #tpu.memory_space<vmem>>, vector<8x128xf32>
    tpu.vector_store %arg15[%422, %c0_144], %421 {strides = array<i32>} : memref<64x128xf32, #tpu.memory_space<vmem>>, vector<8x128xf32>,
    %c4_i32_145 = arith.constant 4 : i32
    %c8_i32_146 = arith.constant 8 : i32
    %424 = arith.muli %c4_i32_145, %c8_i32_146 : i32
    %425 = arith.index_cast %424 : i32 to index
    %c0_147 = arith.constant 0 : index
    %426 = vector.load %arg14[%425, %c0_147] : memref<64x512xf32, #tpu.memory_space<vmem>>, vector<8x512xf32>
    %c0_148 = arith.constant 0 : index
    %c0_149 = arith.constant 0 : index
    %427 = vector.load %arg7[%c0_148, %c0_149] : memref<128x512xf32, #tpu.memory_space<vmem>>, vector<128x512xf32>
    %cst_150 = arith.constant dense<0.000000e+00> : vector<8x512xf32>
    %428 = tpu.matmul %421, %427, %cst_150 {dimension_numbers = #tpu.dot_dimension_numbers<[1], [0], [0], [1], [0, 0, 1, 1], [], []>} : vector<8x128xf32>, vector<128x512xf32>, vector<8x512xf32> -> vector<8x512xf32>
    %429 = arith.addf %426, %428 : vector<8x512xf32>
    %430 = vector.extract_strided_slice %429 {offsets = [0, 0], sizes = [8, 128], strides = [1, 1]} : vector<8x512xf32> to vector<8x128xf32>
    %431 = arith.negf %430 : vector<8x128xf32>
    %432 = math.exp %431 : vector<8x128xf32>
    %cst_151 = arith.constant 1.000000e+00 : f32
    %433 = vector.broadcast %cst_151 : f32 to vector<8x128xf32>
    %434 = arith.addf %433, %432 : vector<8x128xf32>
    %435 = arith.divf %433, %434 : vector<8x128xf32>
    %436 = vector.extract_strided_slice %429 {offsets = [0, 128], sizes = [8, 128], strides = [1, 1]} : vector<8x512xf32> to vector<8x128xf32>
    %437 = arith.negf %436 : vector<8x128xf32>
    %438 = math.exp %437 : vector<8x128xf32>
    %cst_152 = arith.constant 1.000000e+00 : f32
    %439 = vector.broadcast %cst_152 : f32 to vector<8x128xf32>
    %440 = arith.addf %439, %438 : vector<8x128xf32>
    %441 = arith.divf %439, %440 : vector<8x128xf32>
    %442 = vector.extract_strided_slice %429 {offsets = [0, 256], sizes = [8, 128], strides = [1, 1]} : vector<8x512xf32> to vector<8x128xf32>
    %443 = math.tanh %442 : vector<8x128xf32>
    %444 = vector.extract_strided_slice %429 {offsets = [0, 384], sizes = [8, 128], strides = [1, 1]} : vector<8x512xf32> to vector<8x128xf32>
    %445 = arith.negf %444 : vector<8x128xf32>
    %446 = math.exp %445 : vector<8x128xf32>
    %cst_153 = arith.constant 1.000000e+00 : f32
    %447 = vector.broadcast %cst_153 : f32 to vector<8x128xf32>
    %448 = arith.addf %447, %446 : vector<8x128xf32>
    %449 = arith.divf %447, %448 : vector<8x128xf32>
    %450 = arith.mulf %441, %419 : vector<8x128xf32>
    %451 = arith.mulf %435, %443 : vector<8x128xf32>
    %452 = arith.addf %450, %451 : vector<8x128xf32>
    %453 = math.tanh %452 : vector<8x128xf32>
    %454 = arith.mulf %449, %453 : vector<8x128xf32>
    %455 = arith.index_cast %424 : i32 to index
    %c0_154 = arith.constant 0 : index
    %456 = vector.load %arg15[%455, %c0_154] : memref<64x128xf32, #tpu.memory_space<vmem>>, vector<8x128xf32>
    tpu.vector_store %arg15[%455, %c0_154], %454 {strides = array<i32>} : memref<64x128xf32, #tpu.memory_space<vmem>>, vector<8x128xf32>,
    %c5_i32_155 = arith.constant 5 : i32
    %c8_i32_156 = arith.constant 8 : i32
    %457 = arith.muli %c5_i32_155, %c8_i32_156 : i32
    %458 = arith.index_cast %457 : i32 to index
    %c0_157 = arith.constant 0 : index
    %459 = vector.load %arg14[%458, %c0_157] : memref<64x512xf32, #tpu.memory_space<vmem>>, vector<8x512xf32>
    %c0_158 = arith.constant 0 : index
    %c0_159 = arith.constant 0 : index
    %460 = vector.load %arg7[%c0_158, %c0_159] : memref<128x512xf32, #tpu.memory_space<vmem>>, vector<128x512xf32>
    %cst_160 = arith.constant dense<0.000000e+00> : vector<8x512xf32>
    %461 = tpu.matmul %454, %460, %cst_160 {dimension_numbers = #tpu.dot_dimension_numbers<[1], [0], [0], [1], [0, 0, 1, 1], [], []>} : vector<8x128xf32>, vector<128x512xf32>, vector<8x512xf32> -> vector<8x512xf32>
    %462 = arith.addf %459, %461 : vector<8x512xf32>
    %463 = vector.extract_strided_slice %462 {offsets = [0, 0], sizes = [8, 128], strides = [1, 1]} : vector<8x512xf32> to vector<8x128xf32>
    %464 = arith.negf %463 : vector<8x128xf32>
    %465 = math.exp %464 : vector<8x128xf32>
    %cst_161 = arith.constant 1.000000e+00 : f32
    %466 = vector.broadcast %cst_161 : f32 to vector<8x128xf32>
    %467 = arith.addf %466, %465 : vector<8x128xf32>
    %468 = arith.divf %466, %467 : vector<8x128xf32>
    %469 = vector.extract_strided_slice %462 {offsets = [0, 128], sizes = [8, 128], strides = [1, 1]} : vector<8x512xf32> to vector<8x128xf32>
    %470 = arith.negf %469 : vector<8x128xf32>
    %471 = math.exp %470 : vector<8x128xf32>
    %cst_162 = arith.constant 1.000000e+00 : f32
    %472 = vector.broadcast %cst_162 : f32 to vector<8x128xf32>
    %473 = arith.addf %472, %471 : vector<8x128xf32>
    %474 = arith.divf %472, %473 : vector<8x128xf32>
    %475 = vector.extract_strided_slice %462 {offsets = [0, 256], sizes = [8, 128], strides = [1, 1]} : vector<8x512xf32> to vector<8x128xf32>
    %476 = math.tanh %475 : vector<8x128xf32>
    %477 = vector.extract_strided_slice %462 {offsets = [0, 384], sizes = [8, 128], strides = [1, 1]} : vector<8x512xf32> to vector<8x128xf32>
    %478 = arith.negf %477 : vector<8x128xf32>
    %479 = math.exp %478 : vector<8x128xf32>
    %cst_163 = arith.constant 1.000000e+00 : f32
    %480 = vector.broadcast %cst_163 : f32 to vector<8x128xf32>
    %481 = arith.addf %480, %479 : vector<8x128xf32>
    %482 = arith.divf %480, %481 : vector<8x128xf32>
    %483 = arith.mulf %474, %452 : vector<8x128xf32>
    %484 = arith.mulf %468, %476 : vector<8x128xf32>
    %485 = arith.addf %483, %484 : vector<8x128xf32>
    %486 = math.tanh %485 : vector<8x128xf32>
    %487 = arith.mulf %482, %486 : vector<8x128xf32>
    %488 = arith.index_cast %457 : i32 to index
    %c0_164 = arith.constant 0 : index
    %489 = vector.load %arg15[%488, %c0_164] : memref<64x128xf32, #tpu.memory_space<vmem>>, vector<8x128xf32>
    tpu.vector_store %arg15[%488, %c0_164], %487 {strides = array<i32>} : memref<64x128xf32, #tpu.memory_space<vmem>>, vector<8x128xf32>,
    %c6_i32_165 = arith.constant 6 : i32
    %c8_i32_166 = arith.constant 8 : i32
    %490 = arith.muli %c6_i32_165, %c8_i32_166 : i32
    %491 = arith.index_cast %490 : i32 to index
    %c0_167 = arith.constant 0 : index
    %492 = vector.load %arg14[%491, %c0_167] : memref<64x512xf32, #tpu.memory_space<vmem>>, vector<8x512xf32>
    %c0_168 = arith.constant 0 : index
    %c0_169 = arith.constant 0 : index
    %493 = vector.load %arg7[%c0_168, %c0_169] : memref<128x512xf32, #tpu.memory_space<vmem>>, vector<128x512xf32>
    %cst_170 = arith.constant dense<0.000000e+00> : vector<8x512xf32>
    %494 = tpu.matmul %487, %493, %cst_170 {dimension_numbers = #tpu.dot_dimension_numbers<[1], [0], [0], [1], [0, 0, 1, 1], [], []>} : vector<8x128xf32>, vector<128x512xf32>, vector<8x512xf32> -> vector<8x512xf32>
    %495 = arith.addf %492, %494 : vector<8x512xf32>
    %496 = vector.extract_strided_slice %495 {offsets = [0, 0], sizes = [8, 128], strides = [1, 1]} : vector<8x512xf32> to vector<8x128xf32>
    %497 = arith.negf %496 : vector<8x128xf32>
    %498 = math.exp %497 : vector<8x128xf32>
    %cst_171 = arith.constant 1.000000e+00 : f32
    %499 = vector.broadcast %cst_171 : f32 to vector<8x128xf32>
    %500 = arith.addf %499, %498 : vector<8x128xf32>
    %501 = arith.divf %499, %500 : vector<8x128xf32>
    %502 = vector.extract_strided_slice %495 {offsets = [0, 128], sizes = [8, 128], strides = [1, 1]} : vector<8x512xf32> to vector<8x128xf32>
    %503 = arith.negf %502 : vector<8x128xf32>
    %504 = math.exp %503 : vector<8x128xf32>
    %cst_172 = arith.constant 1.000000e+00 : f32
    %505 = vector.broadcast %cst_172 : f32 to vector<8x128xf32>
    %506 = arith.addf %505, %504 : vector<8x128xf32>
    %507 = arith.divf %505, %506 : vector<8x128xf32>
    %508 = vector.extract_strided_slice %495 {offsets = [0, 256], sizes = [8, 128], strides = [1, 1]} : vector<8x512xf32> to vector<8x128xf32>
    %509 = math.tanh %508 : vector<8x128xf32>
    %510 = vector.extract_strided_slice %495 {offsets = [0, 384], sizes = [8, 128], strides = [1, 1]} : vector<8x512xf32> to vector<8x128xf32>
    %511 = arith.negf %510 : vector<8x128xf32>
    %512 = math.exp %511 : vector<8x128xf32>
    %cst_173 = arith.constant 1.000000e+00 : f32
    %513 = vector.broadcast %cst_173 : f32 to vector<8x128xf32>
    %514 = arith.addf %513, %512 : vector<8x128xf32>
    %515 = arith.divf %513, %514 : vector<8x128xf32>
    %516 = arith.mulf %507, %485 : vector<8x128xf32>
    %517 = arith.mulf %501, %509 : vector<8x128xf32>
    %518 = arith.addf %516, %517 : vector<8x128xf32>
    %519 = math.tanh %518 : vector<8x128xf32>
    %520 = arith.mulf %515, %519 : vector<8x128xf32>
    %521 = arith.index_cast %490 : i32 to index
    %c0_174 = arith.constant 0 : index
    %522 = vector.load %arg15[%521, %c0_174] : memref<64x128xf32, #tpu.memory_space<vmem>>, vector<8x128xf32>
    tpu.vector_store %arg15[%521, %c0_174], %520 {strides = array<i32>} : memref<64x128xf32, #tpu.memory_space<vmem>>, vector<8x128xf32>,
    %c7_i32_175 = arith.constant 7 : i32
    %c8_i32_176 = arith.constant 8 : i32
    %523 = arith.muli %c7_i32_175, %c8_i32_176 : i32
    %524 = arith.index_cast %523 : i32 to index
    %c0_177 = arith.constant 0 : index
    %525 = vector.load %arg14[%524, %c0_177] : memref<64x512xf32, #tpu.memory_space<vmem>>, vector<8x512xf32>
    %c0_178 = arith.constant 0 : index
    %c0_179 = arith.constant 0 : index
    %526 = vector.load %arg7[%c0_178, %c0_179] : memref<128x512xf32, #tpu.memory_space<vmem>>, vector<128x512xf32>
    %cst_180 = arith.constant dense<0.000000e+00> : vector<8x512xf32>
    %527 = tpu.matmul %520, %526, %cst_180 {dimension_numbers = #tpu.dot_dimension_numbers<[1], [0], [0], [1], [0, 0, 1, 1], [], []>} : vector<8x128xf32>, vector<128x512xf32>, vector<8x512xf32> -> vector<8x512xf32>
    %528 = arith.addf %525, %527 : vector<8x512xf32>
    %529 = vector.extract_strided_slice %528 {offsets = [0, 0], sizes = [8, 128], strides = [1, 1]} : vector<8x512xf32> to vector<8x128xf32>
    %530 = arith.negf %529 : vector<8x128xf32>
    %531 = math.exp %530 : vector<8x128xf32>
    %cst_181 = arith.constant 1.000000e+00 : f32
    %532 = vector.broadcast %cst_181 : f32 to vector<8x128xf32>
    %533 = arith.addf %532, %531 : vector<8x128xf32>
    %534 = arith.divf %532, %533 : vector<8x128xf32>
    %535 = vector.extract_strided_slice %528 {offsets = [0, 128], sizes = [8, 128], strides = [1, 1]} : vector<8x512xf32> to vector<8x128xf32>
    %536 = arith.negf %535 : vector<8x128xf32>
    %537 = math.exp %536 : vector<8x128xf32>
    %cst_182 = arith.constant 1.000000e+00 : f32
    %538 = vector.broadcast %cst_182 : f32 to vector<8x128xf32>
    %539 = arith.addf %538, %537 : vector<8x128xf32>
    %540 = arith.divf %538, %539 : vector<8x128xf32>
    %541 = vector.extract_strided_slice %528 {offsets = [0, 256], sizes = [8, 128], strides = [1, 1]} : vector<8x512xf32> to vector<8x128xf32>
    %542 = math.tanh %541 : vector<8x128xf32>
    %543 = vector.extract_strided_slice %528 {offsets = [0, 384], sizes = [8, 128], strides = [1, 1]} : vector<8x512xf32> to vector<8x128xf32>
    %544 = arith.negf %543 : vector<8x128xf32>
    %545 = math.exp %544 : vector<8x128xf32>
    %cst_183 = arith.constant 1.000000e+00 : f32
    %546 = vector.broadcast %cst_183 : f32 to vector<8x128xf32>
    %547 = arith.addf %546, %545 : vector<8x128xf32>
    %548 = arith.divf %546, %547 : vector<8x128xf32>
    %549 = arith.mulf %540, %518 : vector<8x128xf32>
    %550 = arith.mulf %534, %542 : vector<8x128xf32>
    %551 = arith.addf %549, %550 : vector<8x128xf32>
    %552 = math.tanh %551 : vector<8x128xf32>
    %553 = arith.mulf %548, %552 : vector<8x128xf32>
    %554 = arith.index_cast %523 : i32 to index
    %c0_184 = arith.constant 0 : index
    %555 = vector.load %arg15[%554, %c0_184] : memref<64x128xf32, #tpu.memory_space<vmem>>, vector<8x128xf32>
    tpu.vector_store %arg15[%554, %c0_184], %553 {strides = array<i32>} : memref<64x128xf32, #tpu.memory_space<vmem>>, vector<8x128xf32>,
    %c8_i32_185 = arith.constant 8 : i32
    %c1_186 = arith.constant 1 : index
    %c0_187 = arith.constant 0 : index
    %c0_188 = arith.constant 0 : index
    %556 = vector.load %arg12[%c1_186, %c0_187, %c0_188] : memref<2x8x128xf32, #tpu.memory_space<vmem>>, vector<1x8x128xf32>
    %557 = vector.shape_cast %556 : vector<1x8x128xf32> to vector<8x128xf32>
    %558 = vector.shape_cast %553 : vector<8x128xf32> to vector<1x8x128xf32>
    tpu.vector_store %arg12[%c1_186, %c0_187, %c0_188], %558 {strides = array<i32>} : memref<2x8x128xf32, #tpu.memory_space<vmem>>, vector<1x8x128xf32>,
    %c1_189 = arith.constant 1 : index
    %c0_190 = arith.constant 0 : index
    %c0_191 = arith.constant 0 : index
    %559 = vector.load %arg13[%c1_189, %c0_190, %c0_191] : memref<2x8x128xf32, #tpu.memory_space<vmem>>, vector<1x8x128xf32>
    %560 = vector.shape_cast %559 : vector<1x8x128xf32> to vector<8x128xf32>
    %561 = vector.shape_cast %551 : vector<8x128xf32> to vector<1x8x128xf32>
    tpu.vector_store %arg13[%c1_189, %c0_190, %c0_191], %561 {strides = array<i32>} : memref<2x8x128xf32, #tpu.memory_space<vmem>>, vector<1x8x128xf32>,
    %c0_192 = arith.constant 0 : index
    %c0_193 = arith.constant 0 : index
    %562 = vector.load %arg15[%c0_192, %c0_193] : memref<64x128xf32, #tpu.memory_space<vmem>>, vector<64x128xf32>
    %c0_194 = arith.constant 0 : index
    %c0_195 = arith.constant 0 : index
    %563 = vector.load %arg9[%c0_194, %c0_195] : memref<128x128xf32, #tpu.memory_space<vmem>>, vector<128x128xf32>
    %cst_196 = arith.constant dense<0.000000e+00> : vector<64x128xf32>
    %564 = tpu.matmul %562, %563, %cst_196 {dimension_numbers = #tpu.dot_dimension_numbers<[1], [0], [0], [1], [0, 0, 1, 1], [], []>} : vector<64x128xf32>, vector<128x128xf32>, vector<64x128xf32> -> vector<64x128xf32>
    %c0_197 = arith.constant 0 : index
    %c0_198 = arith.constant 0 : index
    %565 = vector.load %arg10[%c0_197, %c0_198] : memref<1x128xf32, #tpu.memory_space<vmem>>, vector<1x128xf32>
    %566 = vector.broadcast %565 : vector<1x128xf32> to vector<64x128xf32>
    %567 = arith.addf %564, %566 : vector<64x128xf32>
    %c0_199 = arith.constant 0 : index
    %c0_200 = arith.constant 0 : index
    %568 = vector.load %arg11[%c0_199, %c0_200] : memref<64x128xf32, #tpu.memory_space<vmem>>, vector<64x128xf32>
    tpu.vector_store %arg11[%c0_199, %c0_200], %567 {strides = array<i32>} : memref<64x128xf32, #tpu.memory_space<vmem>>, vector<64x128xf32>,
    return
  }
}

</mosaic_0001>

<bundles_post_ra>
// kernel: char_rnn_forward.1
= control target key start
LH: loop header
LB: loop body
LE: loop exit
PB: predicated region body
PF: predicated region fallthrough
CT: control target
= control target key end

     0   :  { %19 = vsyncpa [#allocation5], 0  ;;  %s7495_s0 = inlined_call_operand.vmem [shape: f32[64,128], index: 0, kind: input, shape index: {}]   ;;  %s7496_s1 = inlined_call_operand.vmem [shape: f32[2,8,128], index: 1, kind: input, shape index: {}]   ;;  %s7497_s2 = inlined_call_operand.vmem [shape: f32[2,8,128], index: 2, kind: input, shape index: {}]   ;;  %s7498_s3 = inlined_call_operand.hbm [shape: f32[128,512], index: 3, kind: input, shape index: {}]   ;;  %s7499_s4 = inlined_call_operand.hbm [shape: f32[128,512], index: 4, kind: input, shape index: {}]   ;;  %s7500_s5 = inlined_call_operand.vmem [shape: f32[1,512], index: 5, kind: input, shape index: {}]   ;;  %s7501_s6 = inlined_call_operand.hbm [shape: f32[128,512], index: 6, kind: input, shape index: {}]   ;;  %s7502_s7 = inlined_call_operand.hbm [shape: f32[128,512], index: 7, kind: input, shape index: {}]   ;;  %s7503_s8 = inlined_call_operand.vmem [shape: f32[1,512], index: 8, kind: input, shape index: {}]   ;;  %s7504_s9 = inlined_call_operand.vmem [shape: f32[128,128], index: 9, kind: input, shape index: {}]   ;;  %s7505_s10 = inlined_call_operand.vmem [shape: f32[1,128], index: 10, kind: input, shape index: {}]   ;;  %s7506_s11 = inlined_call_operand.vmem [shape: f32[64,128], index: 11, kind: output, shape index: {0}]   ;;  %s7507_s12 = inlined_call_operand.vmem [shape: f32[2,8,128], index: 12, kind: output, shape index: {1}]   ;;  %s7508_s13 = inlined_call_operand.vmem [shape: f32[2,8,128], index: 13, kind: output, shape index: {2}]  }
   0x1   :  { %20 = vsyncpa [#allocation7], 0 }
   0x2   :  { %21 = vsyncpa [#allocation10], 0  ;;  %s5265_s25 = smov [#allocation6]   ;;  %s5266_s27 = smov [#allocation4]  }
   0x3   :  { %s45_s26 = sshll.u32 %s5265_s25, 4  ;;  %s33_s28 = sshll.u32 %s5266_s27, 4  ;;  %s46_s26 = int_to_ptr.vmem [resolvable:$true] %s45_s26  ;;  %s34_s28 = int_to_ptr.vmem [resolvable:$true] %s33_s28 }
   0x4   :  { %s5187_s29 = scalar_lea.vmem %s46_s26, 8192  ;;  %p5192_p1 = scmp.lt.s32.totalorder %s46_s26, %s46_s26 }
   0x5   :  { %p5188_p0 = scmp.ne.s32.totalorder %s46_s26, %s5187_s29  ;;  %p5193_p2 = scmp.lt.s32.totalorder %s5187_s29, %s5187_s29 }
   0x7   :  { %p5194_p3 = por %p5193_p2, %p5192_p1 }
   0x9   :  { %p5195_p4 = pnand %p5194_p3, %p5188_p0 }
   0xb   :  { %5198 = shalt.err (!%p5195_p4)
}
   0xc   :  { %s5267_s30 = smov 512   ;;  %s5268_s14 = smov 32  }
   0xd   :  { %51 = dma.hbm_to_vmem [thread:$0]  %s7499_s4, 8192, %s46_s26, [#allocation7], %s5267_s30, %s5267_s30, %s5268_s14  }
   0xe   :  { %s5207_s17 = scalar_lea.vmem %s34_s28, 8192  ;;  %p5212_p6 = scmp.lt.s32.totalorder %s34_s28, %s34_s28 }
   0xf   :  { %p5208_p5 = scmp.ne.s32.totalorder %s34_s28, %s5207_s17  ;;  %p5213_p7 = scmp.lt.s32.totalorder %s5207_s17, %s5207_s17 }
  0x11   :  { %p5214_p8 = por %p5213_p7, %p5212_p6 }
  0x13   :  { %p5215_p9 = pnand %p5214_p8, %p5208_p5 }
  0x15   :  { %5218 = shalt.err (!%p5215_p9)
}
  0x16   :  { %39 = dma.hbm_to_vmem [thread:$0]  %s7498_s3, 8192, %s34_s28, [#allocation5], %s5267_s30, %s5267_s30, %s5268_s14  }
  0x17   :  { %s5269_s20 = smov [#allocation8]   ;;  %s5270_s22 = smov [#allocation9]  }
  0x18   :  { %s59_s21 = sshll.u32 %s5269_s20, 4  ;;  %s71_s23 = sshll.u32 %s5270_s22, 4  ;;  %s60_s21 = int_to_ptr.vmem [resolvable:$true] %s59_s21  ;;  %s72_s23 = int_to_ptr.vmem [resolvable:$true] %s71_s23 }
  0x19   :  { %s5227_s4 = scalar_lea.vmem %s60_s21, 8192  ;;  %p5232_p11 = scmp.lt.s32.totalorder %s60_s21, %s60_s21 }
  0x1a   :  { %p5228_p10 = scmp.ne.s32.totalorder %s60_s21, %s5227_s4  ;;  %p5233_p12 = scmp.lt.s32.totalorder %s5227_s4, %s5227_s4 }
  0x1c   :  { %p5234_p13 = por %p5233_p12, %p5232_p11 }
  0x1e   :  { %p5235_p0 = pnand %p5234_p13, %p5228_p10 }
  0x20   :  { %5238 = shalt.err (!%p5235_p0)
}
  0x21   :  { %65 = dma.hbm_to_vmem [thread:$0]  %s7501_s6, 8192, %s60_s21, [#allocation7], %s5267_s30, %s5267_s30, %s5268_s14  }
  0x22   :  { %s5247_s3 = scalar_lea.vmem %s72_s23, 8192  ;;  %p5252_p2 = scmp.lt.s32.totalorder %s72_s23, %s72_s23 }
  0x23   :  { %p5248_p1 = scmp.ne.s32.totalorder %s72_s23, %s5247_s3  ;;  %p5253_p3 = scmp.lt.s32.totalorder %s5247_s3, %s5247_s3 }
  0x25   :  { %p5254_p4 = por %p5253_p3, %p5252_p2 }
  0x27   :  { %p5255_p5 = pnand %p5254_p4, %p5248_p1 }
  0x29   :  { %5258 = shalt.err (!%p5255_p5)
}
  0x2a   :  { %77 = dma.hbm_to_vmem [thread:$0]  %s7502_s7, 8192, %s72_s23, [#allocation10], %s5267_s30, %s5267_s30, %s5268_s14  }
  0x2b   :  { %5259 = dma.done.wait [#allocation5], 8192  }
  0x2c   :  { %5260 = vsyncadd [#allocation5], 4294959104 }
  0x2d   :  { %5261 = dma.done.wait [#allocation7], 16384  }
  0x2e   :  { %5262 = vsyncadd [#allocation7], 4294950912 }
  0x2f   :  { %5263 = dma.done.wait [#allocation10], 8192  }
  0x30   :  { %5264 = vsyncadd [#allocation10], 4294959104  ;;  %v7511_v0 = vmov 0.0   ;;  %v165_v1 = vld [vmem:[#allocation4 + $0x1e8] sm:$0xff]  ;;  %v164_v2 = vld [vmem:[#allocation4 + $0x1e0] sm:$0xff] }
  0x31   :  { %254 = vmatprep.mubr.f32.mxu1 %v7511_v0  ;;  %582 = vmatprep.mubr.f32.mxu0 %v7511_v0  ;;  %v161_v3 = vld [vmem:[#allocation4 + $0x1c8] sm:$0xff]  ;;  %v160_v5 = vld [vmem:[#allocation4 + $0x1c0] sm:$0xff] }
  0x32   :  { %190 = vmatprep.subr.mxu1 %v165_v1  ;;  %v5368_v4 = vld [vmem:[#allocation6 + $0x1e8] sm:$0xff]  ;;  %v5370_v6 = vld [vmem:[#allocation6 + $0x1e0] sm:$0xff] }
  0x33   :  { %191 = vmatpush1.msra.mxu1 %v164_v2  ;;  %518 = vmatprep.subr.mxu0 %v5368_v4  ;;  %v157_v7 = vld [vmem:[#allocation4 + $0x1a8] sm:$0xff]  ;;  %v156_v9 = vld [vmem:[#allocation4 + $0x1a0] sm:$0xff]  ;;  %v167_v2 = vld [vmem:[#allocation4 + $0x1f8] sm:$0xff] }
  0x34   :  { %v5373_v8 = vld [vmem:[#allocation6 + $0x1c8] sm:$0xff]  ;;  %192 = vmatprep.subr.mxu1 %v161_v3  ;;  %519 = vmatpush1.msra.mxu0 %v5370_v6  ;;  %v5376_v10 = vld [vmem:[#allocation6 + $0x1c0] sm:$0xff]  ;;  %v166_v3 = vld [vmem:[#allocation4 + $0x1f0] sm:$0xff] }
  0x35   :  { %v5378_v11 = vld [vmem:[#allocation6 + $0x1a8] sm:$0xff]  ;;  %193 = vmatpush1.msra.mxu1 %v160_v5  ;;  %520 = vmatprep.subr.mxu0 %v5373_v8  ;;  %v5381_v13 = vld [vmem:[#allocation6 + $0x1a0] sm:$0xff] }
  0x36   :  { %v153_v12 = vld [vmem:[#allocation4 + $0x188] sm:$0xff]  ;;  %194 = vmatprep.subr.mxu1 %v157_v7  ;;  %521 = vmatpush1.msra.mxu0 %v5376_v10  ;;  %v152_v14 = vld [vmem:[#allocation4 + $0x180] sm:$0xff]  ;;  %v163_v7 = vld [vmem:[#allocation4 + $0x1d8] sm:$0xff] }
  0x37   :  { %v5384_v15 = vld [vmem:[#allocation6 + $0x188] sm:$0xff]  ;;  %195 = vmatpush1.msra.mxu1 %v156_v9  ;;  %522 = vmatprep.subr.mxu0 %v5378_v11  ;;  %v5387_v17 = vld [vmem:[#allocation6 + $0x180] sm:$0xff] }
  0x38   :  { %v149_v16 = vld [vmem:[#allocation4 + $0x168] sm:$0xff]  ;;  %196 = vmatprep.subr.mxu1 %v153_v12  ;;  %523 = vmatpush1.msra.mxu0 %v5381_v13  ;;  %v148_v18 = vld [vmem:[#allocation4 + $0x160] sm:$0xff]  ;;  %v162_v12 = vld [vmem:[#allocation4 + $0x1d0] sm:$0xff] }
  0x39   :  { %v5390_v19 = vld [vmem:[#allocation6 + $0x168] sm:$0xff]  ;;  %197 = vmatpush1.msra.mxu1 %v152_v14  ;;  %524 = vmatprep.subr.mxu0 %v5384_v15  ;;  %v5393_v21 = vld [vmem:[#allocation6 + $0x160] sm:$0xff] }
  0x3a   :  { %v145_v20 = vld [vmem:[#allocation4 + $0x148] sm:$0xff]  ;;  %198 = vmatprep.subr.mxu1 %v149_v16  ;;  %525 = vmatpush1.msra.mxu0 %v5387_v17  ;;  %v144_v22 = vld [vmem:[#allocation4 + $0x140] sm:$0xff]  ;;  %v159_v16 = vld [vmem:[#allocation4 + $0x1b8] sm:$0xff] }
  0x3b   :  { %v5396_v23 = vld [vmem:[#allocation6 + $0x148] sm:$0xff]  ;;  %199 = vmatpush1.msra.mxu1 %v148_v18  ;;  %526 = vmatprep.subr.mxu0 %v5390_v19  ;;  %v5399_v25 = vld [vmem:[#allocation6 + $0x140] sm:$0xff]  ;;  %v158_v18 = vld [vmem:[#allocation4 + $0x1b0] sm:$0xff] }
  0x3c   :  { %v141_v24 = vld [vmem:[#allocation4 + $0x128] sm:$0xff]  ;;  %200 = vmatprep.subr.mxu1 %v145_v20  ;;  %527 = vmatpush1.msra.mxu0 %v5393_v21  ;;  %v140_v26 = vld [vmem:[#allocation4 + $0x120] sm:$0xff]  ;;  %v155_v20 = vld [vmem:[#allocation4 + $0x198] sm:$0xff] }
  0x3d   :  { %v5402_v27 = vld [vmem:[#allocation6 + $0x128] sm:$0xff]  ;;  %201 = vmatpush1.msra.mxu1 %v144_v22  ;;  %528 = vmatprep.subr.mxu0 %v5396_v23  ;;  %v5405_v29 = vld [vmem:[#allocation6 + $0x120] sm:$0xff]  ;;  %v154_v22 = vld [vmem:[#allocation4 + $0x190] sm:$0xff] }
  0x3e   :  { %v137_v28 = vld [vmem:[#allocation4 + $0x108] sm:$0xff]  ;;  %202 = vmatprep.subr.mxu1 %v141_v24  ;;  %529 = vmatpush1.msra.mxu0 %v5399_v25  ;;  %v136_v30 = vld [vmem:[#allocation4 + $0x100] sm:$0xff]  ;;  %v5487_v24 = vld [vmem:[%s7495_s0 + $0x10] sm:$0xff] }
  0x3f   :  { %v5408_v31 = vld [vmem:[#allocation6 + $0x108] sm:$0xff]  ;;  %203 = vmatpush1.msra.mxu1 %v140_v26  ;;  %530 = vmatprep.subr.mxu0 %v5402_v27  ;;  %v5411_v33 = vld [vmem:[#allocation6 + $0x100] sm:$0xff]  ;;  %v151_v26 = vld [vmem:[#allocation4 + $0x178] sm:$0xff] }
  0x40   :  { %v133_v32 = vld [vmem:[#allocation4 + $0xe8] sm:$0xff]  ;;  %204 = vmatprep.subr.mxu1 %v137_v28  ;;  %531 = vmatpush1.msra.mxu0 %v5405_v29  ;;  %v132_v34 = vld [vmem:[#allocation4 + $0xe0] sm:$0xff]  ;;  %v150_v28 = vld [vmem:[#allocation4 + $0x170] sm:$0xff] }
  0x41   :  { %v5414_v35 = vld [vmem:[#allocation6 + $0xe8] sm:$0xff]  ;;  %205 = vmatpush1.msra.mxu1 %v136_v30  ;;  %532 = vmatprep.subr.mxu0 %v5408_v31  ;;  %v5417_v37 = vld [vmem:[#allocation6 + $0xe0] sm:$0xff]  ;;  %v147_v30 = vld [vmem:[#allocation4 + $0x158] sm:$0xff] }
  0x42   :  { %v129_v36 = vld [vmem:[#allocation4 + $0xc8] sm:$0xff]  ;;  %206 = vmatprep.subr.mxu1 %v133_v32  ;;  %533 = vmatpush1.msra.mxu0 %v5411_v33  ;;  %v128_v38 = vld [vmem:[#allocation4 + $0xc0] sm:$0xff]  ;;  %v146_v32 = vld [vmem:[#allocation4 + $0x150] sm:$0xff] }
  0x43   :  { %v5420_v39 = vld [vmem:[#allocation6 + $0xc8] sm:$0xff]  ;;  %207 = vmatpush1.msra.mxu1 %v132_v34  ;;  %534 = vmatprep.subr.mxu0 %v5414_v35  ;;  %v5423_v41 = vld [vmem:[#allocation6 + $0xc0] sm:$0xff]  ;;  %v5496_v34 = vld [vmem:[%s7495_s0 + $0x18] sm:$0xff] }
  0x44   :  { %v125_v40 = vld [vmem:[#allocation4 + $0xa8] sm:$0xff]  ;;  %208 = vmatprep.subr.mxu1 %v129_v36  ;;  %535 = vmatpush1.msra.mxu0 %v5417_v37  ;;  %v124_v42 = vld [vmem:[#allocation4 + $0xa0] sm:$0xff]  ;;  %v143_v36 = vld [vmem:[#allocation4 + $0x138] sm:$0xff] }
  0x45   :  { %v5426_v43 = vld [vmem:[#allocation6 + $0xa8] sm:$0xff]  ;;  %209 = vmatpush1.msra.mxu1 %v128_v38  ;;  %536 = vmatprep.subr.mxu0 %v5420_v39  ;;  %v5429_v45 = vld [vmem:[#allocation6 + $0xa0] sm:$0xff]  ;;  %v142_v38 = vld [vmem:[#allocation4 + $0x130] sm:$0xff] }
  0x46   :  { %v121_v44 = vld [vmem:[#allocation4 + $0x88] sm:$0xff]  ;;  %210 = vmatprep.subr.mxu1 %v125_v40  ;;  %537 = vmatpush1.msra.mxu0 %v5423_v41  ;;  %v120_v46 = vld [vmem:[#allocation4 + $0x80] sm:$0xff] }
  0x47   :  { %v5432_v47 = vld [vmem:[#allocation6 + $0x88] sm:$0xff]  ;;  %211 = vmatpush1.msra.mxu1 %v124_v42  ;;  %538 = vmatprep.subr.mxu0 %v5426_v43  ;;  %v5435_v49 = vld [vmem:[#allocation6 + $0x80] sm:$0xff]  ;;  %v135_v42 = vld [vmem:[#allocation4 + $0xf8] sm:$0xff] }
  0x48   :  { %v117_v48 = vld [vmem:[#allocation4 + $0x68] sm:$0xff]  ;;  %212 = vmatprep.subr.mxu1 %v121_v44  ;;  %539 = vmatpush1.msra.mxu0 %v5429_v45  ;;  %v116_v50 = vld [vmem:[#allocation4 + $0x60] sm:$0xff]  ;;  %v134_v44 = vld [vmem:[#allocation4 + $0xf0] sm:$0xff] }
  0x49   :  { %v5438_v51 = vld [vmem:[#allocation6 + $0x68] sm:$0xff]  ;;  %213 = vmatpush1.msra.mxu1 %v120_v46  ;;  %540 = vmatprep.subr.mxu0 %v5432_v47  ;;  %v5441_v53 = vld [vmem:[#allocation6 + $0x60] sm:$0xff] }
  0x4a   :  { %v113_v52 = vld [vmem:[#allocation4 + $0x48] sm:$0xff]  ;;  %214 = vmatprep.subr.mxu1 %v117_v48  ;;  %541 = vmatpush1.msra.mxu0 %v5435_v49  ;;  %v112_v54 = vld [vmem:[#allocation4 + $0x40] sm:$0xff]  ;;  %v127_v48 = vld [vmem:[#allocation4 + $0xb8] sm:$0xff] }
  0x4b   :  { %v5444_v55 = vld [vmem:[#allocation6 + $0x48] sm:$0xff]  ;;  %215 = vmatpush1.msra.mxu1 %v116_v50  ;;  %542 = vmatprep.subr.mxu0 %v5438_v51  ;;  %v5447_v57 = vld [vmem:[#allocation6 + $0x40] sm:$0xff]  ;;  %v126_v50 = vld [vmem:[#allocation4 + $0xb0] sm:$0xff] }
  0x4c   :  { %v109_v56 = vld [vmem:[#allocation4 + $0x28] sm:$0xff]  ;;  %216 = vmatprep.subr.mxu1 %v113_v52  ;;  %543 = vmatpush1.msra.mxu0 %v5441_v53  ;;  %v108_v58 = vld [vmem:[#allocation4 + $0x20] sm:$0xff]  ;;  %v5523_v52 = vld [vmem:[%s7495_s0 + $0x30] sm:$0xff] }
  0x4d   :  { %v5450_v59 = vld [vmem:[#allocation6 + $0x28] sm:$0xff]  ;;  %217 = vmatpush1.msra.mxu1 %v112_v54  ;;  %544 = vmatprep.subr.mxu0 %v5444_v55  ;;  %v5453_v61 = vld [vmem:[#allocation6 + $0x20] sm:$0xff]  ;;  %v119_v54 = vld [vmem:[#allocation4 + $0x78] sm:$0xff] }
  0x4e   :  { %v105_v60 = vld [vmem:[#allocation4 + $0x8] sm:$0xff]  ;;  %218 = vmatprep.subr.mxu1 %v109_v56  ;;  %545 = vmatpush1.msra.mxu0 %v5447_v57  ;;  %v104_v62 = vld [vmem:[#allocation4] sm:$0xff]  ;;  %v118_v56 = vld [vmem:[#allocation4 + $0x70] sm:$0xff] }
  0x4f   :  { %v5456_v63 = vld [vmem:[#allocation6 + $0x8] sm:$0xff]  ;;  %219 = vmatpush1.msra.mxu1 %v108_v58  ;;  %546 = vmatprep.subr.mxu0 %v5450_v59  ;;  %v5462_v1 = vld [vmem:[%s7495_s0] sm:$0xff]  ;;  %v5532_v58 = vld [vmem:[%s7495_s0 + $0x38] sm:$0xff] }
  0x50   :  { %220 = vmatprep.subr.mxu1 %v105_v60  ;;  %547 = vmatpush1.msra.mxu0 %v5453_v61  ;;  %v5465_v5 = vld [vmem:[#allocation6] sm:$0xff]  ;;  %v5478_v14 = vld [vmem:[%s7495_s0 + $0x8] sm:$0xff]  ;;  %v111_v60 = vld [vmem:[#allocation4 + $0x38] sm:$0xff] }
  0x51   :  { %221 = vmatpush1.msra.mxu1 %v104_v62  ;;  %548 = vmatprep.subr.mxu0 %v5456_v63  ;;  %v5471_v9 = vld [vmem:[%s7496_s1] sm:$0xff]  ;;  %v5514_v46 = vld [vmem:[%s7495_s0 + $0x28] sm:$0xff]  ;;  %v110_v62 = vld [vmem:[#allocation4 + $0x30] sm:$0xff] }
  0x52   :  { %255 = vmatmul.mubr.f32.vlgmr.msra.gmra.mxu1 %v5462_v1  ;;  %303 = vmatprep.subr.mxu1 %v167_v2  ;;  %v5505_v40 = vld [vmem:[%s7495_s0 + $0x20] sm:$0xff]  ;;  %v5538_v2 = vld [vmem:[#allocation6 + $0x1f8] sm:$0xff] }
  0x53   :  { %304 = vmatpush1.msra.mxu1 %v166_v3  ;;  %549 = vmatpush1.msra.mxu0 %v5465_v5  ;;  %v5540_v3 = vld [vmem:[#allocation6 + $0x1f0] sm:$0xff] }
  0x54   :  { %305 = vmatprep.subr.mxu1 %v163_v7  ;;  %583 = vmatmul.mubr.f32.vlgmr.msra.gmra.mxu0 %v5471_v9  ;;  %v5552_v7 = vld [vmem:[#allocation6 + $0x1b8] sm:$0xff] }
  0x55   :  { %260 = vmatprep.mubr.f32.mxu1 %v7511_v0  ;;  %306 = vmatpush1.msra.mxu1 %v162_v12  ;;  %v5568_v12 = vld [vmem:[#allocation6 + $0x178] sm:$0xff] }
  0x56   :  { %261 = vmatmul.mubr.f32.gmra.mxu1 %v5478_v14  ;;  %307 = vmatprep.subr.mxu1 %v159_v16  ;;  %v5584_v16 = vld [vmem:[#allocation6 + $0x138] sm:$0xff] }
  0x57   :  { %308 = vmatpush1.msra.mxu1 %v158_v18  ;;  %266 = vmatprep.mubr.f32.mxu1 %v7511_v0  ;;  %v5596_v18 = vld [vmem:[#allocation6 + $0x110] sm:$0xff] }
  0x58   :  { %309 = vmatprep.subr.mxu1 %v155_v20  ;;  %757 = vmatprep.subr.mxu0 %v5368_v4  ;;  %v139_v4 = vld [vmem:[#allocation4 + $0x118] sm:$0xff] }
  0x59   :  { %310 = vmatpush1.msra.mxu1 %v154_v22  ;;  %758 = vmatpush1.msra.mxu0 %v5370_v6  ;;  %v138_v6 = vld [vmem:[#allocation4 + $0x110] sm:$0xff]  ;;  %v5600_v20 = vld [vmem:[#allocation6 + $0xf8] sm:$0xff] }
  0x5a   :  { %267 = vmatmul.mubr.f32.gmra.mxu1 %v5487_v24  ;;  %311 = vmatprep.subr.mxu1 %v151_v26  ;;  %v5612_v22 = vld [vmem:[#allocation6 + $0xd0] sm:$0xff] }
  0x5b   :  { %312 = vmatpush1.msra.mxu1 %v150_v28  ;;  %272 = vmatprep.mubr.f32.mxu1 %v7511_v0  ;;  %v5628_v26 = vld [vmem:[#allocation6 + $0x90] sm:$0xff]  ;;  %v5632_v28 = vld [vmem:[#allocation6 + $0x78] sm:$0xff] }
  0x5c   :  { %313 = vmatprep.subr.mxu1 %v147_v30  ;;  %759 = vmatprep.subr.mxu0 %v5373_v8  ;;  %v131_v8 = vld [vmem:[#allocation4 + $0xd8] sm:$0xff]  ;;  %v5644_v30 = vld [vmem:[#allocation6 + $0x50] sm:$0xff] }
  0x5d   :  { %314 = vmatpush1.msra.mxu1 %v146_v32  ;;  %760 = vmatpush1.msra.mxu0 %v5376_v10  ;;  %v130_v10 = vld [vmem:[#allocation4 + $0xd0] sm:$0xff]  ;;  %v5648_v32 = vld [vmem:[#allocation6 + $0x38] sm:$0xff] }
  0x5e   :  { %273 = vmatmul.mubr.f32.gmra.mxu1 %v5496_v34  ;;  %315 = vmatprep.subr.mxu1 %v143_v36 }
  0x5f   :  { %316 = vmatpush1.msra.mxu1 %v142_v38  ;;  %278 = vmatprep.mubr.f32.mxu1 %v7511_v0 }
  0x60   :  { %317 = vmatprep.subr.mxu1 %v139_v4  ;;  %761 = vmatprep.subr.mxu0 %v5378_v11  ;;  %v123_v11 = vld [vmem:[#allocation4 + $0x98] sm:$0xff] }
  0x61   :  { %318 = vmatpush1.msra.mxu1 %v138_v6  ;;  %762 = vmatpush1.msra.mxu0 %v5381_v13  ;;  %v122_v13 = vld [vmem:[#allocation4 + $0x90] sm:$0xff] }
  0x62   :  { %279 = vmatmul.mubr.f32.gmra.mxu1 %v5505_v40  ;;  %319 = vmatprep.subr.mxu1 %v135_v42 }
  0x63   :  { %320 = vmatpush1.msra.mxu1 %v134_v44  ;;  %284 = vmatprep.mubr.f32.mxu1 %v7511_v0 }
  0x64   :  { %321 = vmatprep.subr.mxu1 %v131_v8  ;;  %763 = vmatprep.subr.mxu0 %v5384_v15  ;;  %v115_v15 = vld [vmem:[#allocation4 + $0x58] sm:$0xff] }
  0x65   :  { %322 = vmatpush1.msra.mxu1 %v130_v10  ;;  %764 = vmatpush1.msra.mxu0 %v5387_v17  ;;  %v114_v17 = vld [vmem:[#allocation4 + $0x50] sm:$0xff] }
  0x66   :  { %285 = vmatmul.mubr.f32.gmra.mxu1 %v5514_v46  ;;  %323 = vmatprep.subr.mxu1 %v127_v48 }
  0x67   :  { %324 = vmatpush1.msra.mxu1 %v126_v50  ;;  %290 = vmatprep.mubr.f32.mxu1 %v7511_v0 }
  0x68   :  { %325 = vmatprep.subr.mxu1 %v123_v11  ;;  %765 = vmatprep.subr.mxu0 %v5390_v19  ;;  %v107_v19 = vld [vmem:[#allocation4 + $0x18] sm:$0xff] }
  0x69   :  { %326 = vmatpush1.msra.mxu1 %v122_v13  ;;  %766 = vmatpush1.msra.mxu0 %v5393_v21  ;;  %v106_v21 = vld [vmem:[#allocation4 + $0x10] sm:$0xff] }
  0x6a   :  { %291 = vmatmul.mubr.f32.gmra.mxu1 %v5523_v52  ;;  %327 = vmatprep.subr.mxu1 %v119_v54 }
  0x6b   :  { %328 = vmatpush1.msra.mxu1 %v118_v56  ;;  %296 = vmatprep.mubr.f32.mxu1 %v7511_v0 }
  0x6c   :  { %329 = vmatprep.subr.mxu1 %v115_v15  ;;  %767 = vmatprep.subr.mxu0 %v5396_v23  ;;  %v5543_v23 = vld [vmem:[#allocation6 + $0x1d8] sm:$0xff] }
  0x6d   :  { %330 = vmatpush1.msra.mxu1 %v114_v17  ;;  %768 = vmatpush1.msra.mxu0 %v5399_v25  ;;  %v5548_v25 = vld [vmem:[#allocation6 + $0x1d0] sm:$0xff] }
  0x6e   :  { %297 = vmatmul.mubr.f32.gmra.mxu1 %v5532_v58  ;;  %331 = vmatprep.subr.mxu1 %v111_v60 }
  0x6f   :  { %332 = vmatpush1.msra.mxu1 %v110_v62  ;;  %367 = vmatprep.mubr.f32.mxu1 %v7511_v0 }
  0x70   :  { %333 = vmatprep.subr.mxu1 %v107_v19  ;;  %769 = vmatprep.subr.mxu0 %v5402_v27  ;;  %v5555_v27 = vld [vmem:[#allocation6 + $0x1b0] sm:$0xff] }
  0x71   :  { %334 = vmatpush1.msra.mxu1 %v106_v21  ;;  %770 = vmatpush1.msra.mxu0 %v5405_v29  ;;  %v5559_v29 = vld [vmem:[#allocation6 + $0x198] sm:$0xff] }
  0x72   :  { %368 = vmatmul.mubr.f32.vlgmr.msra.gmra.mxu1 %v5462_v1  ;;  %589 = vmatprep.subr.mxu1 %v5538_v2  ;;  %v5564_v1 = vld [vmem:[#allocation6 + $0x190] sm:$0xff] }
  0x73   :  { %590 = vmatpush1.msra.mxu1 %v5540_v3  ;;  %373 = vmatprep.mubr.f32.mxu1 %v7511_v0 }
  0x74   :  { %591 = vmatprep.subr.mxu1 %v5543_v23  ;;  %771 = vmatprep.subr.mxu0 %v5408_v31  ;;  %v5571_v31 = vld [vmem:[#allocation6 + $0x170] sm:$0xff] }
  0x75   :  { %592 = vmatpush1.msra.mxu1 %v5548_v25  ;;  %772 = vmatpush1.msra.mxu0 %v5411_v33  ;;  %v5575_v33 = vld [vmem:[#allocation6 + $0x158] sm:$0xff] }
  0x76   :  { %374 = vmatmul.mubr.f32.gmra.mxu1 %v5478_v14  ;;  %593 = vmatprep.subr.mxu1 %v5552_v7  ;;  %v5580_v14 = vld [vmem:[#allocation6 + $0x150] sm:$0xff] }
  0x77   :  { %594 = vmatpush1.msra.mxu1 %v5555_v27  ;;  %379 = vmatprep.mubr.f32.mxu1 %v7511_v0 }
  0x78   :  { %595 = vmatprep.subr.mxu1 %v5559_v29  ;;  %773 = vmatprep.subr.mxu0 %v5414_v35  ;;  %v5587_v35 = vld [vmem:[#allocation6 + $0x130] sm:$0xff] }
  0x79   :  { %596 = vmatpush1.msra.mxu1 %v5564_v1  ;;  %774 = vmatpush1.msra.mxu0 %v5417_v37  ;;  %v5591_v37 = vld [vmem:[#allocation6 + $0x118] sm:$0xff] }
  0x7a   :  { %380 = vmatmul.mubr.f32.gmra.mxu1 %v5487_v24  ;;  %597 = vmatprep.subr.mxu1 %v5568_v12  ;;  %v5616_v24 = vld [vmem:[#allocation6 + $0xb8] sm:$0xff] }
  0x7b   :  { %598 = vmatpush1.msra.mxu1 %v5571_v31  ;;  %385 = vmatprep.mubr.f32.mxu1 %v7511_v0 }
  0x7c   :  { %599 = vmatprep.subr.mxu1 %v5575_v33  ;;  %775 = vmatprep.subr.mxu0 %v5420_v39  ;;  %v5603_v39 = vld [vmem:[#allocation6 + $0xf0] sm:$0xff] }
  0x7d   :  { %600 = vmatpush1.msra.mxu1 %v5580_v14  ;;  %776 = vmatpush1.msra.mxu0 %v5423_v41  ;;  %v5607_v41 = vld [vmem:[#allocation6 + $0xd8] sm:$0xff] }
  0x7e   :  { %386 = vmatmul.mubr.f32.gmra.mxu1 %v5496_v34  ;;  %601 = vmatprep.subr.mxu1 %v5584_v16  ;;  %v5660_v34 = vld [vmem:[#allocation6 + $0x10] sm:$0xff] }
  0x7f   :  { %602 = vmatpush1.msra.mxu1 %v5587_v35  ;;  %391 = vmatprep.mubr.f32.mxu1 %v7511_v0 }
  0x80   :  { %603 = vmatprep.subr.mxu1 %v5591_v37  ;;  %777 = vmatprep.subr.mxu0 %v5426_v43  ;;  %v5619_v43 = vld [vmem:[#allocation6 + $0xb0] sm:$0xff] }
  0x81   :  { %604 = vmatpush1.msra.mxu1 %v5596_v18  ;;  %778 = vmatpush1.msra.mxu0 %v5429_v45  ;;  %v5623_v45 = vld [vmem:[#allocation6 + $0x98] sm:$0xff] }
  0x82   :  { %392 = vmatmul.mubr.f32.gmra.mxu1 %v5505_v40  ;;  %605 = vmatprep.subr.mxu1 %v5600_v20 }
  0x83   :  { %606 = vmatpush1.msra.mxu1 %v5603_v39  ;;  %397 = vmatprep.mubr.f32.mxu1 %v7511_v0 }
  0x84   :  { %607 = vmatprep.subr.mxu1 %v5607_v41  ;;  %779 = vmatprep.subr.mxu0 %v5432_v47  ;;  %v5635_v47 = vld [vmem:[#allocation6 + $0x70] sm:$0xff] }
  0x85   :  { %608 = vmatpush1.msra.mxu1 %v5612_v22  ;;  %780 = vmatpush1.msra.mxu0 %v5435_v49  ;;  %v5639_v49 = vld [vmem:[#allocation6 + $0x58] sm:$0xff] }
  0x86   :  { %398 = vmatmul.mubr.f32.gmra.mxu1 %v5514_v46  ;;  %609 = vmatprep.subr.mxu1 %v5616_v24 }
  0x87   :  { %610 = vmatpush1.msra.mxu1 %v5619_v43  ;;  %403 = vmatprep.mubr.f32.mxu1 %v7511_v0 }
  0x88   :  { %611 = vmatprep.subr.mxu1 %v5623_v45  ;;  %781 = vmatprep.subr.mxu0 %v5438_v51  ;;  %v5651_v51 = vld [vmem:[#allocation6 + $0x30] sm:$0xff] }
  0x89   :  { %612 = vmatpush1.msra.mxu1 %v5628_v26  ;;  %782 = vmatpush1.msra.mxu0 %v5441_v53  ;;  %v5655_v53 = vld [vmem:[#allocation6 + $0x18] sm:$0xff] }
  0x8a   :  { %404 = vmatmul.mubr.f32.gmra.mxu1 %v5523_v52  ;;  %613 = vmatprep.subr.mxu1 %v5632_v28 }
  0x8b   :  { %614 = vmatpush1.msra.mxu1 %v5635_v47  ;;  %409 = vmatprep.mubr.f32.mxu1 %v7511_v0 }
  0x8c   :  { %615 = vmatprep.subr.mxu1 %v5639_v49  ;;  %783 = vmatprep.subr.mxu0 %v5444_v55  ;;  %v170_v55 = vlaneseq }
  0x8d   :  { %616 = vmatpush1.msra.mxu1 %v5644_v30  ;;  %784 = vmatpush1.msra.mxu0 %v5447_v57 }
  0x8e   :  { %410 = vmatmul.mubr.f32.gmra.mxu1 %v5532_v58  ;;  %617 = vmatprep.subr.mxu1 %v5648_v32  ;;  %v5706_v57 = vshrl.u32 %v170_v55, 7 }
  0x8f   :  { %618 = vmatpush1.msra.mxu1 %v5651_v51  ;;  %653 = vmatprep.mubr.f32.mxu1 %v7511_v0 }
  0x90   :  { %619 = vmatprep.subr.mxu1 %v5655_v53  ;;  %785 = vmatprep.subr.mxu0 %v5450_v59  ;;  %7660 = vst [vmem:[#allocation14_spill] sm:$0xff] %v5706_v57  ;;  %v7510_v59 = vsub.s32 0, %v5706_v57 }
  0x91   :  { %620 = vmatpush1.msra.mxu1 %v5660_v34  ;;  %786 = vmatpush1.msra.mxu0 %v5453_v61  ;;  %v168_v61 = vld [vmem:[%s7500_s5] sm:$0xf] }
  0x92   :  { %654 = vmatmul.mubr.f32.vlgmr.msra.gmra.mxu1 %v5471_v9  ;;  %828 = vmatprep.subr.mxu1 %v5538_v2  ;;  %v173_v36 = vrot.slane %v168_v61, %v7510_v59 }
  0x93   :  { %829 = vmatpush1.msra.mxu1 %v5540_v3  ;;  %787 = vmatprep.subr.mxu0 %v5456_v63 }
  0x94   :  { %830 = vmatprep.subr.mxu1 %v5543_v23  ;;  %788 = vmatpush1.msra.mxu0 %v5465_v5  ;;  %v7509_v5 = vsub.s32 1, %v5706_v57 }
  0x95   :  { %831 = vmatpush1.msra.mxu1 %v5548_v25  ;;  %821 = vmatprep.mubr.f32.mxu0 %v7511_v0 }
  0x96   :  { %832 = vmatprep.subr.mxu1 %v5552_v7  ;;  %892 = vmatprep.mubr.f32.mxu1 %v7511_v0  ;;  %v177_v4 = vrot.slane %v168_v61, %v7509_v5 }
  0x97   :  { %833 = vmatpush1.msra.mxu1 %v5555_v27 }
  0x98   :  { %834 = vmatprep.subr.mxu1 %v5559_v29 }
  0x99   :  { %835 = vmatpush1.msra.mxu1 %v5564_v1 }
  0x9a   :  { %836 = vmatprep.subr.mxu1 %v5568_v12 }
  0x9b   :  { %837 = vmatpush1.msra.mxu1 %v5571_v31 }
  0x9c   :  { %838 = vmatprep.subr.mxu1 %v5575_v33 }
  0x9d   :  { %839 = vmatpush1.msra.mxu1 %v5580_v14 }
  0x9e   :  { %840 = vmatprep.subr.mxu1 %v5584_v16 }
  0x9f   :  { %841 = vmatpush1.msra.mxu1 %v5587_v35 }
  0xa0   :  { %842 = vmatprep.subr.mxu1 %v5591_v37 }
  0xa1   :  { %843 = vmatpush1.msra.mxu1 %v5596_v18 }
  0xa2   :  { %844 = vmatprep.subr.mxu1 %v5600_v20 }
  0xa3   :  { %845 = vmatpush1.msra.mxu1 %v5603_v39 }
  0xa4   :  { %846 = vmatprep.subr.mxu1 %v5607_v41 }
  0xa5   :  { %847 = vmatpush1.msra.mxu1 %v5612_v22 }
  0xa6   :  { %848 = vmatprep.subr.mxu1 %v5616_v24 }
  0xa7   :  { %849 = vmatpush1.msra.mxu1 %v5619_v43 }
  0xa8   :  { %850 = vmatprep.subr.mxu1 %v5623_v45 }
  0xa9   :  { %851 = vmatpush1.msra.mxu1 %v5628_v26 }
  0xaa   :  { %852 = vmatprep.subr.mxu1 %v5632_v28 }
  0xab   :  { %853 = vmatpush1.msra.mxu1 %v5635_v47 }
  0xac   :  { %854 = vmatprep.subr.mxu1 %v5639_v49 }
  0xad   :  { %855 = vmatpush1.msra.mxu1 %v5644_v30 }
  0xae   :  { %856 = vmatprep.subr.mxu1 %v5648_v32 }
  0xaf   :  { %857 = vmatpush1.msra.mxu1 %v5651_v51 }
  0xb0   :  { %858 = vmatprep.subr.mxu1 %v5655_v53 }
  0xb1   :  { %859 = vmatpush1.msra.mxu1 %v5660_v34 }
  0xb2   :  { %1067 = vmatprep.subr.mxu1 %v5538_v2 }
 0x112   :  { %v256_v63 = vpop.f32.mrf.mxu1 }
 0x113   :  { %v257_v5 = vadd.f32 %v256_v63, %v173_v36 }
 0x114   :  { %v258_v9 = vpop.f32.mrf.mxu1 }
 0x116   :  { %v262_v38 = vpop.f32.mrf.mxu1 }
 0x117   :  { %v5717_v6 = vadd.f32 %v262_v38, %v173_v36 }
 0x118   :  { %v264_v40 = vpop.f32.mrf.mxu1 }
 0x119   :  { %v5719_v42 = vadd.f32 %v264_v40, %v177_v4 }
 0x11a   :  { %v268_v44 = vpop.f32.mrf.mxu1 }
 0x11b   :  { %v5721_v8 = vadd.f32 %v268_v44, %v173_v36 }
 0x11c   :  { %v270_v10 = vpop.f32.mrf.mxu1 }
 0x11d   :  { %v5723_v46 = vadd.f32 %v270_v10, %v177_v4  ;;  %v584_v10 = vpop.f32.mrf.mxu0 }
 0x11e   :  { %v274_v48 = vpop.f32.mrf.mxu1 }
 0x11f   :  { %v5725_v50 = vadd.f32 %v274_v48, %v173_v36  ;;  %v586_v59 = vpop.f32.mrf.mxu0 }
 0x120   :  { %v276_v11 = vpop.f32.mrf.mxu1 }
 0x121   :  { %7661 = vst [vmem:[#allocation15_spill] sm:$0xff] %v5725_v50  ;;  %v5727_v13 = vadd.f32 %v276_v11, %v177_v4 }
 0x122   :  { %v280_v52 = vpop.f32.mrf.mxu1 }
 0x123   :  { %7662 = vst [vmem:[#allocation16_spill] sm:$0xff] %v5727_v13  ;;  %v5729_v54 = vadd.f32 %v280_v52, %v173_v36  ;;  %v7513_v52 = vsub.s32 2, %v5706_v57 }
 0x124   :  { %v282_v56 = vpop.f32.mrf.mxu1 }
 0x125   :  { %7663 = vst [vmem:[#allocation17_spill] sm:$0xff] %v5729_v54  ;;  %v5731_v15 = vadd.f32 %v282_v56, %v177_v4 }
 0x126   :  { %v286_v17 = vpop.f32.mrf.mxu1 }
 0x127   :  { %7664 = vst [vmem:[#allocation18_spill] sm:$0xff] %v5731_v15  ;;  %v5733_v58 = vadd.f32 %v286_v17, %v173_v36  ;;  %v259_v17 = vadd.f32 %v258_v9, %v177_v4 }
 0x128   :  { %v288_v60 = vpop.f32.mrf.mxu1 }
 0x129   :  { %7665 = vst [vmem:[#allocation19_spill] sm:$0xff] %v5733_v58  ;;  %v5735_v62 = vadd.f32 %v288_v60, %v177_v4  ;;  %v7514_v60 = vsub.s32 3, %v5706_v57 }
 0x12a   :  { %v292_v19 = vpop.f32.mrf.mxu1 }
 0x12b   :  { %7666 = vst [vmem:[#allocation20_spill] sm:$0xff] %v5735_v62  ;;  %v5737_v21 = vadd.f32 %v292_v19, %v173_v36 }
 0x12c   :  { %v294_v55 = vpop.f32.mrf.mxu1 }
 0x12d   :  { %7667 = vst [vmem:[#allocation21_spill] sm:$0xff] %v5737_v21  ;;  %v5739_v38 = vadd.f32 %v294_v55, %v177_v4  ;;  %v181_v55 = vrot.slane %v168_v61, %v7513_v52 }
 0x12e   :  { %v298_v40 = vpop.f32.mrf.mxu1 }
 0x12f   :  { %7668 = vst [vmem:[#allocation22_spill] sm:$0xff] %v5739_v38  ;;  %v5741_v44 = vadd.f32 %v298_v40, %v173_v36  ;;  %v661_v38 = vadd.f32 %v586_v59, %v259_v17  ;;  %v185_v40 = vrot.slane %v168_v61, %v7514_v60 }
 0x130   :  { %v300_v48 = vpop.f32.mrf.mxu1 }
 0x131   :  { %7669 = vst [vmem:[#allocation23_spill] sm:$0xff] %v5741_v44  ;;  %v5743_v11 = vadd.f32 %v300_v48, %v177_v4  ;;  %v660_v48 = vadd.f32 %v584_v10, %v257_v5  ;;  %v4796_v4 = vmul.f32 -1.442695, %v661_v38 }
 0x132   :  { %v369_v56 = vpop.f32.mrf.mxu1 }
 0x133   :  { %7670 = vst [vmem:[#allocation24_spill] sm:$0xff] %v5743_v11  ;;  %v4795_v63 = vmul.f32 -1.442695, %v660_v48  ;;  %4923 = vpow2.f32 %v4796_v4  ;;  %v370_v54 = vadd.f32 %v369_v56, %v181_v55 }
 0x134   :  { %v371_v19 = vpop.f32.mrf.mxu1 }
 0x135   :  { %4925 = vpow2.f32 %v4795_v63 }
 0x136   :  { %v375_v0 = vpop.f32.mrf.mxu1 }
 0x137   :  { %v5751_v44 = vadd.f32 %v375_v0, %v181_v55 }
 0x138   :  { %v377_v11 = vpop.f32.mrf.mxu1 }
 0x139   :  { %v5753_v21 = vadd.f32 %v377_v11, %v185_v40 }
 0x13a   :  { %v381_v9 = vpop.f32.mrf.mxu1 }
 0x13b   :  { %v5755_v62 = vadd.f32 %v381_v9, %v181_v55 }
 0x13c   :  { %v383_v36 = vpop.f32.mrf.mxu1 }
 0x13d   :  { %7671 = vst [vmem:[#allocation25_spill] sm:$0xff] %v5755_v62  ;;  %v5757_v58 = vadd.f32 %v383_v36, %v185_v40 }
 0x13e   :  { %v387_v52 = vpop.f32.mrf.mxu1 }
 0x13f   :  { %v5759_v59 = vadd.f32 %v387_v52, %v181_v55 }
 0x140   :  { %v389_v61 = vpop.f32.mrf.mxu1  ;;  %v4924_v52 = vpop.eup %4923 }
 0x141   :  { %7672 = vst [vmem:[#allocation26_spill] sm:$0xff] %v5759_v59  ;;  %v5761_v0 = vadd.f32 %v389_v61, %v185_v40 }
 0x142   :  { %v393_v5 = vpop.f32.mrf.mxu1  ;;  %v4926_v57 = vpop.eup %4925 }
 0x143   :  { %7673 = vst [vmem:[#allocation27_spill] sm:$0xff] %v5761_v0  ;;  %v5763_v10 = vadd.f32 %v393_v5, %v181_v55  ;;  %v673_v5 = vadd.f32 1.0, %v4924_v52 }
 0x144   :  { %v395_v11 = vpop.f32.mrf.mxu1 }
 0x145   :  { %7674 = vst [vmem:[#allocation28_spill] sm:$0xff] %v5763_v10  ;;  %v5765_v17 = vadd.f32 %v395_v11, %v185_v40  ;;  %v667_v11 = vadd.f32 1.0, %v4926_v57  ;;  %4927 = vrcp.f32 %v673_v5 }
 0x146   :  { %v399_v38 = vpop.f32.mrf.mxu1 }
 0x147   :  { %7675 = vst [vmem:[#allocation29_spill] sm:$0xff] %v5765_v17  ;;  %v5767_v9 = vadd.f32 %v399_v38, %v181_v55  ;;  %4929 = vrcp.f32 %v667_v11  ;;  %v5896_v11 = vld [vmem:[#allocation6 + $0x60] sm:$0xff] }
 0x148   :  { %v401_v48 = vpop.f32.mrf.mxu1  ;;  %7685 = vst [vmem:[#allocation38_spill] sm:$0xff] %v5896_v11 }
 0x149   :  { %7676 = vst [vmem:[#allocation30_spill] sm:$0xff] %v5767_v9  ;;  %v5769_v36 = vadd.f32 %v401_v48, %v185_v40  ;;  %v372_v48 = vadd.f32 %v371_v19, %v185_v40 }
 0x14a   :  { %v405_v60 = vpop.f32.mrf.mxu1 }
 0x14b   :  { %7677 = vst [vmem:[#allocation31_spill] sm:$0xff] %v5769_v36  ;;  %v5771_v4 = vadd.f32 %v405_v60, %v181_v55 }
 0x14c   :  { %v407_v63 = vpop.f32.mrf.mxu1 }
 0x14d   :  { %7678 = vst [vmem:[#allocation32_spill] sm:$0xff] %v5771_v4  ;;  %v5773_v61 = vadd.f32 %v407_v63, %v185_v40 }
 0x14e   :  { %v411_v15 = vpop.f32.mrf.mxu1 }
 0x14f   :  { %7679 = vst [vmem:[#allocation33_spill] sm:$0xff] %v5773_v61  ;;  %v5775_v10 = vadd.f32 %v411_v15, %v181_v55  ;;  %v449_v15 = vld [vmem:[%s7497_s2] sm:$0xff] }
 0x150   :  { %v413_v17 = vpop.f32.mrf.mxu1 }
 0x151   :  { %7680 = vst [vmem:[#allocation34_spill] sm:$0xff] %v5775_v10  ;;  %v5777_v38 = vadd.f32 %v413_v17, %v185_v40 }
 0x152   :  { %v655_v9 = vpop.f32.mrf.mxu1  ;;  %v4928_v63 = vpop.eup %4927 }
 0x153   :  { %7681 = vst [vmem:[#allocation35_spill] sm:$0xff] %v5777_v38  ;;  %v662_v36 = vadd.f32 %v655_v9, %v370_v54  ;;  %v683_v56 = vmul.f32 %v4928_v63, %v449_v15  ;;  %v5905_v63 = vld [vmem:[#allocation6 + $0x28] sm:$0xff]  ;;  %v5908_v15 = vld [vmem:[#allocation6 + $0x20] sm:$0xff] }
 0x154   :  { %v657_v60 = vpop.f32.mrf.mxu1  ;;  %v4930_v57 = vpop.eup %4929  ;;  %7688 = vst [vmem:[#allocation41_spill] sm:$0xff] %v5905_v63  ;;  %7689 = vst [vmem:[#allocation42_spill] sm:$0xff] %v5908_v15 }
 0x155   :  { %4931 = vtanh.f32 %v662_v36  ;;  %v663_v4 = vadd.f32 %v657_v60, %v372_v48  ;;  %v5890_v36 = vld [vmem:[#allocation6 + $0x80] sm:$0xff]  ;;  %v5899_v48 = vld [vmem:[#allocation6 + $0x48] sm:$0xff] }
 0x156   :  { %7686 = vst [vmem:[#allocation39_spill] sm:$0xff] %v5899_v48  ;;  %v5902_v60 = vld [vmem:[#allocation6 + $0x40] sm:$0xff] }
 0x157   :  { %v4797_v59 = vmul.f32 -1.442695, %v663_v4  ;;  %v5893_v4 = vld [vmem:[#allocation6 + $0x68] sm:$0xff]  ;;  %7687 = vst [vmem:[#allocation40_spill] sm:$0xff] %v5902_v60 }
 0x158   :  { %7684 = vst [vmem:[#allocation37_spill] sm:$0xff] %v5893_v4 }
 0x159   :  { %4933 = vpow2.f32 %v4797_v59  ;;  %v7683_v59 = vmov 0.0  }
 0x162   :  { %v4932_v52 = vpop.eup %4931 }
 0x163   :  { %v684_v55 = vmul.f32 %v4932_v52, %v4930_v57  ;;  %v5911_v57 = vld [vmem:[#allocation6 + $0x8] sm:$0xff]  ;;  %v5914_v52 = vld [vmem:[#allocation6] sm:$0xff] }
 0x164   :  { %7690 = vst [vmem:[#allocation43_spill] sm:$0xff] %v5911_v57  ;;  %7691 = vst [vmem:[#allocation44_spill] sm:$0xff] %v5914_v52 }
 0x165   :  { %v5782_v17 = vadd.f32 %v684_v55, %v683_v56 }
 0x166   :  { %v4934_v5 = vpop.eup %4933 }
 0x167   :  { %v680_v19 = vadd.f32 1.0, %v4934_v5  ;;  %4935 = vtanh.f32 %v5782_v17 }
 0x169   :  { %4937 = vrcp.f32 %v680_v19 }
 0x174   :  { %v4936_v54 = vpop.eup %4935 }
 0x176   :  { %v4938_v40 = vpop.eup %4937 }
 0x177   :  { %v5785_v9 = vmul.f32 %v4938_v40, %v4936_v54 }
 0x179   :  { %7682 = vst [vmem:[#allocation36_spill] sm:$0xff] %v5785_v9  ;;  %822 = vmatmul.mubr.f32.vlgmr.msra.gmra.mxu0 %v5785_v9  ;;  %893 = vmatmul.mubr.f32.vlgmr.msra.gmra.mxu1 %v5785_v9 }
 0x17a   :  { %1068 = vmatpush1.msra.mxu1 %v5540_v3  ;;  %1060 = vmatprep.mubr.f32.mxu0 %v7683_v59 }
 0x17b   :  { %1069 = vmatprep.subr.mxu1 %v5543_v23  ;;  %1131 = vmatprep.mubr.f32.mxu1 %v7683_v59 }
 0x17c   :  { %1070 = vmatpush1.msra.mxu1 %v5548_v25 }
 0x17d   :  { %1071 = vmatprep.subr.mxu1 %v5552_v7 }
 0x17e   :  { %1072 = vmatpush1.msra.mxu1 %v5555_v27 }
 0x17f   :  { %1073 = vmatprep.subr.mxu1 %v5559_v29 }
 0x180   :  { %1074 = vmatpush1.msra.mxu1 %v5564_v1 }
 0x181   :  { %1075 = vmatprep.subr.mxu1 %v5568_v12 }
 0x182   :  { %1076 = vmatpush1.msra.mxu1 %v5571_v31 }
 0x183   :  { %1077 = vmatprep.subr.mxu1 %v5575_v33  ;;  %v5823_v33 = vld [vmem:[#allocation6 + $0x1e8] sm:$0xff] }
 0x184   :  { %1078 = vmatpush1.msra.mxu1 %v5580_v14  ;;  %996 = vmatprep.subr.mxu0 %v5823_v33  ;;  %v5826_v14 = vld [vmem:[#allocation6 + $0x1e0] sm:$0xff] }
 0x185   :  { %1079 = vmatprep.subr.mxu1 %v5584_v16  ;;  %997 = vmatpush1.msra.mxu0 %v5826_v14  ;;  %v5829_v16 = vld [vmem:[#allocation6 + $0x1c8] sm:$0xff] }
 0x186   :  { %1080 = vmatpush1.msra.mxu1 %v5587_v35  ;;  %998 = vmatprep.subr.mxu0 %v5829_v16  ;;  %v5832_v35 = vld [vmem:[#allocation6 + $0x1c0] sm:$0xff] }
 0x187   :  { %1081 = vmatprep.subr.mxu1 %v5591_v37  ;;  %999 = vmatpush1.msra.mxu0 %v5832_v35  ;;  %v5835_v37 = vld [vmem:[#allocation6 + $0x1a8] sm:$0xff] }
 0x188   :  { %1082 = vmatpush1.msra.mxu1 %v5596_v18  ;;  %1000 = vmatprep.subr.mxu0 %v5835_v37  ;;  %v5841_v18 = vld [vmem:[#allocation6 + $0x188] sm:$0xff] }
 0x189   :  { %1083 = vmatprep.subr.mxu1 %v5600_v20  ;;  %v5844_v20 = vld [vmem:[#allocation6 + $0x180] sm:$0xff] }
 0x18a   :  { %1084 = vmatpush1.msra.mxu1 %v5603_v39  ;;  %v5847_v39 = vld [vmem:[#allocation6 + $0x168] sm:$0xff] }
 0x18b   :  { %1085 = vmatprep.subr.mxu1 %v5607_v41  ;;  %v5850_v41 = vld [vmem:[#allocation6 + $0x160] sm:$0xff] }
 0x18c   :  { %1086 = vmatpush1.msra.mxu1 %v5612_v22  ;;  %v5853_v22 = vld [vmem:[#allocation6 + $0x148] sm:$0xff] }
 0x18d   :  { %1087 = vmatprep.subr.mxu1 %v5616_v24  ;;  %v5856_v24 = vld [vmem:[#allocation6 + $0x140] sm:$0xff] }
 0x18e   :  { %1088 = vmatpush1.msra.mxu1 %v5619_v43  ;;  %v5859_v43 = vld [vmem:[#allocation6 + $0x128] sm:$0xff] }
 0x18f   :  { %1089 = vmatprep.subr.mxu1 %v5623_v45  ;;  %v5862_v45 = vld [vmem:[#allocation6 + $0x120] sm:$0xff] }
 0x190   :  { %1090 = vmatpush1.msra.mxu1 %v5628_v26  ;;  %v5865_v26 = vld [vmem:[#allocation6 + $0x108] sm:$0xff] }
 0x191   :  { %1091 = vmatprep.subr.mxu1 %v5632_v28  ;;  %v5867_v28 = vld [vmem:[#allocation6 + $0x100] sm:$0xff] }
 0x192   :  { %1092 = vmatpush1.msra.mxu1 %v5635_v47  ;;  %v5869_v47 = vld [vmem:[#allocation6 + $0xe8] sm:$0xff] }
 0x193   :  { %1093 = vmatprep.subr.mxu1 %v5639_v49  ;;  %v5872_v49 = vld [vmem:[#allocation6 + $0xe0] sm:$0xff] }
 0x194   :  { %1094 = vmatpush1.msra.mxu1 %v5644_v30  ;;  %v5875_v30 = vld [vmem:[#allocation6 + $0xc8] sm:$0xff] }
 0x195   :  { %1095 = vmatprep.subr.mxu1 %v5648_v32  ;;  %v5878_v32 = vld [vmem:[#allocation6 + $0xc0] sm:$0xff] }
 0x196   :  { %1096 = vmatpush1.msra.mxu1 %v5651_v51  ;;  %v5881_v51 = vld [vmem:[#allocation6 + $0xa8] sm:$0xff] }
 0x197   :  { %1097 = vmatprep.subr.mxu1 %v5655_v53  ;;  %v5884_v53 = vld [vmem:[#allocation6 + $0xa0] sm:$0xff] }
 0x198   :  { %1098 = vmatpush1.msra.mxu1 %v5660_v34  ;;  %v5887_v34 = vld [vmem:[#allocation6 + $0x88] sm:$0xff] }
 0x199   :  { %1306 = vmatprep.subr.mxu1 %v5538_v2  ;;  %v5838_v2 = vld [vmem:[#allocation6 + $0x1a0] sm:$0xff] }
 0x19a   :  { %1001 = vmatpush1.msra.mxu0 %v5838_v2 }
 0x19b   :  { %1002 = vmatprep.subr.mxu0 %v5841_v18 }
 0x19c   :  { %1003 = vmatpush1.msra.mxu0 %v5844_v20 }
 0x19d   :  { %1004 = vmatprep.subr.mxu0 %v5847_v39 }
 0x19e   :  { %1005 = vmatpush1.msra.mxu0 %v5850_v41 }
 0x19f   :  { %1006 = vmatprep.subr.mxu0 %v5853_v22 }
 0x1a0   :  { %1007 = vmatpush1.msra.mxu0 %v5856_v24 }
 0x1a1   :  { %1008 = vmatprep.subr.mxu0 %v5859_v43 }
 0x1a2   :  { %1009 = vmatpush1.msra.mxu0 %v5862_v45 }
 0x1a3   :  { %1010 = vmatprep.subr.mxu0 %v5865_v26 }
 0x1a4   :  { %1011 = vmatpush1.msra.mxu0 %v5867_v28 }
 0x1a5   :  { %1012 = vmatprep.subr.mxu0 %v5869_v47 }
 0x1a6   :  { %1013 = vmatpush1.msra.mxu0 %v5872_v49 }
 0x1a7   :  { %1014 = vmatprep.subr.mxu0 %v5875_v30 }
 0x1a8   :  { %1015 = vmatpush1.msra.mxu0 %v5878_v32 }
 0x1a9   :  { %1016 = vmatprep.subr.mxu0 %v5881_v51 }
 0x1aa   :  { %1017 = vmatpush1.msra.mxu0 %v5884_v53 }
 0x1ab   :  { %1018 = vmatprep.subr.mxu0 %v5887_v34 }
 0x1ac   :  { %1019 = vmatpush1.msra.mxu0 %v5890_v36 }
 0x1ad   :  { %1020 = vmatprep.subr.mxu0 %v5893_v4 }
 0x1ae   :  { %1021 = vmatpush1.msra.mxu0 %v5896_v11 }
 0x1af   :  { %1022 = vmatprep.subr.mxu0 %v5899_v48 }
 0x1b0   :  { %1023 = vmatpush1.msra.mxu0 %v5902_v60 }
 0x1b1   :  { %1024 = vmatprep.subr.mxu0 %v5905_v63 }
 0x1b2   :  { %1025 = vmatpush1.msra.mxu0 %v5908_v15 }
 0x1b3   :  { %1026 = vmatprep.subr.mxu0 %v5911_v57 }
 0x1b4   :  { %1027 = vmatpush1.msra.mxu0 %v5914_v52 }
 0x1b5   :  { %1235 = vmatprep.subr.mxu0 %v5823_v33 }
 0x239   :  { %v823_v56 = vpop.f32.mrf.mxu0  ;;  %v894_v40 = vpop.f32.mrf.mxu1 }
 0x23a   :  { %v899_v55 = vadd.f32 %v823_v56, %v5717_v6  ;;  %v901_v61 = vadd.f32 %v894_v40, %v5751_v44  ;;  %v6018_v40 = vld [vmem:[#allocation6 + $0x70] sm:$0xff] }
 0x23b   :  { %v825_v5 = vpop.f32.mrf.mxu0  ;;  %v896_v38 = vpop.f32.mrf.mxu1  ;;  %7696 = vst [vmem:[#allocation49_spill] sm:$0xff] %v6018_v40 }
 0x23c   :  { %v4798_v19 = vmul.f32 -1.442695, %v899_v55  ;;  %v900_v54 = vadd.f32 %v825_v5, %v5719_v42  ;;  %v902_v9 = vadd.f32 %v896_v38, %v5753_v21  ;;  %v6009_v38 = vld [vmem:[#allocation6 + $0x98] sm:$0xff] }
 0x23d   :  { %7693 = vst [vmem:[#allocation46_spill] sm:$0xff] %v6009_v38 }
 0x23e   :  { %4939 = vpow2.f32 %v4798_v19  ;;  %v4799_v10 = vmul.f32 -1.442695, %v900_v54  ;;  %v4800_v0 = vmul.f32 -1.442695, %v902_v9  ;;  %v6015_v9 = vld [vmem:[#allocation6 + $0x78] sm:$0xff] }
 0x23f   :  { %7695 = vst [vmem:[#allocation48_spill] sm:$0xff] %v6015_v9 }
 0x240   :  { %4941 = vpow2.f32 %v4799_v10 }
 0x241   :  { %4943 = vtanh.f32 %v901_v61 }
 0x242   :  { %4945 = vpow2.f32 %v4800_v0  ;;  %v6006_v0 = vld [vmem:[#allocation6 + $0xb0] sm:$0xff] }
 0x24b   :  { %v4940_v13 = vpop.eup %4939 }
 0x24c   :  { %v906_v50 = vadd.f32 1.0, %v4940_v13 }
 0x24d   :  { %v4942_v62 = vpop.eup %4941 }
 0x24e   :  { %4947 = vrcp.f32 %v906_v50  ;;  %v912_v6 = vadd.f32 1.0, %v4942_v62  ;;  %v4944_v56 = vpop.eup %4943  ;;  %v6000_v50 = vld [vmem:[#allocation6 + $0xd0] sm:$0xff]  ;;  %v6003_v62 = vld [vmem:[#allocation6 + $0xb8] sm:$0xff] }
 0x24f   :  { %v4946_v42 = vpop.eup %4945 }
 0x250   :  { %4949 = vrcp.f32 %v912_v6  ;;  %v919_v10 = vadd.f32 1.0, %v4946_v42  ;;  %v6021_v6 = vld [vmem:[#allocation6 + $0x58] sm:$0xff] }
 0x251   :  { %7697 = vst [vmem:[#allocation50_spill] sm:$0xff] %v6021_v6  ;;  %v6027_v42 = vld [vmem:[#allocation6 + $0x38] sm:$0xff] }
 0x252   :  { %4951 = vrcp.f32 %v919_v10  ;;  %7699 = vst [vmem:[#allocation52_spill] sm:$0xff] %v6027_v42 }
 0x25b   :  { %v4948_v55 = vpop.eup %4947 }
 0x25c   :  { %v923_v5 = vmul.f32 %v4948_v55, %v4944_v56  ;;  %v6024_v56 = vld [vmem:[#allocation6 + $0x50] sm:$0xff] }
 0x25d   :  { %v4950_v19 = vpop.eup %4949  ;;  %7698 = vst [vmem:[#allocation51_spill] sm:$0xff] %v6024_v56  ;;  %v6030_v55 = vld [vmem:[#allocation6 + $0x30] sm:$0xff] }
 0x25e   :  { %v922_v54 = vmul.f32 %v4950_v19, %v5782_v17  ;;  %v6012_v17 = vld [vmem:[#allocation6 + $0x90] sm:$0xff]  ;;  %7700 = vst [vmem:[#allocation53_spill] sm:$0xff] %v6030_v55 }
 0x25f   :  { %v4952_v13 = vpop.eup %4951  ;;  %7694 = vst [vmem:[#allocation47_spill] sm:$0xff] %v6012_v17  ;;  %v6036_v19 = vld [vmem:[#allocation6 + $0x10] sm:$0xff] }
 0x260   :  { %v5925_v21 = vadd.f32 %v923_v5, %v922_v54  ;;  %v6033_v5 = vld [vmem:[#allocation6 + $0x18] sm:$0xff]  ;;  %7702 = vst [vmem:[#allocation55_spill] sm:$0xff] %v6036_v19 }
 0x261   :  { %7701 = vst [vmem:[#allocation54_spill] sm:$0xff] %v6033_v5 }
 0x262   :  { %4953 = vtanh.f32 %v5925_v21 }
 0x26f   :  { %v4954_v44 = vpop.eup %4953 }
 0x270   :  { %v5928_v61 = vmul.f32 %v4954_v44, %v4952_v13 }
 0x272   :  { %7692 = vst [vmem:[#allocation45_spill] sm:$0xff] %v5928_v61  ;;  %1061 = vmatmul.mubr.f32.vlgmr.msra.gmra.mxu0 %v5928_v61  ;;  %1132 = vmatmul.mubr.f32.vlgmr.msra.gmra.mxu1 %v5928_v61 }
 0x273   :  { %1236 = vmatpush1.msra.mxu0 %v5826_v14  ;;  %1307 = vmatpush1.msra.mxu1 %v5540_v3  ;;  %v5975_v3 = vld [vmem:[#allocation6 + $0x158] sm:$0xff] }
 0x274   :  { %1237 = vmatprep.subr.mxu0 %v5829_v16  ;;  %1308 = vmatprep.subr.mxu1 %v5543_v23  ;;  %v5978_v23 = vld [vmem:[#allocation6 + $0x150] sm:$0xff] }
 0x275   :  { %1238 = vmatpush1.msra.mxu0 %v5832_v35  ;;  %1309 = vmatpush1.msra.mxu1 %v5548_v25  ;;  %v5981_v25 = vld [vmem:[#allocation6 + $0x138] sm:$0xff] }
 0x276   :  { %1239 = vmatprep.subr.mxu0 %v5835_v37  ;;  %1310 = vmatprep.subr.mxu1 %v5552_v7  ;;  %v5984_v7 = vld [vmem:[#allocation6 + $0x130] sm:$0xff] }
 0x277   :  { %1240 = vmatpush1.msra.mxu0 %v5838_v2  ;;  %1311 = vmatpush1.msra.mxu1 %v5555_v27  ;;  %v5987_v27 = vld [vmem:[#allocation6 + $0x118] sm:$0xff] }
 0x278   :  { %1241 = vmatprep.subr.mxu0 %v5841_v18  ;;  %1312 = vmatprep.subr.mxu1 %v5559_v29  ;;  %v5989_v29 = vld [vmem:[#allocation6 + $0x110] sm:$0xff] }
 0x279   :  { %1242 = vmatpush1.msra.mxu0 %v5844_v20  ;;  %1313 = vmatpush1.msra.mxu1 %v5564_v1  ;;  %v5991_v1 = vld [vmem:[#allocation6 + $0xf8] sm:$0xff] }
 0x27a   :  { %1243 = vmatprep.subr.mxu0 %v5847_v39  ;;  %1314 = vmatprep.subr.mxu1 %v5568_v12  ;;  %v5994_v12 = vld [vmem:[#allocation6 + $0xf0] sm:$0xff] }
 0x27b   :  { %1244 = vmatpush1.msra.mxu0 %v5850_v41  ;;  %1315 = vmatpush1.msra.mxu1 %v5571_v31  ;;  %v5997_v31 = vld [vmem:[#allocation6 + $0xd8] sm:$0xff] }
 0x27c   :  { %1245 = vmatprep.subr.mxu0 %v5853_v22  ;;  %1299 = vmatprep.mubr.f32.mxu0 %v7683_v59 }
 0x27d   :  { %1246 = vmatpush1.msra.mxu0 %v5856_v24  ;;  %1370 = vmatprep.mubr.f32.mxu1 %v7683_v59 }
 0x27e   :  { %1247 = vmatprep.subr.mxu0 %v5859_v43  ;;  %1316 = vmatprep.subr.mxu1 %v5975_v3 }
 0x27f   :  { %1248 = vmatpush1.msra.mxu0 %v5862_v45  ;;  %1317 = vmatpush1.msra.mxu1 %v5978_v23 }
 0x280   :  { %1249 = vmatprep.subr.mxu0 %v5865_v26  ;;  %1318 = vmatprep.subr.mxu1 %v5981_v25 }
 0x281   :  { %1250 = vmatpush1.msra.mxu0 %v5867_v28  ;;  %1319 = vmatpush1.msra.mxu1 %v5984_v7 }
 0x282   :  { %1251 = vmatprep.subr.mxu0 %v5869_v47  ;;  %1320 = vmatprep.subr.mxu1 %v5987_v27 }
 0x283   :  { %1252 = vmatpush1.msra.mxu0 %v5872_v49  ;;  %1321 = vmatpush1.msra.mxu1 %v5989_v29 }
 0x284   :  { %1253 = vmatprep.subr.mxu0 %v5875_v30  ;;  %1322 = vmatprep.subr.mxu1 %v5991_v1 }
 0x285   :  { %1254 = vmatpush1.msra.mxu0 %v5878_v32  ;;  %1323 = vmatpush1.msra.mxu1 %v5994_v12 }
 0x286   :  { %1255 = vmatprep.subr.mxu0 %v5881_v51  ;;  %1324 = vmatprep.subr.mxu1 %v5997_v31 }
 0x287   :  { %1256 = vmatpush1.msra.mxu0 %v5884_v53  ;;  %1325 = vmatpush1.msra.mxu1 %v6000_v50 }
 0x288   :  { %1257 = vmatprep.subr.mxu0 %v5887_v34  ;;  %1326 = vmatprep.subr.mxu1 %v6003_v62 }
 0x289   :  { %1258 = vmatpush1.msra.mxu0 %v5890_v36  ;;  %1327 = vmatpush1.msra.mxu1 %v6006_v0 }
 0x28a   :  { %1259 = vmatprep.subr.mxu0 %v5893_v4  ;;  %1328 = vmatprep.subr.mxu1 %v6009_v38 }
 0x28b   :  { %1260 = vmatpush1.msra.mxu0 %v5896_v11  ;;  %1329 = vmatpush1.msra.mxu1 %v6012_v17 }
 0x28c   :  { %1261 = vmatprep.subr.mxu0 %v5899_v48  ;;  %1330 = vmatprep.subr.mxu1 %v6015_v9  ;;  %v7703_v9 = vld [vmem:[#allocation25_spill] sm:$0xff] }
 0x28d   :  { %1262 = vmatpush1.msra.mxu0 %v5902_v60  ;;  %1331 = vmatpush1.msra.mxu1 %v6018_v40 }
 0x28e   :  { %1263 = vmatprep.subr.mxu0 %v5905_v63  ;;  %1332 = vmatprep.subr.mxu1 %v6021_v6 }
 0x28f   :  { %1264 = vmatpush1.msra.mxu0 %v5908_v15  ;;  %1333 = vmatpush1.msra.mxu1 %v6024_v56 }
 0x290   :  { %1265 = vmatprep.subr.mxu0 %v5911_v57  ;;  %1334 = vmatprep.subr.mxu1 %v6027_v42 }
 0x291   :  { %1266 = vmatpush1.msra.mxu0 %v5914_v52  ;;  %1335 = vmatpush1.msra.mxu1 %v6030_v55 }
 0x292   :  { %1474 = vmatprep.subr.mxu0 %v5823_v33  ;;  %1336 = vmatprep.subr.mxu1 %v6033_v5 }
 0x293   :  { %1337 = vmatpush1.msra.mxu1 %v6036_v19 }
 0x332   :  { %v1062_v10 = vpop.f32.mrf.mxu0  ;;  %v1133_v56 = vpop.f32.mrf.mxu1 }
 0x333   :  { %v1138_v54 = vadd.f32 %v1062_v10, %v5721_v8  ;;  %v1140_v55 = vadd.f32 %v1133_v56, %v7703_v9 }
 0x334   :  { %v1064_v13 = vpop.f32.mrf.mxu0  ;;  %v1135_v42 = vpop.f32.mrf.mxu1 }
 0x335   :  { %v4801_v44 = vmul.f32 -1.442695, %v1138_v54  ;;  %v1139_v61 = vadd.f32 %v1064_v13, %v5723_v46  ;;  %v1141_v40 = vadd.f32 %v1135_v42, %v5757_v58  ;;  %v6096_v42 = vld [vmem:[#allocation6 + $0x1d0] sm:$0xff] }
 0x337   :  { %4955 = vpow2.f32 %v4801_v44  ;;  %v4802_v6 = vmul.f32 -1.442695, %v1139_v61  ;;  %v4803_v17 = vmul.f32 -1.442695, %v1141_v40 }
 0x339   :  { %4957 = vpow2.f32 %v4802_v6 }
 0x33a   :  { %4959 = vtanh.f32 %v1140_v55  ;;  %v6099_v55 = vld [vmem:[#allocation6 + $0x1b8] sm:$0xff] }
 0x33b   :  { %4961 = vpow2.f32 %v4803_v17  ;;  %v6093_v17 = vld [vmem:[#allocation6 + $0x1d8] sm:$0xff] }
 0x344   :  { %v4956_v5 = vpop.eup %4955 }
 0x345   :  { %v1145_v38 = vadd.f32 1.0, %v4956_v5  ;;  %v6105_v5 = vld [vmem:[#allocation6 + $0x198] sm:$0xff] }
 0x346   :  { %v4958_v19 = vpop.eup %4957 }
 0x347   :  { %4963 = vrcp.f32 %v1145_v38  ;;  %v1151_v8 = vadd.f32 1.0, %v4958_v19  ;;  %v4960_v10 = vpop.eup %4959  ;;  %v6090_v38 = vld [vmem:[#allocation6 + $0x1f0] sm:$0xff] }
 0x348   :  { %v4962_v46 = vpop.eup %4961  ;;  %v6108_v19 = vld [vmem:[#allocation6 + $0x190] sm:$0xff] }
 0x349   :  { %4965 = vrcp.f32 %v1151_v8  ;;  %v1158_v6 = vadd.f32 1.0, %v4962_v46  ;;  %v6111_v8 = vld [vmem:[#allocation6 + $0x178] sm:$0xff]  ;;  %v7706_v46 = vld [vmem:[#allocation46_spill] sm:$0xff] }
 0x34b   :  { %4967 = vrcp.f32 %v1158_v6  ;;  %v7710_v6 = vld [vmem:[#allocation50_spill] sm:$0xff] }
 0x354   :  { %v4964_v54 = vpop.eup %4963 }
 0x355   :  { %v1162_v13 = vmul.f32 %v4964_v54, %v4960_v10  ;;  %v6114_v10 = vld [vmem:[#allocation6 + $0x170] sm:$0xff]  ;;  %v7707_v54 = vld [vmem:[#allocation47_spill] sm:$0xff] }
 0x356   :  { %v4966_v61 = vpop.eup %4965 }
 0x357   :  { %v1161_v44 = vmul.f32 %v4966_v61, %v5925_v21  ;;  %v6087_v21 = vld [vmem:[#allocation6 + $0x1f8] sm:$0xff] }
 0x358   :  { %v4968_v9 = vpop.eup %4967  ;;  %7705 = vst [vmem:[#allocation56_spill] sm:$0xff] %v6087_v21  ;;  %1545 = vmatprep.subr.mxu1 %v6087_v21  ;;  %v7709_v61 = vld [vmem:[#allocation49_spill] sm:$0xff] }
 0x359   :  { %v6046_v58 = vadd.f32 %v1162_v13, %v1161_v44  ;;  %v7708_v13 = vld [vmem:[#allocation48_spill] sm:$0xff]  ;;  %v7711_v44 = vld [vmem:[#allocation51_spill] sm:$0xff] }
 0x35b   :  { %4969 = vtanh.f32 %v6046_v58 }
 0x368   :  { %v4970_v40 = vpop.eup %4969 }
 0x369   :  { %v6049_v56 = vmul.f32 %v4970_v40, %v4968_v9  ;;  %v7712_v9 = vld [vmem:[#allocation52_spill] sm:$0xff]  ;;  %v7713_v40 = vld [vmem:[#allocation53_spill] sm:$0xff] }
 0x36b   :  { %7704 = vst [vmem:[#allocation25_spill] sm:$0xff] %v6049_v56  ;;  %1300 = vmatmul.mubr.f32.vlgmr.msra.gmra.mxu0 %v6049_v56  ;;  %1371 = vmatmul.mubr.f32.vlgmr.msra.gmra.mxu1 %v6049_v56  ;;  %v7714_v56 = vld [vmem:[#allocation54_spill] sm:$0xff] }
 0x36c   :  { %1475 = vmatpush1.msra.mxu0 %v5826_v14  ;;  %1538 = vmatprep.mubr.f32.mxu0 %v7683_v59 }
 0x36d   :  { %1476 = vmatprep.subr.mxu0 %v5829_v16  ;;  %1609 = vmatprep.mubr.f32.mxu1 %v7683_v59  ;;  %v7715_v59 = vld [vmem:[#allocation55_spill] sm:$0xff] }
 0x36e   :  { %1477 = vmatpush1.msra.mxu0 %v5832_v35  ;;  %1546 = vmatpush1.msra.mxu1 %v6090_v38 }
 0x36f   :  { %1478 = vmatprep.subr.mxu0 %v5835_v37  ;;  %1547 = vmatprep.subr.mxu1 %v6093_v17 }
 0x370   :  { %1479 = vmatpush1.msra.mxu0 %v5838_v2  ;;  %1548 = vmatpush1.msra.mxu1 %v6096_v42 }
 0x371   :  { %1480 = vmatprep.subr.mxu0 %v5841_v18  ;;  %1549 = vmatprep.subr.mxu1 %v6099_v55 }
 0x372   :  { %1481 = vmatpush1.msra.mxu0 %v5844_v20 }
 0x373   :  { %1482 = vmatprep.subr.mxu0 %v5847_v39 }
 0x374   :  { %1483 = vmatpush1.msra.mxu0 %v5850_v41 }
 0x375   :  { %1484 = vmatprep.subr.mxu0 %v5853_v22 }
 0x376   :  { %1485 = vmatpush1.msra.mxu0 %v5856_v24 }
 0x377   :  { %1486 = vmatprep.subr.mxu0 %v5859_v43 }
 0x378   :  { %1487 = vmatpush1.msra.mxu0 %v5862_v45 }
 0x379   :  { %1488 = vmatprep.subr.mxu0 %v5865_v26 }
 0x37a   :  { %1489 = vmatpush1.msra.mxu0 %v5867_v28 }
 0x37b   :  { %1490 = vmatprep.subr.mxu0 %v5869_v47 }
 0x37c   :  { %1491 = vmatpush1.msra.mxu0 %v5872_v49 }
 0x37d   :  { %1492 = vmatprep.subr.mxu0 %v5875_v30 }
 0x37e   :  { %1493 = vmatpush1.msra.mxu0 %v5878_v32 }
 0x37f   :  { %1494 = vmatprep.subr.mxu0 %v5881_v51 }
 0x380   :  { %1495 = vmatpush1.msra.mxu0 %v5884_v53 }
 0x381   :  { %1496 = vmatprep.subr.mxu0 %v5887_v34 }
 0x382   :  { %1497 = vmatpush1.msra.mxu0 %v5890_v36 }
 0x383   :  { %1498 = vmatprep.subr.mxu0 %v5893_v4 }
 0x384   :  { %1499 = vmatpush1.msra.mxu0 %v5896_v11  ;;  %v7718_v11 = vld [vmem:[#allocation27_spill] sm:$0xff] }
 0x385   :  { %1500 = vmatprep.subr.mxu0 %v5899_v48  ;;  %v7717_v48 = vld [vmem:[#allocation16_spill] sm:$0xff] }
 0x386   :  { %1501 = vmatpush1.msra.mxu0 %v5902_v60 }
 0x387   :  { %1502 = vmatprep.subr.mxu0 %v5905_v63 }
 0x388   :  { %1503 = vmatpush1.msra.mxu0 %v5908_v15 }
 0x389   :  { %1504 = vmatprep.subr.mxu0 %v5911_v57  ;;  %v7716_v57 = vld [vmem:[#allocation15_spill] sm:$0xff] }
 0x38a   :  { %1505 = vmatpush1.msra.mxu0 %v5914_v52 }
 0x38b   :  { %1713 = vmatprep.subr.mxu0 %v5823_v33  ;;  %v6102_v33 = vld [vmem:[#allocation6 + $0x1b0] sm:$0xff] }
 0x38c   :  { %1550 = vmatpush1.msra.mxu1 %v6102_v33 }
 0x38d   :  { %1551 = vmatprep.subr.mxu1 %v6105_v5 }
 0x38e   :  { %1552 = vmatpush1.msra.mxu1 %v6108_v19 }
 0x38f   :  { %1553 = vmatprep.subr.mxu1 %v6111_v8 }
 0x390   :  { %1554 = vmatpush1.msra.mxu1 %v6114_v10 }
 0x391   :  { %1555 = vmatprep.subr.mxu1 %v5975_v3 }
 0x392   :  { %1556 = vmatpush1.msra.mxu1 %v5978_v23 }
 0x393   :  { %1557 = vmatprep.subr.mxu1 %v5981_v25 }
 0x394   :  { %1558 = vmatpush1.msra.mxu1 %v5984_v7 }
 0x395   :  { %1559 = vmatprep.subr.mxu1 %v5987_v27 }
 0x396   :  { %1560 = vmatpush1.msra.mxu1 %v5989_v29 }
 0x397   :  { %1561 = vmatprep.subr.mxu1 %v5991_v1 }
 0x398   :  { %1562 = vmatpush1.msra.mxu1 %v5994_v12 }
 0x399   :  { %1563 = vmatprep.subr.mxu1 %v5997_v31 }
 0x39a   :  { %1564 = vmatpush1.msra.mxu1 %v6000_v50 }
 0x39b   :  { %1565 = vmatprep.subr.mxu1 %v6003_v62 }
 0x39c   :  { %1566 = vmatpush1.msra.mxu1 %v6006_v0 }
 0x39d   :  { %1567 = vmatprep.subr.mxu1 %v7706_v46 }
 0x39e   :  { %1568 = vmatpush1.msra.mxu1 %v7707_v54 }
 0x39f   :  { %1569 = vmatprep.subr.mxu1 %v7708_v13  ;;  %v7719_v13 = vld [vmem:[#allocation26_spill] sm:$0xff] }
 0x3a0   :  { %1570 = vmatpush1.msra.mxu1 %v7709_v61 }
 0x3a1   :  { %1571 = vmatprep.subr.mxu1 %v7710_v6 }
 0x3a2   :  { %1572 = vmatpush1.msra.mxu1 %v7711_v44 }
 0x3a3   :  { %1573 = vmatprep.subr.mxu1 %v7712_v9 }
 0x3a4   :  { %1574 = vmatpush1.msra.mxu1 %v7713_v40 }
 0x3a5   :  { %1575 = vmatprep.subr.mxu1 %v7714_v56 }
 0x3a6   :  { %1576 = vmatpush1.msra.mxu1 %v7715_v59 }
 0x3a7   :  { %1784 = vmatprep.subr.mxu1 %v6087_v21 }
 0x42b   :  { %v1301_v52 = vpop.f32.mrf.mxu0  ;;  %v1372_v6 = vpop.f32.mrf.mxu1 }
 0x42c   :  { %v1377_v15 = vadd.f32 %v1301_v52, %v7716_v57  ;;  %v1379_v56 = vadd.f32 %v1372_v6, %v7719_v13 }
 0x42d   :  { %v1303_v63 = vpop.f32.mrf.mxu0  ;;  %v1374_v9 = vpop.f32.mrf.mxu1 }
 0x42e   :  { %v4804_v60 = vmul.f32 -1.442695, %v1377_v15  ;;  %v1378_v61 = vadd.f32 %v1303_v63, %v7717_v48  ;;  %v1380_v40 = vadd.f32 %v1374_v9, %v7718_v11 }
 0x430   :  { %4971 = vpow2.f32 %v4804_v60  ;;  %v4805_v44 = vmul.f32 -1.442695, %v1378_v61  ;;  %v4806_v4 = vmul.f32 -1.442695, %v1380_v40  ;;  %v7741_v40 = vld [vmem:[#allocation29_spill] sm:$0xff] }
 0x432   :  { %4973 = vpow2.f32 %v4805_v44 }
 0x433   :  { %4975 = vtanh.f32 %v1379_v56 }
 0x434   :  { %4977 = vpow2.f32 %v4806_v4 }
 0x43d   :  { %v4972_v59 = vpop.eup %4971 }
 0x43e   :  { %v1384_v54 = vadd.f32 1.0, %v4972_v59 }
 0x43f   :  { %v4974_v21 = vpop.eup %4973 }
 0x440   :  { %4979 = vrcp.f32 %v1384_v54  ;;  %v1390_v57 = vadd.f32 1.0, %v4974_v21  ;;  %v4976_v15 = vpop.eup %4975 }
 0x441   :  { %v4978_v48 = vpop.eup %4977 }
 0x442   :  { %4981 = vrcp.f32 %v1390_v57  ;;  %v1397_v61 = vadd.f32 1.0, %v4978_v48 }
 0x444   :  { %4983 = vrcp.f32 %v1397_v61 }
 0x44d   :  { %v4980_v60 = vpop.eup %4979 }
 0x44e   :  { %v1401_v63 = vmul.f32 %v4980_v60, %v4976_v15  ;;  %v7742_v15 = vld [vmem:[#allocation28_spill] sm:$0xff] }
 0x44f   :  { %v4982_v52 = vpop.eup %4981 }
 0x450   :  { %v1400_v44 = vmul.f32 %v4982_v52, %v6046_v58  ;;  %v7740_v58 = vld [vmem:[#allocation18_spill] sm:$0xff] }
 0x451   :  { %v4984_v59 = vpop.eup %4983 }
 0x452   :  { %v6145_v11 = vadd.f32 %v1401_v63, %v1400_v44 }
 0x454   :  { %4985 = vtanh.f32 %v6145_v11 }
 0x461   :  { %v4986_v56 = vpop.eup %4985 }
 0x462   :  { %v6148_v13 = vmul.f32 %v4986_v56, %v4984_v59 }
 0x464   :  { %1539 = vmatmul.mubr.f32.vlgmr.msra.gmra.mxu0 %v6148_v13  ;;  %1610 = vmatmul.mubr.f32.vlgmr.msra.gmra.mxu1 %v6148_v13 }
 0x465   :  { %1714 = vmatpush1.msra.mxu0 %v5826_v14  ;;  %1785 = vmatpush1.msra.mxu1 %v6090_v38  ;;  %v7720_v14 = vld [vmem:[#allocation47_spill] sm:$0xff] }
 0x466   :  { %1715 = vmatprep.subr.mxu0 %v5829_v16  ;;  %1786 = vmatprep.subr.mxu1 %v6093_v17  ;;  %v7721_v16 = vld [vmem:[#allocation37_spill] sm:$0xff] }
 0x467   :  { %1716 = vmatpush1.msra.mxu0 %v5832_v35  ;;  %1787 = vmatpush1.msra.mxu1 %v6096_v42  ;;  %v7722_v35 = vld [vmem:[#allocation48_spill] sm:$0xff] }
 0x468   :  { %1717 = vmatprep.subr.mxu0 %v5835_v37  ;;  %1788 = vmatprep.subr.mxu1 %v6099_v55  ;;  %v7723_v37 = vld [vmem:[#allocation38_spill] sm:$0xff] }
 0x469   :  { %1718 = vmatpush1.msra.mxu0 %v5838_v2  ;;  %1789 = vmatpush1.msra.mxu1 %v6102_v33  ;;  %v7724_v2 = vld [vmem:[#allocation49_spill] sm:$0xff] }
 0x46a   :  { %1719 = vmatprep.subr.mxu0 %v5841_v18  ;;  %1790 = vmatprep.subr.mxu1 %v6105_v5  ;;  %v7725_v18 = vld [vmem:[#allocation39_spill] sm:$0xff] }
 0x46b   :  { %1720 = vmatpush1.msra.mxu0 %v5844_v20  ;;  %1791 = vmatpush1.msra.mxu1 %v6108_v19  ;;  %v7726_v20 = vld [vmem:[#allocation50_spill] sm:$0xff] }
 0x46c   :  { %1721 = vmatprep.subr.mxu0 %v5847_v39  ;;  %1792 = vmatprep.subr.mxu1 %v6111_v8  ;;  %v7727_v39 = vld [vmem:[#allocation40_spill] sm:$0xff] }
 0x46d   :  { %1722 = vmatpush1.msra.mxu0 %v5850_v41  ;;  %1793 = vmatpush1.msra.mxu1 %v6114_v10  ;;  %v7728_v41 = vld [vmem:[#allocation51_spill] sm:$0xff] }
 0x46e   :  { %1723 = vmatprep.subr.mxu0 %v5853_v22  ;;  %1794 = vmatprep.subr.mxu1 %v5975_v3  ;;  %v7729_v22 = vld [vmem:[#allocation41_spill] sm:$0xff] }
 0x46f   :  { %1724 = vmatpush1.msra.mxu0 %v5856_v24  ;;  %1795 = vmatpush1.msra.mxu1 %v5978_v23  ;;  %v7730_v24 = vld [vmem:[#allocation52_spill] sm:$0xff] }
 0x470   :  { %1725 = vmatprep.subr.mxu0 %v5859_v43  ;;  %1796 = vmatprep.subr.mxu1 %v5981_v25  ;;  %v7731_v43 = vld [vmem:[#allocation42_spill] sm:$0xff] }
 0x471   :  { %1726 = vmatpush1.msra.mxu0 %v5862_v45  ;;  %1797 = vmatpush1.msra.mxu1 %v5984_v7  ;;  %v7732_v45 = vld [vmem:[#allocation53_spill] sm:$0xff] }
 0x472   :  { %1727 = vmatprep.subr.mxu0 %v5865_v26  ;;  %1798 = vmatprep.subr.mxu1 %v5987_v27  ;;  %v7733_v26 = vld [vmem:[#allocation43_spill] sm:$0xff] }
 0x473   :  { %1728 = vmatpush1.msra.mxu0 %v5867_v28  ;;  %1799 = vmatpush1.msra.mxu1 %v5989_v29  ;;  %v7734_v28 = vld [vmem:[#allocation54_spill] sm:$0xff] }
 0x474   :  { %1729 = vmatprep.subr.mxu0 %v5869_v47  ;;  %1800 = vmatprep.subr.mxu1 %v5991_v1  ;;  %v7735_v47 = vld [vmem:[#allocation44_spill] sm:$0xff] }
 0x475   :  { %1730 = vmatpush1.msra.mxu0 %v5872_v49  ;;  %1801 = vmatpush1.msra.mxu1 %v5994_v12  ;;  %v7736_v49 = vmov 0.0  }
 0x476   :  { %1731 = vmatprep.subr.mxu0 %v5875_v30  ;;  %1802 = vmatprep.subr.mxu1 %v5997_v31  ;;  %v7737_v30 = vld [vmem:[#allocation55_spill] sm:$0xff] }
 0x477   :  { %1732 = vmatpush1.msra.mxu0 %v5878_v32  ;;  %1803 = vmatpush1.msra.mxu1 %v6000_v50  ;;  %v7738_v32 = vld [vmem:[#allocation56_spill] sm:$0xff] }
 0x478   :  { %1733 = vmatprep.subr.mxu0 %v5881_v51  ;;  %1804 = vmatprep.subr.mxu1 %v6003_v62 }
 0x479   :  { %1734 = vmatpush1.msra.mxu0 %v5884_v53  ;;  %1805 = vmatpush1.msra.mxu1 %v6006_v0  ;;  %v7739_v53 = vld [vmem:[#allocation17_spill] sm:$0xff] }
 0x47a   :  { %1735 = vmatprep.subr.mxu0 %v5887_v34  ;;  %1806 = vmatprep.subr.mxu1 %v7706_v46 }
 0x47b   :  { %1736 = vmatpush1.msra.mxu0 %v5890_v36  ;;  %1807 = vmatpush1.msra.mxu1 %v7720_v14 }
 0x47c   :  { %1737 = vmatprep.subr.mxu0 %v7721_v16  ;;  %1808 = vmatprep.subr.mxu1 %v7722_v35 }
 0x47d   :  { %1738 = vmatpush1.msra.mxu0 %v7723_v37  ;;  %1809 = vmatpush1.msra.mxu1 %v7724_v2 }
 0x47e   :  { %1739 = vmatprep.subr.mxu0 %v7725_v18  ;;  %1810 = vmatprep.subr.mxu1 %v7726_v20 }
 0x47f   :  { %1740 = vmatpush1.msra.mxu0 %v7727_v39  ;;  %1811 = vmatpush1.msra.mxu1 %v7728_v41 }
 0x480   :  { %1741 = vmatprep.subr.mxu0 %v7729_v22  ;;  %1812 = vmatprep.subr.mxu1 %v7730_v24 }
 0x481   :  { %1742 = vmatpush1.msra.mxu0 %v7731_v43  ;;  %1813 = vmatpush1.msra.mxu1 %v7732_v45 }
 0x482   :  { %1743 = vmatprep.subr.mxu0 %v7733_v26  ;;  %1814 = vmatprep.subr.mxu1 %v7734_v28 }
 0x483   :  { %1744 = vmatpush1.msra.mxu0 %v7735_v47  ;;  %1777 = vmatprep.mubr.f32.mxu0 %v7736_v49 }
 0x484   :  { %1815 = vmatpush1.msra.mxu1 %v7737_v30  ;;  %1848 = vmatprep.mubr.f32.mxu1 %v7736_v49 }
 0x485   :  { %2023 = vmatprep.subr.mxu1 %v7738_v32 }
 0x524   :  { %v1540_v51 = vpop.f32.mrf.mxu0  ;;  %v1611_v54 = vpop.f32.mrf.mxu1 }
 0x525   :  { %v1616_v34 = vadd.f32 %v1540_v51, %v7739_v53  ;;  %v1618_v48 = vadd.f32 %v1611_v54, %v7742_v15  ;;  %v6333_v53 = vld [vmem:[#allocation6 + $0x68] sm:$0xff] }
 0x526   :  { %v1542_v36 = vpop.f32.mrf.mxu0  ;;  %v1613_v9 = vpop.f32.mrf.mxu1  ;;  %v6351_v54 = vld [vmem:[#allocation6 + $0x8] sm:$0xff] }
 0x527   :  { %v4807_v4 = vmul.f32 -1.442695, %v1616_v34  ;;  %v1617_v21 = vadd.f32 %v1542_v36, %v7740_v58  ;;  %v1619_v57 = vadd.f32 %v1613_v9, %v7741_v40  ;;  %v6336_v34 = vld [vmem:[#allocation6 + $0x60] sm:$0xff]  ;;  %v6339_v36 = vld [vmem:[#allocation6 + $0x48] sm:$0xff] }
 0x528   :  { %v6345_v58 = vld [vmem:[#allocation6 + $0x28] sm:$0xff] }
 0x529   :  { %4987 = vpow2.f32 %v4807_v4  ;;  %v4808_v6 = vmul.f32 -1.442695, %v1617_v21  ;;  %v4809_v60 = vmul.f32 -1.442695, %v1619_v57  ;;  %v6342_v4 = vld [vmem:[#allocation6 + $0x40] sm:$0xff]  ;;  %v7743_v40 = vld [vmem:[#allocation19_spill] sm:$0xff] }
 0x52a   :  { %v6348_v21 = vld [vmem:[#allocation6 + $0x20] sm:$0xff] }
 0x52b   :  { %4989 = vpow2.f32 %v4808_v6  ;;  %v6354_v6 = vld [vmem:[#allocation6] sm:$0xff] }
 0x52c   :  { %4991 = vtanh.f32 %v1618_v48 }
 0x52d   :  { %4993 = vpow2.f32 %v4809_v60  ;;  %v7744_v60 = vld [vmem:[#allocation20_spill] sm:$0xff] }
 0x536   :  { %v4988_v63 = vpop.eup %4987 }
 0x537   :  { %v1623_v52 = vadd.f32 1.0, %v4988_v63 }
 0x538   :  { %v4990_v61 = vpop.eup %4989 }
 0x539   :  { %4995 = vrcp.f32 %v1623_v52  ;;  %v1629_v44 = vadd.f32 1.0, %v4990_v61  ;;  %v4992_v59 = vpop.eup %4991 }
 0x53a   :  { %v4994_v56 = vpop.eup %4993 }
 0x53b   :  { %4997 = vrcp.f32 %v1629_v44  ;;  %v1636_v39 = vadd.f32 1.0, %v4994_v56 }
 0x53d   :  { %4999 = vrcp.f32 %v1636_v39 }
 0x546   :  { %v4996_v16 = vpop.eup %4995 }
 0x547   :  { %v1640_v37 = vmul.f32 %v4996_v16, %v4992_v59  ;;  %v7745_v59 = vld [vmem:[#allocation31_spill] sm:$0xff]  ;;  %v7746_v16 = vld [vmem:[#allocation30_spill] sm:$0xff] }
 0x548   :  { %v4998_v18 = vpop.eup %4997 }
 0x549   :  { %v1639_v22 = vmul.f32 %v4998_v18, %v6145_v11  ;;  %v6302_v11 = vld [vmem:[#allocation6 + $0x120] sm:$0xff] }
 0x54a   :  { %v5000_v26 = vpop.eup %4999 }
 0x54b   :  { %v6222_v43 = vadd.f32 %v1640_v37, %v1639_v22 }
 0x54d   :  { %5001 = vtanh.f32 %v6222_v43 }
 0x55a   :  { %v5002_v47 = vpop.eup %5001 }
 0x55b   :  { %v6225_v51 = vmul.f32 %v5002_v47, %v5000_v26 }
 0x55d   :  { %1778 = vmatmul.mubr.f32.vlgmr.msra.gmra.mxu0 %v6225_v51  ;;  %1849 = vmatmul.mubr.f32.vlgmr.msra.gmra.mxu1 %v6225_v51 }
 0x55e   :  { %2024 = vmatpush1.msra.mxu1 %v6090_v38  ;;  %2016 = vmatprep.mubr.f32.mxu0 %v7736_v49 }
 0x55f   :  { %2025 = vmatprep.subr.mxu1 %v6093_v17  ;;  %2087 = vmatprep.mubr.f32.mxu1 %v7736_v49 }
 0x560   :  { %2026 = vmatpush1.msra.mxu1 %v6096_v42 }
 0x561   :  { %2027 = vmatprep.subr.mxu1 %v6099_v55 }
 0x562   :  { %2028 = vmatpush1.msra.mxu1 %v6102_v33 }
 0x563   :  { %2029 = vmatprep.subr.mxu1 %v6105_v5 }
 0x564   :  { %2030 = vmatpush1.msra.mxu1 %v6108_v19 }
 0x565   :  { %2031 = vmatprep.subr.mxu1 %v6111_v8 }
 0x566   :  { %2032 = vmatpush1.msra.mxu1 %v6114_v10 }
 0x567   :  { %2033 = vmatprep.subr.mxu1 %v5975_v3  ;;  %v6263_v3 = vld [vmem:[#allocation6 + $0x1e8] sm:$0xff] }
 0x568   :  { %2034 = vmatpush1.msra.mxu1 %v5978_v23  ;;  %1952 = vmatprep.subr.mxu0 %v6263_v3  ;;  %v6266_v23 = vld [vmem:[#allocation6 + $0x1e0] sm:$0xff] }
 0x569   :  { %2035 = vmatprep.subr.mxu1 %v5981_v25  ;;  %1953 = vmatpush1.msra.mxu0 %v6266_v23  ;;  %v6269_v25 = vld [vmem:[#allocation6 + $0x1c8] sm:$0xff] }
 0x56a   :  { %2036 = vmatpush1.msra.mxu1 %v5984_v7  ;;  %1954 = vmatprep.subr.mxu0 %v6269_v25  ;;  %v6272_v7 = vld [vmem:[#allocation6 + $0x1c0] sm:$0xff] }
 0x56b   :  { %2037 = vmatprep.subr.mxu1 %v5987_v27  ;;  %1955 = vmatpush1.msra.mxu0 %v6272_v7  ;;  %v6275_v27 = vld [vmem:[#allocation6 + $0x1a8] sm:$0xff] }
 0x56c   :  { %2038 = vmatpush1.msra.mxu1 %v5989_v29  ;;  %1956 = vmatprep.subr.mxu0 %v6275_v27  ;;  %v6278_v29 = vld [vmem:[#allocation6 + $0x1a0] sm:$0xff] }
 0x56d   :  { %2039 = vmatprep.subr.mxu1 %v5991_v1  ;;  %1957 = vmatpush1.msra.mxu0 %v6278_v29  ;;  %v6281_v1 = vld [vmem:[#allocation6 + $0x188] sm:$0xff] }
 0x56e   :  { %2040 = vmatpush1.msra.mxu1 %v5994_v12  ;;  %1958 = vmatprep.subr.mxu0 %v6281_v1  ;;  %v6284_v12 = vld [vmem:[#allocation6 + $0x180] sm:$0xff] }
 0x56f   :  { %2041 = vmatprep.subr.mxu1 %v5997_v31  ;;  %1959 = vmatpush1.msra.mxu0 %v6284_v12  ;;  %v6287_v31 = vld [vmem:[#allocation6 + $0x168] sm:$0xff] }
 0x570   :  { %2042 = vmatpush1.msra.mxu1 %v6000_v50  ;;  %1960 = vmatprep.subr.mxu0 %v6287_v31  ;;  %v6290_v50 = vld [vmem:[#allocation6 + $0x160] sm:$0xff] }
 0x571   :  { %2043 = vmatprep.subr.mxu1 %v6003_v62  ;;  %1961 = vmatpush1.msra.mxu0 %v6290_v50  ;;  %v6293_v62 = vld [vmem:[#allocation6 + $0x148] sm:$0xff] }
 0x572   :  { %2044 = vmatpush1.msra.mxu1 %v6006_v0  ;;  %1962 = vmatprep.subr.mxu0 %v6293_v62  ;;  %v6296_v0 = vld [vmem:[#allocation6 + $0x140] sm:$0xff] }
 0x573   :  { %2045 = vmatprep.subr.mxu1 %v7706_v46  ;;  %1963 = vmatpush1.msra.mxu0 %v6296_v0  ;;  %v6299_v46 = vld [vmem:[#allocation6 + $0x128] sm:$0xff] }
 0x574   :  { %2046 = vmatpush1.msra.mxu1 %v7720_v14  ;;  %1964 = vmatprep.subr.mxu0 %v6299_v46  ;;  %v6305_v14 = vld [vmem:[#allocation6 + $0x108] sm:$0xff] }
 0x575   :  { %2047 = vmatprep.subr.mxu1 %v7722_v35  ;;  %1965 = vmatpush1.msra.mxu0 %v6302_v11  ;;  %v6307_v35 = vld [vmem:[#allocation6 + $0x100] sm:$0xff] }
 0x576   :  { %2048 = vmatpush1.msra.mxu1 %v7724_v2  ;;  %v6309_v2 = vld [vmem:[#allocation6 + $0xe8] sm:$0xff]  ;;  %1966 = vmatprep.subr.mxu0 %v6305_v14 }
 0x577   :  { %2049 = vmatprep.subr.mxu1 %v7726_v20  ;;  %v6312_v20 = vld [vmem:[#allocation6 + $0xe0] sm:$0xff]  ;;  %1967 = vmatpush1.msra.mxu0 %v6307_v35 }
 0x578   :  { %2050 = vmatpush1.msra.mxu1 %v7728_v41  ;;  %v6315_v41 = vld [vmem:[#allocation6 + $0xc8] sm:$0xff]  ;;  %1968 = vmatprep.subr.mxu0 %v6309_v2 }
 0x579   :  { %2051 = vmatprep.subr.mxu1 %v7730_v24  ;;  %v6318_v24 = vld [vmem:[#allocation6 + $0xc0] sm:$0xff]  ;;  %1969 = vmatpush1.msra.mxu0 %v6312_v20 }
 0x57a   :  { %2052 = vmatpush1.msra.mxu1 %v7732_v45  ;;  %v6321_v45 = vld [vmem:[#allocation6 + $0xa8] sm:$0xff]  ;;  %1970 = vmatprep.subr.mxu0 %v6315_v41 }
 0x57b   :  { %2053 = vmatprep.subr.mxu1 %v7734_v28  ;;  %v6324_v28 = vld [vmem:[#allocation6 + $0xa0] sm:$0xff]  ;;  %1971 = vmatpush1.msra.mxu0 %v6318_v24 }
 0x57c   :  { %2054 = vmatpush1.msra.mxu1 %v7737_v30  ;;  %v6327_v30 = vld [vmem:[#allocation6 + $0x88] sm:$0xff]  ;;  %1972 = vmatprep.subr.mxu0 %v6321_v45 }
 0x57d   :  { %2262 = vmatprep.subr.mxu1 %v7738_v32  ;;  %v6330_v32 = vld [vmem:[#allocation6 + $0x80] sm:$0xff]  ;;  %1973 = vmatpush1.msra.mxu0 %v6324_v28 }
 0x57e   :  { %1974 = vmatprep.subr.mxu0 %v6327_v30 }
 0x57f   :  { %1975 = vmatpush1.msra.mxu0 %v6330_v32 }
 0x580   :  { %1976 = vmatprep.subr.mxu0 %v6333_v53 }
 0x581   :  { %1977 = vmatpush1.msra.mxu0 %v6336_v34 }
 0x582   :  { %1978 = vmatprep.subr.mxu0 %v6339_v36 }
 0x583   :  { %1979 = vmatpush1.msra.mxu0 %v6342_v4 }
 0x584   :  { %1980 = vmatprep.subr.mxu0 %v6345_v58 }
 0x585   :  { %1981 = vmatpush1.msra.mxu0 %v6348_v21 }
 0x586   :  { %1982 = vmatprep.subr.mxu0 %v6351_v54 }
 0x587   :  { %1983 = vmatpush1.msra.mxu0 %v6354_v6 }
 0x588   :  { %2191 = vmatprep.subr.mxu0 %v6263_v3 }
 0x61d   :  { %v1779_v9 = vpop.f32.mrf.mxu0  ;;  %v1850_v52 = vpop.f32.mrf.mxu1 }
 0x61e   :  { %v1855_v57 = vadd.f32 %v1779_v9, %v7743_v40  ;;  %v1857_v37 = vadd.f32 %v1850_v52, %v7746_v16 }
 0x61f   :  { %v1781_v15 = vpop.f32.mrf.mxu0  ;;  %v1852_v44 = vpop.f32.mrf.mxu1 }
 0x620   :  { %v4810_v48 = vmul.f32 -1.442695, %v1855_v57  ;;  %v1856_v63 = vadd.f32 %v1781_v15, %v7744_v60  ;;  %v1858_v56 = vadd.f32 %v1852_v44, %v7745_v59 }
 0x622   :  { %5003 = vpow2.f32 %v4810_v48  ;;  %v4811_v61 = vmul.f32 -1.442695, %v1856_v63  ;;  %v4812_v18 = vmul.f32 -1.442695, %v1858_v56 }
 0x624   :  { %5005 = vpow2.f32 %v4811_v61 }
 0x625   :  { %5007 = vtanh.f32 %v1857_v37 }
 0x626   :  { %5009 = vpow2.f32 %v4812_v18 }
 0x62f   :  { %v5004_v39 = vpop.eup %5003 }
 0x630   :  { %v1862_v22 = vadd.f32 1.0, %v5004_v39 }
 0x631   :  { %v5006_v26 = vpop.eup %5005 }
 0x632   :  { %5011 = vrcp.f32 %v1862_v22  ;;  %v1868_v47 = vadd.f32 1.0, %v5006_v26  ;;  %v5008_v3 = vpop.eup %5007 }
 0x633   :  { %v5010_v9 = vpop.eup %5009 }
 0x634   :  { %5013 = vrcp.f32 %v1868_v47  ;;  %v1875_v48 = vadd.f32 1.0, %v5010_v9 }
 0x636   :  { %5015 = vrcp.f32 %v1875_v48  ;;  %v2434_v48 = vld [vmem:[#allocation8 + $0x1f0] sm:$0xff] }
 0x63f   :  { %v5012_v40 = vpop.eup %5011 }
 0x640   :  { %v1879_v57 = vmul.f32 %v5012_v40, %v5008_v3 }
 0x641   :  { %v5014_v15 = vpop.eup %5013 }
 0x642   :  { %v1878_v60 = vmul.f32 %v5014_v15, %v6222_v43  ;;  %v2153_v43 = vld [vmem:[#allocation6 + $0xd0] sm:$0xff]  ;;  %v2432_v15 = vld [vmem:[#allocation8 + $0x1e0] sm:$0xff] }
 0x643   :  { %v5016_v52 = vpop.eup %5015 }
 0x644   :  { %v6365_v63 = vadd.f32 %v1879_v57, %v1878_v60  ;;  %v2429_v60 = vld [vmem:[#allocation8 + $0x1c8] sm:$0xff] }
 0x646   :  { %5017 = vtanh.f32 %v6365_v63 }
 0x653   :  { %v5018_v61 = vpop.eup %5017 }
 0x654   :  { %v6368_v44 = vmul.f32 %v5018_v61, %v5016_v52  ;;  %v2431_v52 = vld [vmem:[#allocation8 + $0x1d8] sm:$0xff]  ;;  %v2428_v61 = vld [vmem:[#allocation8 + $0x1c0] sm:$0xff] }
 0x656   :  { %2017 = vmatmul.mubr.f32.vlgmr.msra.gmra.mxu0 %v6368_v44  ;;  %2088 = vmatmul.mubr.f32.vlgmr.msra.gmra.mxu1 %v6368_v44 }
 0x657   :  { %2192 = vmatpush1.msra.mxu0 %v6266_v23  ;;  %2263 = vmatpush1.msra.mxu1 %v6090_v38  ;;  %v2170_v38 = vld [vmem:[#allocation6 + $0x158] sm:$0xff] }
 0x658   :  { %2193 = vmatprep.subr.mxu0 %v6269_v25  ;;  %2264 = vmatprep.subr.mxu1 %v6093_v17  ;;  %v2169_v17 = vld [vmem:[#allocation6 + $0x150] sm:$0xff]  ;;  %v2150_v23 = vld [vmem:[#allocation6 + $0xb8] sm:$0xff] }
 0x659   :  { %2194 = vmatpush1.msra.mxu0 %v6272_v7  ;;  %2265 = vmatpush1.msra.mxu1 %v6096_v42  ;;  %v2166_v42 = vld [vmem:[#allocation6 + $0x138] sm:$0xff]  ;;  %v2149_v25 = vld [vmem:[#allocation6 + $0xb0] sm:$0xff] }
 0x65a   :  { %2195 = vmatprep.subr.mxu0 %v6275_v27  ;;  %2266 = vmatprep.subr.mxu1 %v6099_v55  ;;  %v2165_v55 = vld [vmem:[#allocation6 + $0x130] sm:$0xff]  ;;  %v2146_v7 = vld [vmem:[#allocation6 + $0x98] sm:$0xff]  ;;  %v2433_v27 = vld [vmem:[#allocation8 + $0x1e8] sm:$0xff] }
 0x65b   :  { %2196 = vmatpush1.msra.mxu0 %v6278_v29  ;;  %2267 = vmatpush1.msra.mxu1 %v6102_v33  ;;  %v2162_v33 = vld [vmem:[#allocation6 + $0x118] sm:$0xff]  ;;  %v2145_v29 = vld [vmem:[#allocation6 + $0x90] sm:$0xff] }
 0x65c   :  { %2197 = vmatprep.subr.mxu0 %v6281_v1  ;;  %2268 = vmatprep.subr.mxu1 %v6105_v5  ;;  %v2161_v5 = vld [vmem:[#allocation6 + $0x110] sm:$0xff]  ;;  %v2142_v1 = vld [vmem:[#allocation6 + $0x78] sm:$0xff] }
 0x65d   :  { %2198 = vmatpush1.msra.mxu0 %v6284_v12  ;;  %2269 = vmatpush1.msra.mxu1 %v6108_v19  ;;  %v2158_v19 = vld [vmem:[#allocation6 + $0xf8] sm:$0xff]  ;;  %v2141_v12 = vld [vmem:[#allocation6 + $0x70] sm:$0xff] }
 0x65e   :  { %2199 = vmatprep.subr.mxu0 %v6287_v31  ;;  %2270 = vmatprep.subr.mxu1 %v6111_v8  ;;  %v2157_v8 = vld [vmem:[#allocation6 + $0xf0] sm:$0xff]  ;;  %v2138_v31 = vld [vmem:[#allocation6 + $0x58] sm:$0xff] }
 0x65f   :  { %2200 = vmatpush1.msra.mxu0 %v6290_v50  ;;  %2271 = vmatpush1.msra.mxu1 %v6114_v10  ;;  %v2154_v10 = vld [vmem:[#allocation6 + $0xd8] sm:$0xff]  ;;  %v2137_v50 = vld [vmem:[#allocation6 + $0x50] sm:$0xff] }
 0x660   :  { %2201 = vmatprep.subr.mxu0 %v6293_v62  ;;  %2255 = vmatprep.mubr.f32.mxu0 %v7736_v49  ;;  %v2134_v62 = vld [vmem:[#allocation6 + $0x38] sm:$0xff] }
 0x661   :  { %2202 = vmatpush1.msra.mxu0 %v6296_v0  ;;  %2326 = vmatprep.mubr.f32.mxu1 %v7736_v49  ;;  %v2133_v0 = vld [vmem:[#allocation6 + $0x30] sm:$0xff] }
 0x662   :  { %2203 = vmatprep.subr.mxu0 %v6299_v46  ;;  %2272 = vmatprep.subr.mxu1 %v2170_v38  ;;  %v2130_v46 = vld [vmem:[#allocation6 + $0x18] sm:$0xff]  ;;  %v2430_v38 = vld [vmem:[#allocation8 + $0x1d0] sm:$0xff] }
 0x663   :  { %2204 = vmatpush1.msra.mxu0 %v6302_v11  ;;  %2273 = vmatpush1.msra.mxu1 %v2169_v17  ;;  %v2129_v11 = vld [vmem:[#allocation6 + $0x10] sm:$0xff]  ;;  %v2427_v17 = vld [vmem:[#allocation8 + $0x1b8] sm:$0xff] }
 0x664   :  { %2205 = vmatprep.subr.mxu0 %v6305_v14  ;;  %2274 = vmatprep.subr.mxu1 %v2166_v42  ;;  %v2435_v14 = vld [vmem:[#allocation8 + $0x1f8] sm:$0xff]  ;;  %v2424_v42 = vld [vmem:[#allocation8 + $0x1a0] sm:$0xff] }
 0x665   :  { %2206 = vmatpush1.msra.mxu0 %v6307_v35  ;;  %2275 = vmatpush1.msra.mxu1 %v2165_v55  ;;  %v2426_v55 = vld [vmem:[#allocation8 + $0x1b0] sm:$0xff] }
 0x666   :  { %2207 = vmatprep.subr.mxu0 %v6309_v2  ;;  %2276 = vmatprep.subr.mxu1 %v2162_v33  ;;  %v7747_v2 = vld [vmem:[#allocation21_spill] sm:$0xff]  ;;  %v2421_v33 = vld [vmem:[#allocation8 + $0x188] sm:$0xff] }
 0x667   :  { %2208 = vmatpush1.msra.mxu0 %v6312_v20  ;;  %2277 = vmatpush1.msra.mxu1 %v2161_v5  ;;  %v2423_v5 = vld [vmem:[#allocation8 + $0x198] sm:$0xff] }
 0x668   :  { %2209 = vmatprep.subr.mxu0 %v6315_v41  ;;  %2278 = vmatprep.subr.mxu1 %v2158_v19  ;;  %v2420_v19 = vld [vmem:[#allocation8 + $0x180] sm:$0xff] }
 0x669   :  { %2210 = vmatpush1.msra.mxu0 %v6318_v24  ;;  %2279 = vmatpush1.msra.mxu1 %v2157_v8  ;;  %v2422_v8 = vld [vmem:[#allocation8 + $0x190] sm:$0xff] }
 0x66a   :  { %2211 = vmatprep.subr.mxu0 %v6321_v45  ;;  %2280 = vmatprep.subr.mxu1 %v2154_v10  ;;  %v7748_v45 = vld [vmem:[#allocation22_spill] sm:$0xff]  ;;  %v2417_v10 = vld [vmem:[#allocation8 + $0x168] sm:$0xff] }
 0x66b   :  { %2212 = vmatpush1.msra.mxu0 %v6324_v28  ;;  %2281 = vmatpush1.msra.mxu1 %v2153_v43  ;;  %v2419_v43 = vld [vmem:[#allocation8 + $0x178] sm:$0xff] }
 0x66c   :  { %2213 = vmatprep.subr.mxu0 %v6327_v30  ;;  %2282 = vmatprep.subr.mxu1 %v2150_v23  ;;  %v2416_v23 = vld [vmem:[#allocation8 + $0x160] sm:$0xff] }
 0x66d   :  { %2214 = vmatpush1.msra.mxu0 %v6330_v32  ;;  %2283 = vmatpush1.msra.mxu1 %v2149_v25  ;;  %v2418_v25 = vld [vmem:[#allocation8 + $0x170] sm:$0xff] }
 0x66e   :  { %2215 = vmatprep.subr.mxu0 %v6333_v53  ;;  %2284 = vmatprep.subr.mxu1 %v2146_v7  ;;  %v2413_v7 = vld [vmem:[#allocation8 + $0x148] sm:$0xff] }
 0x66f   :  { %2216 = vmatpush1.msra.mxu0 %v6336_v34  ;;  %2285 = vmatpush1.msra.mxu1 %v2145_v29  ;;  %v7749_v34 = vld [vmem:[#allocation33_spill] sm:$0xff]  ;;  %v2412_v29 = vld [vmem:[#allocation8 + $0x140] sm:$0xff] }
 0x670   :  { %2217 = vmatprep.subr.mxu0 %v6339_v36  ;;  %2286 = vmatprep.subr.mxu1 %v2142_v1  ;;  %v2414_v1 = vld [vmem:[#allocation8 + $0x150] sm:$0xff] }
 0x671   :  { %2218 = vmatpush1.msra.mxu0 %v6342_v4  ;;  %2287 = vmatpush1.msra.mxu1 %v2141_v12  ;;  %v7750_v4 = vld [vmem:[#allocation32_spill] sm:$0xff]  ;;  %v2409_v12 = vld [vmem:[#allocation8 + $0x128] sm:$0xff] }
 0x672   :  { %2219 = vmatprep.subr.mxu0 %v6345_v58  ;;  %2288 = vmatprep.subr.mxu1 %v2138_v31  ;;  %v2411_v31 = vld [vmem:[#allocation8 + $0x138] sm:$0xff] }
 0x673   :  { %2220 = vmatpush1.msra.mxu0 %v6348_v21  ;;  %2289 = vmatpush1.msra.mxu1 %v2137_v50  ;;  %v2408_v50 = vld [vmem:[#allocation8 + $0x120] sm:$0xff] }
 0x674   :  { %2221 = vmatprep.subr.mxu0 %v6351_v54  ;;  %2290 = vmatprep.subr.mxu1 %v2134_v62  ;;  %v2410_v62 = vld [vmem:[#allocation8 + $0x130] sm:$0xff] }
 0x675   :  { %2222 = vmatpush1.msra.mxu0 %v6354_v6  ;;  %2291 = vmatpush1.msra.mxu1 %v2133_v0  ;;  %v2405_v0 = vld [vmem:[#allocation8 + $0x108] sm:$0xff] }
 0x676   :  { %2458 = vmatprep.subr.mxu0 %v2433_v27  ;;  %2292 = vmatprep.subr.mxu1 %v2130_v46  ;;  %v2415_v27 = vld [vmem:[#allocation8 + $0x158] sm:$0xff] }
 0x677   :  { %2293 = vmatpush1.msra.mxu1 %v2129_v11  ;;  %v2407_v46 = vld [vmem:[#allocation8 + $0x118] sm:$0xff]  ;;  %v2404_v11 = vld [vmem:[#allocation8 + $0x100] sm:$0xff] }
 0x678   :  { %2571 = vmatprep.subr.mxu1 %v2435_v14  ;;  %v2406_v14 = vld [vmem:[#allocation8 + $0x110] sm:$0xff] }
 0x716   :  { %v2018_v35 = vpop.f32.mrf.mxu0  ;;  %v2089_v30 = vpop.f32.mrf.mxu1 }
 0x717   :  { %v2094_v20 = vadd.f32 %v2018_v35, %v7747_v2  ;;  %v2096_v58 = vadd.f32 %v2089_v30, %v7750_v4  ;;  %v2401_v35 = vld [vmem:[#allocation8 + $0xe8] sm:$0xff]  ;;  %v2403_v2 = vld [vmem:[#allocation8 + $0xf8] sm:$0xff]  ;;  %v2398_v30 = vld [vmem:[#allocation8 + $0xd0] sm:$0xff] }
 0x718   :  { %v2020_v41 = vpop.f32.mrf.mxu0  ;;  %v2091_v53 = vpop.f32.mrf.mxu1  ;;  %v2389_v4 = vld [vmem:[#allocation8 + $0x88] sm:$0xff] }
 0x719   :  { %v4813_v24 = vmul.f32 -1.442695, %v2094_v20  ;;  %v2095_v28 = vadd.f32 %v2020_v41, %v7748_v45  ;;  %v2097_v36 = vadd.f32 %v2091_v53, %v7749_v34  ;;  %v2400_v20 = vld [vmem:[#allocation8 + $0xe0] sm:$0xff]  ;;  %v2402_v41 = vld [vmem:[#allocation8 + $0xf0] sm:$0xff]  ;;  %v2399_v45 = vld [vmem:[#allocation8 + $0xd8] sm:$0xff] }
 0x71a   :  { %v2395_v53 = vld [vmem:[#allocation8 + $0xb8] sm:$0xff]  ;;  %v2392_v34 = vld [vmem:[#allocation8 + $0xa0] sm:$0xff] }
 0x71b   :  { %5019 = vpow2.f32 %v4813_v24  ;;  %v4814_v32 = vmul.f32 -1.442695, %v2095_v28  ;;  %v4815_v21 = vmul.f32 -1.442695, %v2097_v36  ;;  %v2397_v24 = vld [vmem:[#allocation8 + $0xc8] sm:$0xff]  ;;  %v2396_v28 = vld [vmem:[#allocation8 + $0xc0] sm:$0xff] }
 0x71c   :  { %v2394_v36 = vld [vmem:[#allocation8 + $0xb0] sm:$0xff] }
 0x71d   :  { %5021 = vpow2.f32 %v4814_v32  ;;  %v2393_v32 = vld [vmem:[#allocation8 + $0xa8] sm:$0xff] }
 0x71e   :  { %5023 = vtanh.f32 %v2096_v58  ;;  %v2391_v58 = vld [vmem:[#allocation8 + $0x98] sm:$0xff] }
 0x71f   :  { %5025 = vpow2.f32 %v4815_v21  ;;  %v2388_v21 = vld [vmem:[#allocation8 + $0x80] sm:$0xff] }
 0x728   :  { %v5020_v54 = vpop.eup %5019 }
 0x729   :  { %v2101_v6 = vadd.f32 1.0, %v5020_v54  ;;  %v2390_v54 = vld [vmem:[#allocation8 + $0x90] sm:$0xff] }
 0x72a   :  { %v5022_v59 = vpop.eup %5021 }
 0x72b   :  { %5027 = vrcp.f32 %v2101_v6  ;;  %v2107_v56 = vadd.f32 1.0, %v5022_v59  ;;  %v5024_v16 = vpop.eup %5023  ;;  %v2385_v6 = vld [vmem:[#allocation8 + $0x68] sm:$0xff]  ;;  %v2387_v59 = vld [vmem:[#allocation8 + $0x78] sm:$0xff] }
 0x72c   :  { %v5026_v37 = vpop.eup %5025 }
 0x72d   :  { %5029 = vrcp.f32 %v2107_v56  ;;  %v2114_v26 = vadd.f32 1.0, %v5026_v37  ;;  %v2384_v56 = vld [vmem:[#allocation8 + $0x60] sm:$0xff]  ;;  %v2381_v37 = vld [vmem:[#allocation8 + $0x48] sm:$0xff] }
 0x72f   :  { %5031 = vrcp.f32 %v2114_v26  ;;  %v2377_v26 = vld [vmem:[#allocation8 + $0x28] sm:$0xff] }
 0x738   :  { %v5028_v18 = vpop.eup %5027 }
 0x739   :  { %v2118_v39 = vmul.f32 %v5028_v18, %v5024_v16  ;;  %v2386_v16 = vld [vmem:[#allocation8 + $0x70] sm:$0xff]  ;;  %v2383_v18 = vld [vmem:[#allocation8 + $0x58] sm:$0xff] }
 0x73a   :  { %v5030_v22 = vpop.eup %5029 }
 0x73b   :  { %v2117_v47 = vmul.f32 %v5030_v22, %v6365_v63  ;;  %v2425_v63 = vld [vmem:[#allocation8 + $0x1a8] sm:$0xff]  ;;  %v2382_v22 = vld [vmem:[#allocation8 + $0x50] sm:$0xff] }
 0x73c   :  { %v5032_v9 = vpop.eup %5031 }
 0x73d   :  { %v6419_v3 = vadd.f32 %v2118_v39, %v2117_v47  ;;  %v2380_v39 = vld [vmem:[#allocation8 + $0x40] sm:$0xff]  ;;  %v2379_v47 = vld [vmem:[#allocation8 + $0x38] sm:$0xff] }
 0x73f   :  { %5033 = vtanh.f32 %v6419_v3 }
 0x74c   :  { %v5034_v40 = vpop.eup %5033 }
 0x74d   :  { %v6422_v57 = vmul.f32 %v5034_v40, %v5032_v9  ;;  %v2376_v9 = vld [vmem:[#allocation8 + $0x20] sm:$0xff]  ;;  %v2378_v40 = vld [vmem:[#allocation8 + $0x30] sm:$0xff] }
 0x74f   :  { %2256 = vmatmul.mubr.f32.vlgmr.msra.gmra.mxu0 %v6422_v57  ;;  %2327 = vmatmul.mubr.f32.vlgmr.msra.gmra.mxu1 %v6422_v57 }
 0x750   :  { %2459 = vmatpush1.msra.mxu0 %v2432_v15  ;;  %2572 = vmatpush1.msra.mxu1 %v2434_v48  ;;  %v2373_v15 = vld [vmem:[#allocation8 + $0x8] sm:$0xff]  ;;  %v2375_v48 = vld [vmem:[#allocation8 + $0x18] sm:$0xff] }
 0x751   :  { %2460 = vmatprep.subr.mxu0 %v2429_v60  ;;  %2573 = vmatprep.subr.mxu1 %v2431_v52  ;;  %v2372_v60 = vld [vmem:[#allocation8] sm:$0xff]  ;;  %v2374_v52 = vld [vmem:[#allocation8 + $0x10] sm:$0xff] }
 0x752   :  { %2461 = vmatpush1.msra.mxu0 %v2428_v61  ;;  %2574 = vmatpush1.msra.mxu1 %v2430_v38  ;;  %v7751_v61 = vld [vmem:[#allocation36_spill] sm:$0xff]  ;;  %v7752_v38 = vld [vmem:[#allocation45_spill] sm:$0xff] }
 0x753   :  { %2462 = vmatprep.subr.mxu0 %v2425_v63  ;;  %2575 = vmatprep.subr.mxu1 %v2427_v17  ;;  %v7753_v63 = vld [vmem:[#allocation25_spill] sm:$0xff]  ;;  %v6464_v17 = vld [vmem:[#allocation9 + $0x1f0] sm:$0xff] }
 0x754   :  { %2463 = vmatpush1.msra.mxu0 %v2424_v42  ;;  %2576 = vmatpush1.msra.mxu1 %v2426_v55  ;;  %v6470_v42 = vld [vmem:[#allocation9 + $0x1d8] sm:$0xff]  ;;  %v6474_v55 = vld [vmem:[#allocation9 + $0x1c0] sm:$0xff] }
 0x755   :  { %2464 = vmatprep.subr.mxu0 %v2421_v33  ;;  %2577 = vmatprep.subr.mxu1 %v2423_v5  ;;  %v6476_v33 = vld [vmem:[#allocation9 + $0x1d0] sm:$0xff]  ;;  %v6480_v5 = vld [vmem:[#allocation9 + $0x1a8] sm:$0xff] }
 0x756   :  { %2465 = vmatpush1.msra.mxu0 %v2420_v19  ;;  %2578 = vmatpush1.msra.mxu1 %v2422_v8  ;;  %v6482_v19 = vld [vmem:[#allocation9 + $0x1b8] sm:$0xff]  ;;  %v6486_v8 = vld [vmem:[#allocation9 + $0x1a0] sm:$0xff] }
 0x757   :  { %2466 = vmatprep.subr.mxu0 %v2417_v10  ;;  %2579 = vmatprep.subr.mxu1 %v2419_v43  ;;  %v6488_v10 = vld [vmem:[#allocation9 + $0x1b0] sm:$0xff]  ;;  %v6492_v43 = vld [vmem:[#allocation9 + $0x188] sm:$0xff] }
 0x758   :  { %2467 = vmatpush1.msra.mxu0 %v2416_v23  ;;  %2580 = vmatpush1.msra.mxu1 %v2418_v25  ;;  %v6494_v23 = vld [vmem:[#allocation9 + $0x198] sm:$0xff]  ;;  %v6498_v25 = vld [vmem:[#allocation9 + $0x180] sm:$0xff] }
 0x759   :  { %2468 = vmatprep.subr.mxu0 %v2413_v7  ;;  %2581 = vmatprep.subr.mxu1 %v2415_v27  ;;  %v6500_v7 = vld [vmem:[#allocation9 + $0x190] sm:$0xff]  ;;  %v6504_v27 = vld [vmem:[#allocation9 + $0x168] sm:$0xff] }
 0x75a   :  { %2469 = vmatpush1.msra.mxu0 %v2412_v29  ;;  %2582 = vmatpush1.msra.mxu1 %v2414_v1  ;;  %v6506_v29 = vld [vmem:[#allocation9 + $0x178] sm:$0xff]  ;;  %v6510_v1 = vld [vmem:[#allocation9 + $0x160] sm:$0xff] }
 0x75b   :  { %2470 = vmatprep.subr.mxu0 %v2409_v12  ;;  %2583 = vmatprep.subr.mxu1 %v2411_v31  ;;  %v6512_v12 = vld [vmem:[#allocation9 + $0x170] sm:$0xff]  ;;  %v6516_v31 = vld [vmem:[#allocation9 + $0x148] sm:$0xff] }
 0x75c   :  { %2471 = vmatpush1.msra.mxu0 %v2408_v50  ;;  %2584 = vmatpush1.msra.mxu1 %v2410_v62  ;;  %v6518_v50 = vld [vmem:[#allocation9 + $0x158] sm:$0xff]  ;;  %v6522_v62 = vld [vmem:[#allocation9 + $0x140] sm:$0xff] }
 0x75d   :  { %2472 = vmatprep.subr.mxu0 %v2405_v0  ;;  %2585 = vmatprep.subr.mxu1 %v2407_v46  ;;  %v6524_v0 = vld [vmem:[#allocation9 + $0x150] sm:$0xff]  ;;  %v6528_v46 = vld [vmem:[#allocation9 + $0x128] sm:$0xff] }
 0x75e   :  { %2473 = vmatpush1.msra.mxu0 %v2404_v11  ;;  %2586 = vmatpush1.msra.mxu1 %v2406_v14  ;;  %v6530_v11 = vld [vmem:[#allocation9 + $0x138] sm:$0xff]  ;;  %v6534_v14 = vld [vmem:[#allocation9 + $0x120] sm:$0xff] }
 0x75f   :  { %2474 = vmatprep.subr.mxu0 %v2401_v35  ;;  %2587 = vmatprep.subr.mxu1 %v2403_v2  ;;  %v6536_v35 = vld [vmem:[#allocation9 + $0x130] sm:$0xff]  ;;  %v6540_v2 = vld [vmem:[#allocation9 + $0x108] sm:$0xff] }
 0x760   :  { %2475 = vmatpush1.msra.mxu0 %v2400_v20  ;;  %2588 = vmatpush1.msra.mxu1 %v2402_v41  ;;  %v6542_v20 = vld [vmem:[#allocation9 + $0x118] sm:$0xff]  ;;  %v6546_v41 = vld [vmem:[#allocation9 + $0x100] sm:$0xff] }
 0x761   :  { %2476 = vmatprep.subr.mxu0 %v2397_v24  ;;  %2589 = vmatprep.subr.mxu1 %v2399_v45  ;;  %v6548_v24 = vld [vmem:[#allocation9 + $0x110] sm:$0xff]  ;;  %v6552_v45 = vld [vmem:[#allocation9 + $0xe8] sm:$0xff] }
 0x762   :  { %2477 = vmatpush1.msra.mxu0 %v2396_v28  ;;  %2590 = vmatpush1.msra.mxu1 %v2398_v30  ;;  %v6554_v28 = vld [vmem:[#allocation9 + $0xf8] sm:$0xff]  ;;  %v6558_v30 = vld [vmem:[#allocation9 + $0xe0] sm:$0xff] }
 0x763   :  { %2478 = vmatprep.subr.mxu0 %v2393_v32  ;;  %2591 = vmatprep.subr.mxu1 %v2395_v53  ;;  %v6560_v32 = vld [vmem:[#allocation9 + $0xf0] sm:$0xff]  ;;  %v6564_v53 = vld [vmem:[#allocation9 + $0xc8] sm:$0xff] }
 0x764   :  { %2479 = vmatpush1.msra.mxu0 %v2392_v34  ;;  %2592 = vmatpush1.msra.mxu1 %v2394_v36  ;;  %v6566_v34 = vld [vmem:[#allocation9 + $0xd8] sm:$0xff]  ;;  %v6570_v36 = vld [vmem:[#allocation9 + $0xc0] sm:$0xff] }
 0x765   :  { %2480 = vmatprep.subr.mxu0 %v2389_v4  ;;  %2593 = vmatprep.subr.mxu1 %v2391_v58  ;;  %v6572_v4 = vld [vmem:[#allocation9 + $0xd0] sm:$0xff]  ;;  %v6576_v58 = vld [vmem:[#allocation9 + $0xa8] sm:$0xff] }
 0x766   :  { %2481 = vmatpush1.msra.mxu0 %v2388_v21  ;;  %2594 = vmatpush1.msra.mxu1 %v2390_v54  ;;  %v6578_v21 = vld [vmem:[#allocation9 + $0xb8] sm:$0xff]  ;;  %v6582_v54 = vld [vmem:[#allocation9 + $0xa0] sm:$0xff] }
 0x767   :  { %2482 = vmatprep.subr.mxu0 %v2385_v6  ;;  %2595 = vmatprep.subr.mxu1 %v2387_v59  ;;  %v6584_v6 = vld [vmem:[#allocation9 + $0xb0] sm:$0xff]  ;;  %v6588_v59 = vld [vmem:[#allocation9 + $0x88] sm:$0xff] }
 0x768   :  { %2483 = vmatpush1.msra.mxu0 %v2384_v56  ;;  %2596 = vmatpush1.msra.mxu1 %v2386_v16  ;;  %7756 = vst [vmem:[#allocation16_spill] sm:$0xff] %v6588_v59  ;;  %v6590_v56 = vld [vmem:[#allocation9 + $0x98] sm:$0xff]  ;;  %v6594_v16 = vld [vmem:[#allocation9 + $0x80] sm:$0xff] }
 0x769   :  { %2484 = vmatprep.subr.mxu0 %v2381_v37  ;;  %2597 = vmatprep.subr.mxu1 %v2383_v18  ;;  %7757 = vst [vmem:[#allocation27_spill] sm:$0xff] %v6590_v56  ;;  %7758 = vst [vmem:[#allocation26_spill] sm:$0xff] %v6594_v16  ;;  %v6596_v37 = vld [vmem:[#allocation9 + $0x90] sm:$0xff]  ;;  %v6600_v18 = vld [vmem:[#allocation9 + $0x68] sm:$0xff] }
 0x76a   :  { %2485 = vmatpush1.msra.mxu0 %v2380_v39  ;;  %2598 = vmatpush1.msra.mxu1 %v2382_v22  ;;  %7759 = vst [vmem:[#allocation47_spill] sm:$0xff] %v6596_v37  ;;  %7760 = vst [vmem:[#allocation37_spill] sm:$0xff] %v6600_v18  ;;  %v6602_v39 = vld [vmem:[#allocation9 + $0x78] sm:$0xff]  ;;  %v6606_v22 = vld [vmem:[#allocation9 + $0x60] sm:$0xff] }
 0x76b   :  { %2486 = vmatprep.subr.mxu0 %v2377_v26  ;;  %2599 = vmatprep.subr.mxu1 %v2379_v47  ;;  %7761 = vst [vmem:[#allocation48_spill] sm:$0xff] %v6602_v39  ;;  %7762 = vst [vmem:[#allocation38_spill] sm:$0xff] %v6606_v22  ;;  %v6608_v26 = vld [vmem:[#allocation9 + $0x70] sm:$0xff]  ;;  %v6612_v47 = vld [vmem:[#allocation9 + $0x48] sm:$0xff] }
 0x76c   :  { %2487 = vmatpush1.msra.mxu0 %v2376_v9  ;;  %2600 = vmatpush1.msra.mxu1 %v2378_v40  ;;  %7763 = vst [vmem:[#allocation49_spill] sm:$0xff] %v6608_v26  ;;  %7764 = vst [vmem:[#allocation39_spill] sm:$0xff] %v6612_v47  ;;  %v6614_v9 = vld [vmem:[#allocation9 + $0x58] sm:$0xff]  ;;  %v6618_v40 = vld [vmem:[#allocation9 + $0x40] sm:$0xff] }
 0x76d   :  { %2488 = vmatprep.subr.mxu0 %v2373_v15  ;;  %2601 = vmatprep.subr.mxu1 %v2375_v48  ;;  %7765 = vst [vmem:[#allocation50_spill] sm:$0xff] %v6614_v9  ;;  %7766 = vst [vmem:[#allocation40_spill] sm:$0xff] %v6618_v40  ;;  %v6620_v15 = vld [vmem:[#allocation9 + $0x50] sm:$0xff]  ;;  %v6624_v48 = vld [vmem:[#allocation9 + $0x28] sm:$0xff] }
 0x76e   :  { %2489 = vmatpush1.msra.mxu0 %v2372_v60  ;;  %2522 = vmatprep.mubr.f32.mxu0 %v7736_v49  ;;  %7767 = vst [vmem:[#allocation51_spill] sm:$0xff] %v6620_v15  ;;  %7768 = vst [vmem:[#allocation41_spill] sm:$0xff] %v6624_v48  ;;  %v6626_v60 = vld [vmem:[#allocation9 + $0x38] sm:$0xff] }
 0x76f   :  { %2602 = vmatpush1.msra.mxu1 %v2374_v52  ;;  %2635 = vmatprep.mubr.f32.mxu1 %v7736_v49  ;;  %7769 = vst [vmem:[#allocation52_spill] sm:$0xff] %v6626_v60  ;;  %v6630_v52 = vld [vmem:[#allocation9 + $0x20] sm:$0xff] }
 0x770   :  { %2523 = vmatmul.mubr.f32.vlgmr.msra.gmra.mxu0 %v7751_v61  ;;  %2636 = vmatmul.mubr.f32.vlgmr.msra.gmra.mxu1 %v7751_v61  ;;  %7770 = vst [vmem:[#allocation42_spill] sm:$0xff] %v6630_v52  ;;  %v6632_v61 = vld [vmem:[#allocation9 + $0x30] sm:$0xff] }
 0x771   :  { %2528 = vmatprep.mubr.f32.mxu0 %v7736_v49  ;;  %2641 = vmatprep.mubr.f32.mxu1 %v7736_v49  ;;  %7771 = vst [vmem:[#allocation53_spill] sm:$0xff] %v6632_v61 }
 0x774   :  { %2529 = vmatmul.mubr.f32.gmra.mxu0 %v7752_v38  ;;  %2642 = vmatmul.mubr.f32.gmra.mxu1 %v7752_v38  ;;  %v6636_v38 = vld [vmem:[#allocation9 + $0x8] sm:$0xff] }
 0x775   :  { %2534 = vmatprep.mubr.f32.mxu0 %v7736_v49  ;;  %2647 = vmatprep.mubr.f32.mxu1 %v7736_v49  ;;  %7772 = vst [vmem:[#allocation43_spill] sm:$0xff] %v6636_v38 }
 0x778   :  { %2535 = vmatmul.mubr.f32.gmra.mxu0 %v7753_v63  ;;  %2648 = vmatmul.mubr.f32.gmra.mxu1 %v7753_v63  ;;  %v6638_v63 = vld [vmem:[#allocation9 + $0x18] sm:$0xff] }
 0x779   :  { %2540 = vmatprep.mubr.f32.mxu0 %v7736_v49  ;;  %2653 = vmatprep.mubr.f32.mxu1 %v7736_v49  ;;  %7773 = vst [vmem:[#allocation54_spill] sm:$0xff] %v6638_v63 }
 0x77c   :  { %2541 = vmatmul.mubr.f32.gmra.mxu0 %v6148_v13  ;;  %2654 = vmatmul.mubr.f32.gmra.mxu1 %v6148_v13  ;;  %v6456_v13 = vld [vmem:[#allocation9 + $0x1e8] sm:$0xff] }
 0x77d   :  { %2546 = vmatprep.mubr.f32.mxu0 %v7736_v49  ;;  %2659 = vmatprep.mubr.f32.mxu1 %v7736_v49  ;;  %7754 = vst [vmem:[#allocation46_spill] sm:$0xff] %v6456_v13 }
 0x77e   :  { %2788 = vmatprep.subr.mxu0 %v6456_v13 }
 0x780   :  { %2547 = vmatmul.mubr.f32.gmra.mxu0 %v6225_v51  ;;  %2660 = vmatmul.mubr.f32.gmra.mxu1 %v6225_v51  ;;  %v6458_v51 = vld [vmem:[#allocation9 + $0x1f8] sm:$0xff] }
 0x781   :  { %2552 = vmatprep.mubr.f32.mxu0 %v7736_v49  ;;  %2665 = vmatprep.mubr.f32.mxu1 %v7736_v49  ;;  %7755 = vst [vmem:[#allocation15_spill] sm:$0xff] %v6458_v51 }
 0x782   :  { %2859 = vmatprep.subr.mxu1 %v6458_v51 }
 0x783   :  { %2860 = vmatpush1.msra.mxu1 %v6464_v17 }
 0x784   :  { %2553 = vmatmul.mubr.f32.gmra.mxu0 %v6368_v44  ;;  %2666 = vmatmul.mubr.f32.gmra.mxu1 %v6368_v44  ;;  %v6462_v44 = vld [vmem:[#allocation9 + $0x1e0] sm:$0xff] }
 0x785   :  { %2558 = vmatprep.mubr.f32.mxu0 %v7736_v49  ;;  %2671 = vmatprep.mubr.f32.mxu1 %v7736_v49 }
 0x786   :  { %2789 = vmatpush1.msra.mxu0 %v6462_v44  ;;  %2861 = vmatprep.subr.mxu1 %v6470_v42 }
 0x787   :  { %2862 = vmatpush1.msra.mxu1 %v6476_v33 }
 0x788   :  { %2559 = vmatmul.mubr.f32.gmra.mxu0 %v6422_v57  ;;  %2672 = vmatmul.mubr.f32.gmra.mxu1 %v6422_v57  ;;  %v6468_v57 = vld [vmem:[#allocation9 + $0x1c8] sm:$0xff] }
 0x789   :  { %2564 = vmatprep.mubr.f32.mxu0 %v7736_v49  ;;  %2677 = vmatprep.mubr.f32.mxu1 %v7736_v49 }
 0x78a   :  { %2790 = vmatprep.subr.mxu0 %v6468_v57  ;;  %2863 = vmatprep.subr.mxu1 %v6482_v19 }
 0x78b   :  { %2791 = vmatpush1.msra.mxu0 %v6474_v55  ;;  %2864 = vmatpush1.msra.mxu1 %v6488_v10 }
 0x78c   :  { %2792 = vmatprep.subr.mxu0 %v6480_v5  ;;  %2865 = vmatprep.subr.mxu1 %v6494_v23 }
 0x78d   :  { %2793 = vmatpush1.msra.mxu0 %v6486_v8  ;;  %2866 = vmatpush1.msra.mxu1 %v6500_v7 }
 0x78e   :  { %2794 = vmatprep.subr.mxu0 %v6492_v43  ;;  %2867 = vmatprep.subr.mxu1 %v6506_v29 }
 0x78f   :  { %2795 = vmatpush1.msra.mxu0 %v6498_v25  ;;  %2868 = vmatpush1.msra.mxu1 %v6512_v12 }
 0x790   :  { %2796 = vmatprep.subr.mxu0 %v6504_v27  ;;  %2869 = vmatprep.subr.mxu1 %v6518_v50 }
 0x791   :  { %2797 = vmatpush1.msra.mxu0 %v6510_v1  ;;  %2870 = vmatpush1.msra.mxu1 %v6524_v0 }
 0x792   :  { %2798 = vmatprep.subr.mxu0 %v6516_v31  ;;  %2871 = vmatprep.subr.mxu1 %v6530_v11 }
 0x793   :  { %2799 = vmatpush1.msra.mxu0 %v6522_v62  ;;  %2872 = vmatpush1.msra.mxu1 %v6536_v35 }
 0x794   :  { %2800 = vmatprep.subr.mxu0 %v6528_v46  ;;  %2873 = vmatprep.subr.mxu1 %v6542_v20 }
 0x795   :  { %2801 = vmatpush1.msra.mxu0 %v6534_v14  ;;  %2874 = vmatpush1.msra.mxu1 %v6548_v24 }
 0x796   :  { %2802 = vmatprep.subr.mxu0 %v6540_v2  ;;  %2875 = vmatprep.subr.mxu1 %v6554_v28 }
 0x797   :  { %2803 = vmatpush1.msra.mxu0 %v6546_v41  ;;  %2876 = vmatpush1.msra.mxu1 %v6560_v32 }
 0x798   :  { %2804 = vmatprep.subr.mxu0 %v6552_v45  ;;  %2877 = vmatprep.subr.mxu1 %v6566_v34 }
 0x799   :  { %2805 = vmatpush1.msra.mxu0 %v6558_v30  ;;  %2878 = vmatpush1.msra.mxu1 %v6572_v4 }
 0x79a   :  { %2806 = vmatprep.subr.mxu0 %v6564_v53  ;;  %2879 = vmatprep.subr.mxu1 %v6578_v21 }
 0x79b   :  { %2807 = vmatpush1.msra.mxu0 %v6570_v36  ;;  %2880 = vmatpush1.msra.mxu1 %v6584_v6 }
 0x79c   :  { %2808 = vmatprep.subr.mxu0 %v6576_v58  ;;  %2881 = vmatprep.subr.mxu1 %v6590_v56 }
 0x79d   :  { %2809 = vmatpush1.msra.mxu0 %v6582_v54  ;;  %2882 = vmatpush1.msra.mxu1 %v6596_v37 }
 0x79e   :  { %2810 = vmatprep.subr.mxu0 %v6588_v59  ;;  %2883 = vmatprep.subr.mxu1 %v6602_v39  ;;  %v7778_v39 = vld [vmem:[#allocation35_spill] sm:$0xff] }
 0x79f   :  { %2811 = vmatpush1.msra.mxu0 %v6594_v16  ;;  %2884 = vmatpush1.msra.mxu1 %v6608_v26 }
 0x7a0   :  { %2812 = vmatprep.subr.mxu0 %v6600_v18  ;;  %2885 = vmatprep.subr.mxu1 %v6614_v9  ;;  %v7779_v18 = vld [vmem:[#allocation34_spill] sm:$0xff] }
 0x7a1   :  { %2813 = vmatpush1.msra.mxu0 %v6606_v22  ;;  %2886 = vmatpush1.msra.mxu1 %v6620_v15  ;;  %v6640_v15 = vld [vmem:[#allocation9] sm:$0xff] }
 0x7a2   :  { %2814 = vmatprep.subr.mxu0 %v6612_v47  ;;  %2887 = vmatprep.subr.mxu1 %v6626_v60  ;;  %7774 = vst [vmem:[#allocation44_spill] sm:$0xff] %v6640_v15  ;;  %v7777_v47 = vld [vmem:[#allocation24_spill] sm:$0xff] }
 0x7a3   :  { %2815 = vmatpush1.msra.mxu0 %v6618_v40  ;;  %2888 = vmatpush1.msra.mxu1 %v6632_v61 }
 0x7a4   :  { %2816 = vmatprep.subr.mxu0 %v6624_v48  ;;  %2889 = vmatprep.subr.mxu1 %v6638_v63  ;;  %v6644_v48 = vld [vmem:[#allocation9 + $0x10] sm:$0xff] }
 0x7a5   :  { %2817 = vmatpush1.msra.mxu0 %v6630_v52  ;;  %7775 = vst [vmem:[#allocation55_spill] sm:$0xff] %v6644_v48  ;;  %2890 = vmatpush1.msra.mxu1 %v6644_v48  ;;  %v7776_v52 = vld [vmem:[#allocation23_spill] sm:$0xff] }
 0x7a6   :  { %2818 = vmatprep.subr.mxu0 %v6636_v38  ;;  %3098 = vmatprep.subr.mxu1 %v6458_v51 }
 0x7a7   :  { %2819 = vmatpush1.msra.mxu0 %v6640_v15 }
 0x7a8   :  { %3027 = vmatprep.subr.mxu0 %v6456_v13 }
 0x80f   :  { %v2257_v61 = vpop.f32.mrf.mxu0  ;;  %v2328_v38 = vpop.f32.mrf.mxu1 }
 0x810   :  { %v2333_v60 = vadd.f32 %v2257_v61, %v7776_v52  ;;  %v2335_v48 = vadd.f32 %v2328_v38, %v7779_v18  ;;  %v7781_v18 = vld [vmem:[#allocation47_spill] sm:$0xff]  ;;  %v7785_v38 = vld [vmem:[#allocation49_spill] sm:$0xff] }
 0x811   :  { %v2259_v40 = vpop.f32.mrf.mxu0  ;;  %v2330_v22 = vpop.f32.mrf.mxu1 }
 0x812   :  { %v4816_v9 = vmul.f32 -1.442695, %v2333_v60  ;;  %v2334_v26 = vadd.f32 %v2259_v40, %v7777_v47  ;;  %v2336_v15 = vadd.f32 %v2330_v22, %v7778_v39  ;;  %v7782_v22 = vld [vmem:[#allocation37_spill] sm:$0xff] }
 0x814   :  { %5035 = vpow2.f32 %v4816_v9  ;;  %v4817_v63 = vmul.f32 -1.442695, %v2334_v26  ;;  %v4818_v37 = vmul.f32 -1.442695, %v2336_v15  ;;  %v7783_v15 = vld [vmem:[#allocation48_spill] sm:$0xff] }
 0x816   :  { %5037 = vpow2.f32 %v4817_v63 }
 0x817   :  { %5039 = vtanh.f32 %v2335_v48  ;;  %v7784_v48 = vld [vmem:[#allocation38_spill] sm:$0xff] }
 0x818   :  { %5041 = vpow2.f32 %v4818_v37 }
 0x821   :  { %v5036_v13 = vpop.eup %5035 }
 0x822   :  { %v2340_v16 = vadd.f32 1.0, %v5036_v13 }
 0x823   :  { %v5038_v51 = vpop.eup %5037 }
 0x824   :  { %5043 = vrcp.f32 %v2340_v16  ;;  %v2346_v52 = vadd.f32 1.0, %v5038_v51  ;;  %v5040_v60 = vpop.eup %5039  ;;  %v7780_v51 = vld [vmem:[#allocation26_spill] sm:$0xff] }
 0x825   :  { %v5042_v47 = vpop.eup %5041 }
 0x826   :  { %5045 = vrcp.f32 %v2346_v52  ;;  %v2353_v61 = vadd.f32 1.0, %v5042_v47  ;;  %v7786_v52 = vld [vmem:[#allocation39_spill] sm:$0xff]  ;;  %v7788_v47 = vld [vmem:[#allocation40_spill] sm:$0xff] }
 0x828   :  { %5047 = vrcp.f32 %v2353_v61  ;;  %v7792_v61 = vld [vmem:[#allocation42_spill] sm:$0xff] }
 0x831   :  { %v5044_v9 = vpop.eup %5043 }
 0x832   :  { %v2357_v40 = vmul.f32 %v5044_v9, %v5040_v60  ;;  %v7787_v60 = vld [vmem:[#allocation50_spill] sm:$0xff]  ;;  %v7789_v9 = vld [vmem:[#allocation51_spill] sm:$0xff] }
 0x833   :  { %v5046_v26 = vpop.eup %5045 }
 0x834   :  { %v2356_v63 = vmul.f32 %v5046_v26, %v6419_v3  ;;  %v4819_v3 = vld [vmem:[%s7496_s1 + $0x8] sm:$0xff]  ;;  %v7791_v26 = vld [vmem:[#allocation52_spill] sm:$0xff] }
 0x835   :  { %v5048_v13 = vpop.eup %5047 }
 0x836   :  { %v2358_v39 = vadd.f32 %v2357_v40, %v2356_v63  ;;  %v7790_v40 = vld [vmem:[#allocation41_spill] sm:$0xff] }
 0x837   :  { %v7793_v63 = vld [vmem:[#allocation53_spill] sm:$0xff] }
 0x838   :  { %5049 = vtanh.f32 %v2358_v39  ;;  %2363 = vst [vmem:[%s7508_s13] sm:$0xff] %v2358_v39  ;;  %v7794_v39 = vld [vmem:[#allocation43_spill] sm:$0xff] }
 0x845   :  { %v5050_v37 = vpop.eup %5049 }
 0x846   :  { %v2360_v16 = vmul.f32 %v5050_v37, %v5048_v13  ;;  %v7795_v13 = vld [vmem:[#allocation54_spill] sm:$0xff]  ;;  %v7796_v37 = vld [vmem:[#allocation44_spill] sm:$0xff] }
 0x848   :  { %2362 = vst [vmem:[%s7507_s12] sm:$0xff] %v2360_v16  ;;  %2565 = vmatmul.mubr.f32.gmra.mxu0 %v2360_v16  ;;  %2678 = vmatmul.mubr.f32.gmra.mxu1 %v2360_v16  ;;  %v7797_v16 = vld [vmem:[#allocation55_spill] sm:$0xff] }
 0x849   :  { %2852 = vmatprep.mubr.f32.mxu0 %v7736_v49  ;;  %2923 = vmatprep.mubr.f32.mxu1 %v7736_v49 }
 0x84c   :  { %2853 = vmatmul.mubr.f32.vlgmr.msra.gmra.mxu0 %v4819_v3  ;;  %2924 = vmatmul.mubr.f32.vlgmr.msra.gmra.mxu1 %v4819_v3  ;;  %v7798_v3 = vld [vmem:[#allocation46_spill] sm:$0xff] }
 0x84d   :  { %3028 = vmatpush1.msra.mxu0 %v6462_v44  ;;  %3099 = vmatpush1.msra.mxu1 %v6464_v17 }
 0x84e   :  { %3029 = vmatprep.subr.mxu0 %v6468_v57  ;;  %3100 = vmatprep.subr.mxu1 %v6470_v42 }
 0x84f   :  { %3030 = vmatpush1.msra.mxu0 %v6474_v55  ;;  %3101 = vmatpush1.msra.mxu1 %v6476_v33 }
 0x850   :  { %3031 = vmatprep.subr.mxu0 %v6480_v5  ;;  %3102 = vmatprep.subr.mxu1 %v6482_v19 }
 0x851   :  { %3032 = vmatpush1.msra.mxu0 %v6486_v8  ;;  %3103 = vmatpush1.msra.mxu1 %v6488_v10 }
 0x852   :  { %3033 = vmatprep.subr.mxu0 %v6492_v43  ;;  %3104 = vmatprep.subr.mxu1 %v6494_v23 }
 0x853   :  { %3034 = vmatpush1.msra.mxu0 %v6498_v25  ;;  %3105 = vmatpush1.msra.mxu1 %v6500_v7 }
 0x854   :  { %3035 = vmatprep.subr.mxu0 %v6504_v27  ;;  %3106 = vmatprep.subr.mxu1 %v6506_v29 }
 0x855   :  { %3036 = vmatpush1.msra.mxu0 %v6510_v1  ;;  %3107 = vmatpush1.msra.mxu1 %v6512_v12 }
 0x856   :  { %3037 = vmatprep.subr.mxu0 %v6516_v31  ;;  %3108 = vmatprep.subr.mxu1 %v6518_v50 }
 0x857   :  { %3038 = vmatpush1.msra.mxu0 %v6522_v62  ;;  %3109 = vmatpush1.msra.mxu1 %v6524_v0 }
 0x858   :  { %3039 = vmatprep.subr.mxu0 %v6528_v46  ;;  %3110 = vmatprep.subr.mxu1 %v6530_v11 }
 0x859   :  { %3040 = vmatpush1.msra.mxu0 %v6534_v14  ;;  %3111 = vmatpush1.msra.mxu1 %v6536_v35 }
 0x85a   :  { %3041 = vmatprep.subr.mxu0 %v6540_v2  ;;  %3112 = vmatprep.subr.mxu1 %v6542_v20 }
 0x85b   :  { %3042 = vmatpush1.msra.mxu0 %v6546_v41  ;;  %3113 = vmatpush1.msra.mxu1 %v6548_v24 }
 0x85c   :  { %3043 = vmatprep.subr.mxu0 %v6552_v45  ;;  %3114 = vmatprep.subr.mxu1 %v6554_v28 }
 0x85d   :  { %3044 = vmatpush1.msra.mxu0 %v6558_v30  ;;  %3115 = vmatpush1.msra.mxu1 %v6560_v32 }
 0x85e   :  { %3045 = vmatprep.subr.mxu0 %v6564_v53  ;;  %3116 = vmatprep.subr.mxu1 %v6566_v34 }
 0x85f   :  { %3046 = vmatpush1.msra.mxu0 %v6570_v36  ;;  %3117 = vmatpush1.msra.mxu1 %v6572_v4 }
 0x860   :  { %3047 = vmatprep.subr.mxu0 %v6576_v58  ;;  %3118 = vmatprep.subr.mxu1 %v6578_v21 }
 0x861   :  { %3048 = vmatpush1.msra.mxu0 %v6582_v54  ;;  %3119 = vmatpush1.msra.mxu1 %v6584_v6 }
 0x862   :  { %3049 = vmatprep.subr.mxu0 %v6588_v59  ;;  %3120 = vmatprep.subr.mxu1 %v6590_v56 }
 0x863   :  { %3050 = vmatpush1.msra.mxu0 %v7780_v51  ;;  %3121 = vmatpush1.msra.mxu1 %v7781_v18 }
 0x864   :  { %3051 = vmatprep.subr.mxu0 %v7782_v22  ;;  %3122 = vmatprep.subr.mxu1 %v7783_v15 }
 0x865   :  { %3052 = vmatpush1.msra.mxu0 %v7784_v48  ;;  %3123 = vmatpush1.msra.mxu1 %v7785_v38 }
 0x866   :  { %3053 = vmatprep.subr.mxu0 %v7786_v52  ;;  %3124 = vmatprep.subr.mxu1 %v7787_v60 }
 0x867   :  { %3054 = vmatpush1.msra.mxu0 %v7788_v47  ;;  %3125 = vmatpush1.msra.mxu1 %v7789_v9 }
 0x868   :  { %3055 = vmatprep.subr.mxu0 %v7790_v40  ;;  %3126 = vmatprep.subr.mxu1 %v7791_v26  ;;  %v7799_v40 = vld [vmem:[#allocation15_spill] sm:$0xff]  ;;  %v2524_v26 = vpop.f32.mrf.mxu0 }
 0x869   :  { %3056 = vmatpush1.msra.mxu0 %v7792_v61  ;;  %3127 = vmatpush1.msra.mxu1 %v7793_v63  ;;  %v2637_v61 = vpop.f32.mrf.mxu1 }
 0x86a   :  { %3057 = vmatprep.subr.mxu0 %v7794_v39  ;;  %3128 = vmatprep.subr.mxu1 %v7795_v13  ;;  %v2526_v9 = vpop.f32.mrf.mxu0 }
 0x86b   :  { %3058 = vmatpush1.msra.mxu0 %v7796_v37  ;;  %3091 = vmatprep.mubr.f32.mxu0 %v7736_v49  ;;  %v2639_v63 = vpop.f32.mrf.mxu1 }
 0x86c   :  { %3129 = vmatpush1.msra.mxu1 %v7797_v16  ;;  %3162 = vmatprep.mubr.f32.mxu1 %v7736_v49  ;;  %v6732_v47 = vpop.f32.mrf.mxu0 }
 0x86d   :  { %3266 = vmatprep.subr.mxu0 %v7798_v3  ;;  %3337 = vmatprep.subr.mxu1 %v7799_v40  ;;  %7800 = vst [vmem:[#allocation56_spill] sm:$0xff] %v6732_v47  ;;  %v6734_v39 = vpop.f32.mrf.mxu1 }
 0x86e   :  { %7801 = vst [vmem:[#allocation17_spill] sm:$0xff] %v6734_v39  ;;  %v6736_v13 = vpop.f32.mrf.mxu0 }
 0x86f   :  { %7802 = vst [vmem:[#allocation18_spill] sm:$0xff] %v6736_v13  ;;  %v6738_v37 = vpop.f32.mrf.mxu1 }
 0x870   :  { %7803 = vst [vmem:[#allocation29_spill] sm:$0xff] %v6738_v37  ;;  %v6740_v60 = vpop.f32.mrf.mxu0 }
 0x871   :  { %7804 = vst [vmem:[#allocation28_spill] sm:$0xff] %v6740_v60  ;;  %v6742_v16 = vpop.f32.mrf.mxu1 }
 0x872   :  { %7805 = vst [vmem:[#allocation19_spill] sm:$0xff] %v6742_v16  ;;  %v6744_v49 = vpop.f32.mrf.mxu0 }
 0x873   :  { %7806 = vst [vmem:[#allocation20_spill] sm:$0xff] %v6744_v49  ;;  %v6746_v3 = vpop.f32.mrf.mxu1 }
 0x874   :  { %7807 = vst [vmem:[#allocation31_spill] sm:$0xff] %v6746_v3  ;;  %v6748_v40 = vpop.f32.mrf.mxu0 }
 0x875   :  { %7808 = vst [vmem:[#allocation30_spill] sm:$0xff] %v6748_v40  ;;  %v6750_v52 = vpop.f32.mrf.mxu1 }
 0x876   :  { %7809 = vst [vmem:[#allocation21_spill] sm:$0xff] %v6750_v52  ;;  %v6752_v38 = vpop.f32.mrf.mxu0 }
 0x877   :  { %7810 = vst [vmem:[#allocation22_spill] sm:$0xff] %v6752_v38  ;;  %v6754_v47 = vpop.f32.mrf.mxu1 }
 0x878   :  { %7811 = vst [vmem:[#allocation33_spill] sm:$0xff] %v6754_v47  ;;  %v6756_v39 = vpop.f32.mrf.mxu0 }
 0x879   :  { %7812 = vst [vmem:[#allocation32_spill] sm:$0xff] %v6756_v39  ;;  %v6758_v13 = vpop.f32.mrf.mxu1 }
 0x87a   :  { %7813 = vst [vmem:[#allocation36_spill] sm:$0xff] %v6758_v13  ;;  %v6760_v37 = vpop.f32.mrf.mxu0  ;;  %v2436_v13 = vld [vmem:[%s7503_s8] sm:$0xf] }
 0x87b   :  { %7814 = vst [vmem:[#allocation45_spill] sm:$0xff] %v6760_v37  ;;  %v6762_v60 = vpop.f32.mrf.mxu1  ;;  %v7823_v37 = vld [vmem:[#allocation14_spill] sm:$0xff] }
 0x87c   :  { %7815 = vst [vmem:[#allocation25_spill] sm:$0xff] %v6762_v60  ;;  %v6764_v16 = vpop.f32.mrf.mxu0  ;;  %v7824_v60 = vsub.s32 0, %v7823_v37 }
 0x87d   :  { %7816 = vst [vmem:[#allocation23_spill] sm:$0xff] %v6764_v16  ;;  %v6766_v49 = vpop.f32.mrf.mxu1 }
 0x87e   :  { %7817 = vst [vmem:[#allocation24_spill] sm:$0xff] %v6766_v49  ;;  %v6768_v3 = vpop.f32.mrf.mxu0  ;;  %v6783_v47 = vrot.slane %v2436_v13, %v7824_v60 }
 0x87f   :  { %7818 = vst [vmem:[#allocation35_spill] sm:$0xff] %v6768_v3  ;;  %v6770_v40 = vpop.f32.mrf.mxu1 }
 0x880   :  { %7819 = vst [vmem:[#allocation34_spill] sm:$0xff] %v6770_v40  ;;  %v6772_v52 = vpop.f32.mrf.mxu0  ;;  %7825 = vst [vmem:[#allocation14_spill] sm:$0xff] %v6783_v47  ;;  %v7828_v40 = vsub.s32 1, %v7823_v37  ;;  %v2525_v48 = vadd.f32 %v2524_v26, %v6783_v47 }
 0x881   :  { %7820 = vst [vmem:[#allocation46_spill] sm:$0xff] %v6772_v52  ;;  %v6774_v38 = vpop.f32.mrf.mxu1 }
 0x882   :  { %7821 = vst [vmem:[#allocation15_spill] sm:$0xff] %v6774_v38  ;;  %v6779_v39 = vpop.f32.mrf.mxu0  ;;  %v6791_v3 = vrot.slane %v2436_v13, %v7828_v40  ;;  %v7832_v40 = vsub.s32 3, %v7823_v37 }
 0x883   :  { %7822 = vst [vmem:[#allocation57_spill] sm:$0xff] %v6779_v39  ;;  %v6785_v16 = vpop.f32.mrf.mxu1 }
 0x884   :  { %7826 = vst [vmem:[#allocation58_spill] sm:$0xff] %v6785_v16  ;;  %v2527_v39 = vadd.f32 %v2526_v9, %v6791_v3  ;;  %v6803_v59 = vrot.slane %v2436_v13, %v7832_v40 }
 0x886   :  { %v2640_v26 = vadd.f32 %v2639_v63, %v6803_v59 }
 0x908   :  { %v6787_v49 = vpop.f32.mrf.mxu0  ;;  %v6793_v52 = vpop.f32.mrf.mxu1 }
 0x909   :  { %7827 = vst [vmem:[#allocation59_spill] sm:$0xff] %v6787_v49  ;;  %7829 = vst [vmem:[#allocation60_spill] sm:$0xff] %v6793_v52 }
 0x90a   :  { %v6795_v38 = vpop.f32.mrf.mxu0  ;;  %v6799_v22 = vpop.f32.mrf.mxu1 }
 0x90b   :  { %7830 = vst [vmem:[#allocation61_spill] sm:$0xff] %v6795_v38  ;;  %7831 = vst [vmem:[#allocation62_spill] sm:$0xff] %v6799_v22  ;;  %v7833_v38 = vsub.s32 2, %v7823_v37 }
 0x90c   :  { %v2854_v15 = vpop.f32.mrf.mxu0  ;;  %v2925_v49 = vpop.f32.mrf.mxu1 }
 0x90d   :  { %v2930_v60 = vadd.f32 %v2854_v15, %v2525_v48  ;;  %v6808_v9 = vrot.slane %v2436_v13, %v7833_v38  ;;  %v4820_v38 = vld [vmem:[%s7497_s2 + $0x8] sm:$0xff] }
 0x90e   :  { %v2856_v18 = vpop.f32.mrf.mxu0  ;;  %v2927_v52 = vpop.f32.mrf.mxu1 }
 0x90f   :  { %v4821_v16 = vmul.f32 -1.442695, %v2930_v60  ;;  %v2931_v51 = vadd.f32 %v2856_v18, %v2527_v39  ;;  %v2933_v22 = vadd.f32 %v2927_v52, %v2640_v26  ;;  %v2638_v15 = vadd.f32 %v2637_v61, %v6808_v9 }
 0x911   :  { %5051 = vpow2.f32 %v4821_v16  ;;  %v4822_v56 = vmul.f32 -1.442695, %v2931_v51  ;;  %v4823_v48 = vmul.f32 -1.442695, %v2933_v22  ;;  %v2932_v39 = vadd.f32 %v2925_v49, %v2638_v15 }
 0x913   :  { %5053 = vpow2.f32 %v4822_v56 }
 0x914   :  { %5055 = vpow2.f32 %v4823_v48 }
 0x91e   :  { %v5052_v18 = vpop.eup %5051 }
 0x91f   :  { %v2937_v16 = vadd.f32 1.0, %v5052_v18 }
 0x920   :  { %v5054_v51 = vpop.eup %5053 }
 0x921   :  { %5057 = vrcp.f32 %v2937_v16  ;;  %v2943_v60 = vadd.f32 1.0, %v5054_v51  ;;  %v5056_v56 = vpop.eup %5055 }
 0x922   :  { %5059 = vtanh.f32 %v2932_v39  ;;  %v2950_v13 = vadd.f32 1.0, %v5056_v56  ;;  %v7859_v39 = vld [vmem:[#allocation17_spill] sm:$0xff] }
 0x923   :  { %5061 = vrcp.f32 %v2943_v60  ;;  %v2644_v16 = vadd.f32 %v7859_v39, %v6808_v9  ;;  %v6935_v39 = vld [vmem:[#allocation9 + $0x1b0] sm:$0xff] }
 0x924   :  { %5063 = vrcp.f32 %v2950_v13 }
 0x92e   :  { %v5058_v40 = vpop.eup %5057 }
 0x92f   :  { %v5060_v63 = vpop.eup %5059 }
 0x930   :  { %v5062_v52 = vpop.eup %5061  ;;  %v2954_v61 = vmul.f32 %v5060_v63, %v5058_v40 }
 0x931   :  { %v2953_v22 = vmul.f32 %v5062_v52, %v4820_v38  ;;  %v5064_v49 = vpop.eup %5063 }
 0x933   :  { %v6814_v37 = vadd.f32 %v2954_v61, %v2953_v22 }
 0x935   :  { %5065 = vtanh.f32 %v6814_v37 }
 0x942   :  { %v5066_v26 = vpop.eup %5065 }
 0x943   :  { %v6817_v15 = vmul.f32 %v5066_v26, %v5064_v49 }
 0x945   :  { %7834 = vst [vmem:[#allocation63_spill] sm:$0xff] %v6817_v15  ;;  %3092 = vmatmul.mubr.f32.vlgmr.msra.gmra.mxu0 %v6817_v15  ;;  %3163 = vmatmul.mubr.f32.vlgmr.msra.gmra.mxu1 %v6817_v15  ;;  %v6989_v15 = vld [vmem:[#allocation9 + $0x118] sm:$0xff] }
 0x946   :  { %3267 = vmatpush1.msra.mxu0 %v6462_v44  ;;  %3338 = vmatpush1.msra.mxu1 %v6464_v17  ;;  %v7835_v44 = vld [vmem:[#allocation16_spill] sm:$0xff]  ;;  %v7836_v17 = vld [vmem:[#allocation27_spill] sm:$0xff] }
 0x947   :  { %3268 = vmatprep.subr.mxu0 %v6468_v57  ;;  %3339 = vmatprep.subr.mxu1 %v6470_v42  ;;  %v7837_v57 = vld [vmem:[#allocation26_spill] sm:$0xff]  ;;  %v7838_v42 = vld [vmem:[#allocation47_spill] sm:$0xff] }
 0x948   :  { %3269 = vmatpush1.msra.mxu0 %v6474_v55  ;;  %3340 = vmatpush1.msra.mxu1 %v6476_v33  ;;  %v7839_v55 = vld [vmem:[#allocation37_spill] sm:$0xff]  ;;  %v7840_v33 = vld [vmem:[#allocation48_spill] sm:$0xff] }
 0x949   :  { %3270 = vmatprep.subr.mxu0 %v6480_v5  ;;  %3341 = vmatprep.subr.mxu1 %v6482_v19  ;;  %v7841_v5 = vld [vmem:[#allocation38_spill] sm:$0xff]  ;;  %v7842_v19 = vld [vmem:[#allocation49_spill] sm:$0xff] }
 0x94a   :  { %3271 = vmatpush1.msra.mxu0 %v6486_v8  ;;  %3342 = vmatpush1.msra.mxu1 %v6488_v10  ;;  %v7843_v8 = vld [vmem:[#allocation39_spill] sm:$0xff]  ;;  %v7844_v10 = vld [vmem:[#allocation50_spill] sm:$0xff] }
 0x94b   :  { %3272 = vmatprep.subr.mxu0 %v6492_v43  ;;  %3343 = vmatprep.subr.mxu1 %v6494_v23  ;;  %v7845_v43 = vld [vmem:[#allocation40_spill] sm:$0xff]  ;;  %v7846_v23 = vld [vmem:[#allocation51_spill] sm:$0xff] }
 0x94c   :  { %3273 = vmatpush1.msra.mxu0 %v6498_v25  ;;  %3344 = vmatpush1.msra.mxu1 %v6500_v7  ;;  %v7847_v25 = vld [vmem:[#allocation41_spill] sm:$0xff]  ;;  %v7848_v7 = vld [vmem:[#allocation52_spill] sm:$0xff] }
 0x94d   :  { %3274 = vmatprep.subr.mxu0 %v6504_v27  ;;  %3345 = vmatprep.subr.mxu1 %v6506_v29  ;;  %v7849_v27 = vld [vmem:[#allocation42_spill] sm:$0xff]  ;;  %v7850_v29 = vld [vmem:[#allocation53_spill] sm:$0xff] }
 0x94e   :  { %3275 = vmatpush1.msra.mxu0 %v6510_v1  ;;  %3346 = vmatpush1.msra.mxu1 %v6512_v12  ;;  %v7851_v1 = vld [vmem:[#allocation43_spill] sm:$0xff]  ;;  %v7852_v12 = vld [vmem:[#allocation54_spill] sm:$0xff] }
 0x94f   :  { %3276 = vmatprep.subr.mxu0 %v6516_v31  ;;  %3347 = vmatprep.subr.mxu1 %v6518_v50  ;;  %v7853_v31 = vld [vmem:[#allocation44_spill] sm:$0xff]  ;;  %v7854_v50 = vmov 0.0  }
 0x950   :  { %3277 = vmatpush1.msra.mxu0 %v6522_v62  ;;  %3348 = vmatpush1.msra.mxu1 %v6524_v0  ;;  %v7855_v62 = vld [vmem:[#allocation55_spill] sm:$0xff]  ;;  %v7856_v0 = vld [vmem:[#allocation56_spill] sm:$0xff] }
 0x951   :  { %3278 = vmatprep.subr.mxu0 %v6528_v46  ;;  %3349 = vmatprep.subr.mxu1 %v6530_v11  ;;  %v2531_v46 = vadd.f32 %v7856_v0, %v6783_v47 }
 0x952   :  { %3279 = vmatpush1.msra.mxu0 %v6534_v14  ;;  %3350 = vmatpush1.msra.mxu1 %v6536_v35  ;;  %v7857_v14 = vld [vmem:[#allocation18_spill] sm:$0xff] }
 0x953   :  { %3280 = vmatprep.subr.mxu0 %v6540_v2  ;;  %3351 = vmatprep.subr.mxu1 %v6542_v20  ;;  %v2533_v35 = vadd.f32 %v7857_v14, %v6791_v3 }
 0x954   :  { %3281 = vmatpush1.msra.mxu0 %v6546_v41  ;;  %3352 = vmatpush1.msra.mxu1 %v6548_v24 }
 0x955   :  { %3282 = vmatprep.subr.mxu0 %v6552_v45  ;;  %3353 = vmatprep.subr.mxu1 %v6554_v28 }
 0x956   :  { %3283 = vmatpush1.msra.mxu0 %v6558_v30  ;;  %3354 = vmatpush1.msra.mxu1 %v6560_v32  ;;  %v7858_v32 = vld [vmem:[#allocation29_spill] sm:$0xff] }
 0x957   :  { %3284 = vmatprep.subr.mxu0 %v6564_v53  ;;  %3355 = vmatprep.subr.mxu1 %v6566_v34  ;;  %v2646_v48 = vadd.f32 %v7858_v32, %v6803_v59  ;;  %v6927_v32 = vld [vmem:[#allocation9 + $0x1a8] sm:$0xff] }
 0x958   :  { %3285 = vmatpush1.msra.mxu0 %v6570_v36  ;;  %3356 = vmatpush1.msra.mxu1 %v6572_v4 }
 0x959   :  { %3286 = vmatprep.subr.mxu0 %v6576_v58  ;;  %3357 = vmatprep.subr.mxu1 %v6578_v21 }
 0x95a   :  { %3287 = vmatpush1.msra.mxu0 %v6582_v54  ;;  %3358 = vmatpush1.msra.mxu1 %v6584_v6 }
 0x95b   :  { %3288 = vmatprep.subr.mxu0 %v7835_v44  ;;  %3359 = vmatprep.subr.mxu1 %v7836_v17 }
 0x95c   :  { %3289 = vmatpush1.msra.mxu0 %v7837_v57  ;;  %3360 = vmatpush1.msra.mxu1 %v7838_v42 }
 0x95d   :  { %3290 = vmatprep.subr.mxu0 %v7839_v55  ;;  %3361 = vmatprep.subr.mxu1 %v7840_v33 }
 0x95e   :  { %3291 = vmatpush1.msra.mxu0 %v7841_v5  ;;  %3362 = vmatpush1.msra.mxu1 %v7842_v19 }
 0x95f   :  { %3292 = vmatprep.subr.mxu0 %v7843_v8  ;;  %3363 = vmatprep.subr.mxu1 %v7844_v10 }
 0x960   :  { %3293 = vmatpush1.msra.mxu0 %v7845_v43  ;;  %3364 = vmatpush1.msra.mxu1 %v7846_v23 }
 0x961   :  { %3294 = vmatprep.subr.mxu0 %v7847_v25  ;;  %3365 = vmatprep.subr.mxu1 %v7848_v7 }
 0x962   :  { %3295 = vmatpush1.msra.mxu0 %v7849_v27  ;;  %3366 = vmatpush1.msra.mxu1 %v7850_v29 }
 0x963   :  { %3296 = vmatprep.subr.mxu0 %v7851_v1  ;;  %3367 = vmatprep.subr.mxu1 %v7852_v12 }
 0x964   :  { %3297 = vmatpush1.msra.mxu0 %v7853_v31  ;;  %3330 = vmatprep.mubr.f32.mxu0 %v7854_v50 }
 0x965   :  { %3368 = vmatpush1.msra.mxu1 %v7855_v62  ;;  %3401 = vmatprep.mubr.f32.mxu1 %v7854_v50 }
 0xa05   :  { %v3093_v11 = vpop.f32.mrf.mxu0  ;;  %v3164_v45 = vpop.f32.mrf.mxu1 }
 0xa06   :  { %v3169_v2 = vadd.f32 %v3093_v11, %v2531_v46  ;;  %v3171_v51 = vadd.f32 %v3164_v45, %v2644_v16  ;;  %v6917_v45 = vld [vmem:[#allocation9 + $0x1d8] sm:$0xff]  ;;  %v6939_v16 = vld [vmem:[#allocation9 + $0x188] sm:$0xff] }
 0xa07   :  { %v3095_v20 = vpop.f32.mrf.mxu0  ;;  %v3166_v30 = vpop.f32.mrf.mxu1 }
 0xa08   :  { %v4824_v41 = vmul.f32 -1.442695, %v3169_v2  ;;  %v3170_v24 = vadd.f32 %v3095_v20, %v2533_v35  ;;  %v3172_v18 = vadd.f32 %v3166_v30, %v2646_v48  ;;  %v6903_v2 = vld [vmem:[#allocation9 + $0x1e8] sm:$0xff]  ;;  %v6909_v20 = vld [vmem:[#allocation9 + $0x1e0] sm:$0xff]  ;;  %v6923_v30 = vld [vmem:[#allocation9 + $0x1d0] sm:$0xff] }
 0xa09   :  { %7861 = vst [vmem:[#allocation27_spill] sm:$0xff] %v6903_v2  ;;  %3505 = vmatprep.subr.mxu0 %v6903_v2  ;;  %v6929_v48 = vld [vmem:[#allocation9 + $0x1b8] sm:$0xff] }
 0xa0a   :  { %5067 = vpow2.f32 %v4824_v41  ;;  %v4825_v28 = vmul.f32 -1.442695, %v3170_v24  ;;  %v4826_v60 = vmul.f32 -1.442695, %v3172_v18  ;;  %v6911_v41 = vld [vmem:[#allocation9 + $0x1f0] sm:$0xff]  ;;  %v6915_v24 = vld [vmem:[#allocation9 + $0x1c8] sm:$0xff] }
 0xa0b   :  { %v6933_v18 = vld [vmem:[#allocation9 + $0x1a0] sm:$0xff] }
 0xa0c   :  { %5069 = vpow2.f32 %v4825_v28  ;;  %v6921_v28 = vld [vmem:[#allocation9 + $0x1c0] sm:$0xff] }
 0xa0d   :  { %5071 = vtanh.f32 %v3171_v51  ;;  %v6941_v51 = vld [vmem:[#allocation9 + $0x198] sm:$0xff] }
 0xa0e   :  { %5073 = vpow2.f32 %v4826_v60  ;;  %v6945_v60 = vld [vmem:[#allocation9 + $0x180] sm:$0xff] }
 0xa17   :  { %v5068_v56 = vpop.eup %5067 }
 0xa18   :  { %v3176_v40 = vadd.f32 1.0, %v5068_v56  ;;  %v6947_v56 = vld [vmem:[#allocation9 + $0x190] sm:$0xff] }
 0xa19   :  { %v5070_v38 = vpop.eup %5069 }
 0xa1a   :  { %5075 = vrcp.f32 %v3176_v40  ;;  %v3182_v63 = vadd.f32 1.0, %v5070_v38  ;;  %v5072_v52 = vpop.eup %5071  ;;  %v6951_v40 = vld [vmem:[#allocation9 + $0x168] sm:$0xff]  ;;  %v6953_v38 = vld [vmem:[#allocation9 + $0x178] sm:$0xff] }
 0xa1b   :  { %v5074_v13 = vpop.eup %5073 }
 0xa1c   :  { %5077 = vrcp.f32 %v3182_v63  ;;  %v3189_v26 = vadd.f32 1.0, %v5074_v13  ;;  %v6957_v63 = vld [vmem:[#allocation9 + $0x160] sm:$0xff]  ;;  %v6963_v13 = vld [vmem:[#allocation9 + $0x148] sm:$0xff] }
 0xa1e   :  { %5079 = vrcp.f32 %v3189_v26  ;;  %v6975_v26 = vld [vmem:[#allocation9 + $0x128] sm:$0xff] }
 0xa1f   :  { %7865 = vst [vmem:[#allocation48_spill] sm:$0xff] %v6975_v26 }
 0xa27   :  { %v5076_v61 = vpop.eup %5075 }
 0xa28   :  { %v3193_v22 = vmul.f32 %v5076_v61, %v5072_v52  ;;  %v6959_v52 = vld [vmem:[#allocation9 + $0x170] sm:$0xff]  ;;  %v6965_v61 = vld [vmem:[#allocation9 + $0x158] sm:$0xff] }
 0xa29   :  { %v5078_v49 = vpop.eup %5077 }
 0xa2a   :  { %v3192_v0 = vmul.f32 %v5078_v49, %v6814_v37  ;;  %v6905_v37 = vld [vmem:[#allocation9 + $0x1f8] sm:$0xff]  ;;  %v6971_v49 = vld [vmem:[#allocation9 + $0x150] sm:$0xff] }
 0xa2b   :  { %v5080_v11 = vpop.eup %5079  ;;  %7862 = vst [vmem:[#allocation26_spill] sm:$0xff] %v6905_v37  ;;  %3576 = vmatprep.subr.mxu1 %v6905_v37  ;;  %7864 = vst [vmem:[#allocation37_spill] sm:$0xff] %v6971_v49 }
 0xa2c   :  { %v6894_v46 = vadd.f32 %v3193_v22, %v3192_v0  ;;  %v6969_v22 = vld [vmem:[#allocation9 + $0x140] sm:$0xff]  ;;  %v6977_v0 = vld [vmem:[#allocation9 + $0x138] sm:$0xff] }
 0xa2d   :  { %7863 = vst [vmem:[#allocation47_spill] sm:$0xff] %v6969_v22  ;;  %7866 = vst [vmem:[#allocation38_spill] sm:$0xff] %v6977_v0 }
 0xa2e   :  { %5081 = vtanh.f32 %v6894_v46 }
 0xa3b   :  { %v5082_v14 = vpop.eup %5081 }
 0xa3c   :  { %v6897_v35 = vmul.f32 %v5082_v14, %v5080_v11  ;;  %v6981_v11 = vld [vmem:[#allocation9 + $0x120] sm:$0xff]  ;;  %v6983_v14 = vld [vmem:[#allocation9 + $0x130] sm:$0xff] }
 0xa3d   :  { %7867 = vst [vmem:[#allocation49_spill] sm:$0xff] %v6983_v14 }
 0xa3e   :  { %7860 = vst [vmem:[#allocation16_spill] sm:$0xff] %v6897_v35  ;;  %3331 = vmatmul.mubr.f32.vlgmr.msra.gmra.mxu0 %v6897_v35  ;;  %3402 = vmatmul.mubr.f32.vlgmr.msra.gmra.mxu1 %v6897_v35  ;;  %v6985_v35 = vld [vmem:[#allocation9 + $0x108] sm:$0xff] }
 0xa3f   :  { %3569 = vmatprep.mubr.f32.mxu0 %v7854_v50  ;;  %3640 = vmatprep.mubr.f32.mxu1 %v7854_v50  ;;  %v6991_v50 = vld [vmem:[#allocation9 + $0x100] sm:$0xff] }
 0xa40   :  { %3506 = vmatpush1.msra.mxu0 %v6909_v20  ;;  %3577 = vmatpush1.msra.mxu1 %v6911_v41 }
 0xa41   :  { %3507 = vmatprep.subr.mxu0 %v6915_v24  ;;  %3578 = vmatprep.subr.mxu1 %v6917_v45 }
 0xa42   :  { %3508 = vmatpush1.msra.mxu0 %v6921_v28  ;;  %3579 = vmatpush1.msra.mxu1 %v6923_v30 }
 0xa43   :  { %3509 = vmatprep.subr.mxu0 %v6927_v32  ;;  %3580 = vmatprep.subr.mxu1 %v6929_v48 }
 0xa44   :  { %3510 = vmatpush1.msra.mxu0 %v6933_v18  ;;  %3581 = vmatpush1.msra.mxu1 %v6935_v39 }
 0xa45   :  { %3511 = vmatprep.subr.mxu0 %v6939_v16  ;;  %3582 = vmatprep.subr.mxu1 %v6941_v51 }
 0xa46   :  { %3512 = vmatpush1.msra.mxu0 %v6945_v60  ;;  %3583 = vmatpush1.msra.mxu1 %v6947_v56 }
 0xa47   :  { %3513 = vmatprep.subr.mxu0 %v6951_v40  ;;  %3584 = vmatprep.subr.mxu1 %v6953_v38 }
 0xa48   :  { %3514 = vmatpush1.msra.mxu0 %v6957_v63  ;;  %3585 = vmatpush1.msra.mxu1 %v6959_v52 }
 0xa49   :  { %3515 = vmatprep.subr.mxu0 %v6963_v13  ;;  %3586 = vmatprep.subr.mxu1 %v6965_v61 }
 0xa4a   :  { %3516 = vmatpush1.msra.mxu0 %v6969_v22  ;;  %3587 = vmatpush1.msra.mxu1 %v6971_v49  ;;  %v6993_v49 = vld [vmem:[#allocation9 + $0x110] sm:$0xff]  ;;  %v7001_v22 = vld [vmem:[#allocation9 + $0xe0] sm:$0xff] }
 0xa4b   :  { %3517 = vmatprep.subr.mxu0 %v6975_v26  ;;  %3588 = vmatprep.subr.mxu1 %v6977_v0  ;;  %v6997_v0 = vld [vmem:[#allocation9 + $0xe8] sm:$0xff]  ;;  %v6999_v26 = vld [vmem:[#allocation9 + $0xf8] sm:$0xff] }
 0xa4c   :  { %3518 = vmatpush1.msra.mxu0 %v6981_v11  ;;  %3589 = vmatpush1.msra.mxu1 %v6983_v14  ;;  %v7005_v14 = vld [vmem:[#allocation9 + $0xf0] sm:$0xff] }
 0xa4d   :  { %3519 = vmatprep.subr.mxu0 %v6985_v35  ;;  %3590 = vmatprep.subr.mxu1 %v6989_v15 }
 0xa4e   :  { %3520 = vmatpush1.msra.mxu0 %v6991_v50  ;;  %3591 = vmatpush1.msra.mxu1 %v6993_v49 }
 0xa4f   :  { %3521 = vmatprep.subr.mxu0 %v6997_v0  ;;  %3592 = vmatprep.subr.mxu1 %v6999_v26 }
 0xa50   :  { %3522 = vmatpush1.msra.mxu0 %v7001_v22  ;;  %3593 = vmatpush1.msra.mxu1 %v7005_v14 }
 0xa51   :  { %3523 = vmatprep.subr.mxu0 %v6564_v53  ;;  %3594 = vmatprep.subr.mxu1 %v6566_v34  ;;  %v7868_v53 = vld [vmem:[#allocation28_spill] sm:$0xff] }
 0xa52   :  { %3524 = vmatpush1.msra.mxu0 %v6570_v36  ;;  %3595 = vmatpush1.msra.mxu1 %v6572_v4  ;;  %v2537_v34 = vadd.f32 %v7868_v53, %v6783_v47  ;;  %v7869_v4 = vld [vmem:[#allocation20_spill] sm:$0xff] }
 0xa53   :  { %3525 = vmatprep.subr.mxu0 %v6576_v58  ;;  %3596 = vmatprep.subr.mxu1 %v6578_v21  ;;  %v2539_v58 = vadd.f32 %v7869_v4, %v6791_v3 }
 0xa54   :  { %3526 = vmatpush1.msra.mxu0 %v6582_v54  ;;  %3597 = vmatpush1.msra.mxu1 %v6584_v6 }
 0xa55   :  { %3527 = vmatprep.subr.mxu0 %v7835_v44  ;;  %3598 = vmatprep.subr.mxu1 %v7836_v17 }
 0xa56   :  { %3528 = vmatpush1.msra.mxu0 %v7837_v57  ;;  %3599 = vmatpush1.msra.mxu1 %v7838_v42 }
 0xa57   :  { %3529 = vmatprep.subr.mxu0 %v7839_v55  ;;  %3600 = vmatprep.subr.mxu1 %v7840_v33  ;;  %v7870_v55 = vld [vmem:[#allocation31_spill] sm:$0xff] }
 0xa58   :  { %3530 = vmatpush1.msra.mxu0 %v7841_v5  ;;  %3601 = vmatpush1.msra.mxu1 %v7842_v19  ;;  %v2652_v33 = vadd.f32 %v7870_v55, %v6803_v59  ;;  %v7871_v19 = vld [vmem:[#allocation19_spill] sm:$0xff]  ;;  %v7095_v55 = vld [vmem:[#allocation9 + $0xd8] sm:$0xff] }
 0xa59   :  { %3531 = vmatprep.subr.mxu0 %v7843_v8  ;;  %3602 = vmatprep.subr.mxu1 %v7844_v10  ;;  %v2650_v8 = vadd.f32 %v7871_v19, %v6808_v9  ;;  %v7103_v19 = vld [vmem:[#allocation9 + $0xa8] sm:$0xff] }
 0xa5a   :  { %3532 = vmatpush1.msra.mxu0 %v7845_v43  ;;  %3603 = vmatpush1.msra.mxu1 %v7846_v23 }
 0xa5b   :  { %3533 = vmatprep.subr.mxu0 %v7847_v25  ;;  %3604 = vmatprep.subr.mxu1 %v7848_v7 }
 0xa5c   :  { %3534 = vmatpush1.msra.mxu0 %v7849_v27  ;;  %3605 = vmatpush1.msra.mxu1 %v7850_v29 }
 0xa5d   :  { %3535 = vmatprep.subr.mxu0 %v7851_v1  ;;  %3606 = vmatprep.subr.mxu1 %v7852_v12 }
 0xa5e   :  { %3536 = vmatpush1.msra.mxu0 %v7853_v31  ;;  %3607 = vmatpush1.msra.mxu1 %v7855_v62 }
 0xa5f   :  { %3744 = vmatprep.subr.mxu0 %v6903_v2  ;;  %3815 = vmatprep.subr.mxu1 %v6905_v37 }
 0xafe   :  { %v3332_v36 = vpop.f32.mrf.mxu0  ;;  %v3403_v17 = vpop.f32.mrf.mxu1 }
 0xaff   :  { %v3408_v21 = vadd.f32 %v3332_v36, %v2537_v34  ;;  %v3410_v10 = vadd.f32 %v3403_v17, %v2650_v8  ;;  %v7877_v17 = vld [vmem:[#allocation49_spill] sm:$0xff] }
 0xb00   :  { %v3334_v54 = vpop.f32.mrf.mxu0  ;;  %v3405_v42 = vpop.f32.mrf.mxu1  ;;  %v7105_v8 = vld [vmem:[#allocation9 + $0xb8] sm:$0xff] }
 0xb01   :  { %v4827_v6 = vmul.f32 -1.442695, %v3408_v21  ;;  %v3409_v44 = vadd.f32 %v3334_v54, %v2539_v58  ;;  %v3411_v5 = vadd.f32 %v3405_v42, %v2652_v33  ;;  %v7874_v54 = vld [vmem:[#allocation37_spill] sm:$0xff]  ;;  %v7093_v42 = vld [vmem:[#allocation9 + $0xc8] sm:$0xff]  ;;  %v7097_v33 = vld [vmem:[#allocation9 + $0xc0] sm:$0xff] }
 0xb03   :  { %5083 = vpow2.f32 %v4827_v6  ;;  %v4828_v57 = vmul.f32 -1.442695, %v3409_v44  ;;  %v4829_v43 = vmul.f32 -1.442695, %v3411_v5  ;;  %v7875_v6 = vld [vmem:[#allocation48_spill] sm:$0xff]  ;;  %v7876_v44 = vld [vmem:[#allocation38_spill] sm:$0xff] }
 0xb04   :  { %v7101_v5 = vld [vmem:[#allocation9 + $0xd0] sm:$0xff] }
 0xb05   :  { %5085 = vpow2.f32 %v4828_v57  ;;  %v7878_v57 = vmov 0.0  }
 0xb06   :  { %5087 = vtanh.f32 %v3410_v10  ;;  %v7109_v10 = vld [vmem:[#allocation9 + $0xa0] sm:$0xff] }
 0xb07   :  { %5089 = vpow2.f32 %v4829_v43  ;;  %v7111_v43 = vld [vmem:[#allocation9 + $0xb0] sm:$0xff] }
 0xb08   :  { %7879 = vst [vmem:[#allocation50_spill] sm:$0xff] %v7111_v43 }
 0xb10   :  { %v5084_v23 = vpop.eup %5083 }
 0xb11   :  { %v3415_v25 = vadd.f32 1.0, %v5084_v23  ;;  %v7113_v23 = vld [vmem:[#allocation9 + $0x88] sm:$0xff] }
 0xb12   :  { %v5086_v7 = vpop.eup %5085  ;;  %7880 = vst [vmem:[#allocation40_spill] sm:$0xff] %v7113_v23 }
 0xb13   :  { %5091 = vrcp.f32 %v3415_v25  ;;  %v3421_v27 = vadd.f32 1.0, %v5086_v7  ;;  %v5088_v29 = vpop.eup %5087  ;;  %v7117_v25 = vld [vmem:[#allocation9 + $0x98] sm:$0xff]  ;;  %v7119_v7 = vld [vmem:[#allocation9 + $0x80] sm:$0xff] }
 0xb14   :  { %v5090_v1 = vpop.eup %5089  ;;  %7881 = vst [vmem:[#allocation51_spill] sm:$0xff] %v7117_v25  ;;  %7882 = vst [vmem:[#allocation41_spill] sm:$0xff] %v7119_v7 }
 0xb15   :  { %5093 = vrcp.f32 %v3421_v27  ;;  %v3428_v53 = vadd.f32 1.0, %v5090_v1  ;;  %v7121_v27 = vld [vmem:[#allocation9 + $0x90] sm:$0xff]  ;;  %v7127_v1 = vld [vmem:[#allocation9 + $0x78] sm:$0xff] }
 0xb16   :  { %7883 = vst [vmem:[#allocation52_spill] sm:$0xff] %v7121_v27  ;;  %7885 = vst [vmem:[#allocation53_spill] sm:$0xff] %v7127_v1 }
 0xb17   :  { %5095 = vrcp.f32 %v3428_v53  ;;  %v7139_v53 = vld [vmem:[#allocation9 + $0x58] sm:$0xff] }
 0xb18   :  { %7889 = vst [vmem:[#allocation55_spill] sm:$0xff] %v7139_v53 }
 0xb20   :  { %v5092_v12 = vpop.eup %5091 }
 0xb21   :  { %v3432_v31 = vmul.f32 %v5092_v12, %v5088_v29  ;;  %v7125_v29 = vld [vmem:[#allocation9 + $0x68] sm:$0xff]  ;;  %v7131_v12 = vld [vmem:[#allocation9 + $0x60] sm:$0xff] }
 0xb22   :  { %v5094_v62 = vpop.eup %5093  ;;  %7884 = vst [vmem:[#allocation42_spill] sm:$0xff] %v7125_v29  ;;  %7886 = vst [vmem:[#allocation43_spill] sm:$0xff] %v7131_v12 }
 0xb23   :  { %v3431_v34 = vmul.f32 %v5094_v62, %v6894_v46  ;;  %v7873_v46 = vld [vmem:[#allocation47_spill] sm:$0xff] }
 0xb24   :  { %v5096_v4 = vpop.eup %5095  ;;  %v7137_v62 = vld [vmem:[#allocation9 + $0x48] sm:$0xff] }
 0xb25   :  { %v7050_v36 = vadd.f32 %v3432_v31, %v3431_v34  ;;  %v7133_v31 = vld [vmem:[#allocation9 + $0x70] sm:$0xff]  ;;  %7888 = vst [vmem:[#allocation44_spill] sm:$0xff] %v7137_v62  ;;  %v7143_v34 = vld [vmem:[#allocation9 + $0x40] sm:$0xff] }
 0xb26   :  { %7887 = vst [vmem:[#allocation54_spill] sm:$0xff] %v7133_v31  ;;  %7890 = vst [vmem:[#allocation56_spill] sm:$0xff] %v7143_v34 }
 0xb27   :  { %5097 = vtanh.f32 %v7050_v36 }
 0xb34   :  { %v5098_v58 = vpop.eup %5097 }
 0xb35   :  { %v7053_v21 = vmul.f32 %v5098_v58, %v5096_v4  ;;  %v7145_v4 = vld [vmem:[#allocation9 + $0x50] sm:$0xff]  ;;  %v7149_v58 = vld [vmem:[#allocation9 + $0x28] sm:$0xff] }
 0xb36   :  { %7891 = vst [vmem:[#allocation18_spill] sm:$0xff] %v7145_v4  ;;  %7892 = vst [vmem:[#allocation29_spill] sm:$0xff] %v7149_v58 }
 0xb37   :  { %7872 = vst [vmem:[#allocation39_spill] sm:$0xff] %v7053_v21  ;;  %3570 = vmatmul.mubr.f32.vlgmr.msra.gmra.mxu0 %v7053_v21  ;;  %3641 = vmatmul.mubr.f32.vlgmr.msra.gmra.mxu1 %v7053_v21  ;;  %v7151_v21 = vld [vmem:[#allocation9 + $0x38] sm:$0xff] }
 0xb38   :  { %3745 = vmatpush1.msra.mxu0 %v6909_v20  ;;  %3816 = vmatpush1.msra.mxu1 %v6911_v41  ;;  %7893 = vst [vmem:[#allocation17_spill] sm:$0xff] %v7151_v21 }
 0xb39   :  { %3746 = vmatprep.subr.mxu0 %v6915_v24  ;;  %3817 = vmatprep.subr.mxu1 %v6917_v45 }
 0xb3a   :  { %3747 = vmatpush1.msra.mxu0 %v6921_v28  ;;  %3818 = vmatpush1.msra.mxu1 %v6923_v30 }
 0xb3b   :  { %3748 = vmatprep.subr.mxu0 %v6927_v32  ;;  %3819 = vmatprep.subr.mxu1 %v6929_v48 }
 0xb3c   :  { %3749 = vmatpush1.msra.mxu0 %v6933_v18  ;;  %3820 = vmatpush1.msra.mxu1 %v6935_v39 }
 0xb3d   :  { %3750 = vmatprep.subr.mxu0 %v6939_v16  ;;  %3821 = vmatprep.subr.mxu1 %v6941_v51 }
 0xb3e   :  { %3751 = vmatpush1.msra.mxu0 %v6945_v60  ;;  %3822 = vmatpush1.msra.mxu1 %v6947_v56 }
 0xb3f   :  { %3752 = vmatprep.subr.mxu0 %v6951_v40  ;;  %3823 = vmatprep.subr.mxu1 %v6953_v38 }
 0xb40   :  { %3753 = vmatpush1.msra.mxu0 %v6957_v63  ;;  %3824 = vmatpush1.msra.mxu1 %v6959_v52 }
 0xb41   :  { %3754 = vmatprep.subr.mxu0 %v6963_v13  ;;  %3825 = vmatprep.subr.mxu1 %v6965_v61 }
 0xb42   :  { %3755 = vmatpush1.msra.mxu0 %v7873_v46  ;;  %3826 = vmatpush1.msra.mxu1 %v7874_v54 }
 0xb43   :  { %3756 = vmatprep.subr.mxu0 %v7875_v6  ;;  %3827 = vmatprep.subr.mxu1 %v7876_v44 }
 0xb44   :  { %3757 = vmatpush1.msra.mxu0 %v6981_v11  ;;  %3828 = vmatpush1.msra.mxu1 %v7877_v17 }
 0xb45   :  { %3758 = vmatprep.subr.mxu0 %v6985_v35  ;;  %3829 = vmatprep.subr.mxu1 %v6989_v15 }
 0xb46   :  { %3759 = vmatpush1.msra.mxu0 %v6991_v50  ;;  %3830 = vmatpush1.msra.mxu1 %v6993_v49 }
 0xb47   :  { %3760 = vmatprep.subr.mxu0 %v6997_v0  ;;  %3831 = vmatprep.subr.mxu1 %v6999_v26 }
 0xb48   :  { %3761 = vmatpush1.msra.mxu0 %v7001_v22  ;;  %3832 = vmatpush1.msra.mxu1 %v7005_v14 }
 0xb49   :  { %3808 = vmatprep.mubr.f32.mxu0 %v7878_v57  ;;  %3879 = vmatprep.mubr.f32.mxu1 %v7878_v57  ;;  %v7155_v57 = vld [vmem:[#allocation9 + $0x20] sm:$0xff] }
 0xb4a   :  { %3762 = vmatprep.subr.mxu0 %v7093_v42  ;;  %3833 = vmatprep.subr.mxu1 %v7095_v55  ;;  %7894 = vst [vmem:[#allocation28_spill] sm:$0xff] %v7155_v57 }
 0xb4b   :  { %3763 = vmatpush1.msra.mxu0 %v7097_v33  ;;  %3834 = vmatpush1.msra.mxu1 %v7101_v5 }
 0xb4c   :  { %3764 = vmatprep.subr.mxu0 %v7103_v19  ;;  %3835 = vmatprep.subr.mxu1 %v7105_v8 }
 0xb4d   :  { %3765 = vmatpush1.msra.mxu0 %v7109_v10  ;;  %3836 = vmatpush1.msra.mxu1 %v7111_v43 }
 0xb4e   :  { %3766 = vmatprep.subr.mxu0 %v7113_v23  ;;  %3837 = vmatprep.subr.mxu1 %v7117_v25  ;;  %v7903_v25 = vld [vmem:[#allocation21_spill] sm:$0xff] }
 0xb4f   :  { %3767 = vmatpush1.msra.mxu0 %v7119_v7  ;;  %3838 = vmatpush1.msra.mxu1 %v7121_v27 }
 0xb50   :  { %3768 = vmatprep.subr.mxu0 %v7125_v29  ;;  %3839 = vmatprep.subr.mxu1 %v7127_v1  ;;  %v7157_v29 = vld [vmem:[#allocation9 + $0x30] sm:$0xff]  ;;  %v7161_v1 = vld [vmem:[#allocation9 + $0x8] sm:$0xff] }
 0xb51   :  { %3769 = vmatpush1.msra.mxu0 %v7131_v12  ;;  %3840 = vmatpush1.msra.mxu1 %v7133_v31  ;;  %7895 = vst [vmem:[#allocation20_spill] sm:$0xff] %v7157_v29  ;;  %7896 = vst [vmem:[#allocation31_spill] sm:$0xff] %v7161_v1  ;;  %v7163_v12 = vld [vmem:[#allocation9 + $0x18] sm:$0xff]  ;;  %v7167_v31 = vld [vmem:[#allocation9] sm:$0xff] }
 0xb52   :  { %3770 = vmatprep.subr.mxu0 %v7137_v62  ;;  %3841 = vmatprep.subr.mxu1 %v7139_v53  ;;  %7897 = vst [vmem:[#allocation19_spill] sm:$0xff] %v7163_v12  ;;  %7898 = vst [vmem:[#allocation47_spill] sm:$0xff] %v7167_v31  ;;  %v7169_v62 = vld [vmem:[#allocation9 + $0x10] sm:$0xff] }
 0xb53   :  { %3771 = vmatpush1.msra.mxu0 %v7143_v34  ;;  %3842 = vmatpush1.msra.mxu1 %v7145_v4  ;;  %7899 = vst [vmem:[#allocation37_spill] sm:$0xff] %v7169_v62 }
 0xb54   :  { %3772 = vmatprep.subr.mxu0 %v7149_v58  ;;  %3843 = vmatprep.subr.mxu1 %v7151_v21  ;;  %v7900_v21 = vld [vmem:[#allocation30_spill] sm:$0xff] }
 0xb55   :  { %3773 = vmatpush1.msra.mxu0 %v7155_v57  ;;  %3844 = vmatpush1.msra.mxu1 %v7157_v29  ;;  %v2543_v58 = vadd.f32 %v7900_v21, %v6783_v47  ;;  %v7901_v57 = vld [vmem:[#allocation22_spill] sm:$0xff]  ;;  %v2656_v21 = vadd.f32 %v7903_v25, %v6808_v9  ;;  %v7907_v25 = vld [vmem:[#allocation51_spill] sm:$0xff] }
 0xb56   :  { %3774 = vmatprep.subr.mxu0 %v7161_v1  ;;  %3845 = vmatprep.subr.mxu1 %v7163_v12  ;;  %v2545_v34 = vadd.f32 %v7901_v57, %v6791_v3 }
 0xb57   :  { %3775 = vmatpush1.msra.mxu0 %v7167_v31  ;;  %3846 = vmatpush1.msra.mxu1 %v7169_v62 }
 0xb58   :  { %3983 = vmatprep.subr.mxu0 %v6903_v2  ;;  %4054 = vmatprep.subr.mxu1 %v6905_v37  ;;  %v7902_v2 = vld [vmem:[#allocation33_spill] sm:$0xff] }
 0xb59   :  { %v2658_v7 = vadd.f32 %v7902_v2, %v6803_v59 }
 0xbf7   :  { %v3571_v4 = vpop.f32.mrf.mxu0  ;;  %v3642_v12 = vpop.f32.mrf.mxu1 }
 0xbf8   :  { %v3647_v29 = vadd.f32 %v3571_v4, %v2543_v58  ;;  %v3649_v47 = vadd.f32 %v3642_v12, %v2656_v21  ;;  %v7908_v12 = vld [vmem:[#allocation41_spill] sm:$0xff]  ;;  %v7909_v58 = vld [vmem:[#allocation52_spill] sm:$0xff]  ;;  %v7910_v21 = vld [vmem:[#allocation42_spill] sm:$0xff] }
 0xbf9   :  { %v3573_v53 = vpop.f32.mrf.mxu0  ;;  %v3644_v62 = vpop.f32.mrf.mxu1 }
 0xbfa   :  { %v4830_v1 = vmul.f32 -1.442695, %v3647_v29  ;;  %v3648_v27 = vadd.f32 %v3573_v53, %v2545_v34  ;;  %v3650_v37 = vadd.f32 %v3644_v62, %v2658_v7 }
 0xbfc   :  { %5099 = vpow2.f32 %v4830_v1  ;;  %v4831_v31 = vmul.f32 -1.442695, %v3648_v27  ;;  %v4832_v23 = vmul.f32 -1.442695, %v3650_v37 }
 0xbfe   :  { %5101 = vpow2.f32 %v4831_v31 }
 0xbff   :  { %5103 = vtanh.f32 %v3649_v47 }
 0xc00   :  { %5105 = vpow2.f32 %v4832_v23  ;;  %v7906_v23 = vld [vmem:[#allocation40_spill] sm:$0xff] }
 0xc09   :  { %v5100_v43 = vpop.eup %5099 }
 0xc0a   :  { %v3654_v57 = vadd.f32 1.0, %v5100_v43 }
 0xc0b   :  { %v5102_v4 = vpop.eup %5101 }
 0xc0c   :  { %5107 = vrcp.f32 %v3654_v57  ;;  %v3660_v29 = vadd.f32 1.0, %v5102_v4  ;;  %v5104_v27 = vpop.eup %5103  ;;  %v7911_v57 = vld [vmem:[#allocation53_spill] sm:$0xff]  ;;  %v7912_v4 = vld [vmem:[#allocation43_spill] sm:$0xff] }
 0xc0d   :  { %v5106_v1 = vpop.eup %5105 }
 0xc0e   :  { %5109 = vrcp.f32 %v3660_v29  ;;  %v3667_v2 = vadd.f32 1.0, %v5106_v1  ;;  %v7913_v29 = vld [vmem:[#allocation54_spill] sm:$0xff]  ;;  %v7915_v1 = vld [vmem:[#allocation55_spill] sm:$0xff] }
 0xc10   :  { %5111 = vrcp.f32 %v3667_v2  ;;  %v7919_v2 = vld [vmem:[#allocation17_spill] sm:$0xff] }
 0xc19   :  { %v5108_v31 = vpop.eup %5107 }
 0xc1a   :  { %v3671_v53 = vmul.f32 %v5108_v31, %v5104_v27  ;;  %v7914_v27 = vld [vmem:[#allocation44_spill] sm:$0xff] }
 0xc1b   :  { %v5110_v34 = vpop.eup %5109  ;;  %v7916_v31 = vld [vmem:[#allocation56_spill] sm:$0xff] }
 0xc1c   :  { %v3670_v7 = vmul.f32 %v5110_v34, %v7050_v36  ;;  %v7905_v36 = vld [vmem:[#allocation50_spill] sm:$0xff]  ;;  %v7918_v34 = vld [vmem:[#allocation29_spill] sm:$0xff] }
 0xc1d   :  { %v5112_v37 = vpop.eup %5111 }
 0xc1e   :  { %v7188_v62 = vadd.f32 %v3671_v53, %v3670_v7  ;;  %v7917_v53 = vld [vmem:[#allocation18_spill] sm:$0xff]  ;;  %v7920_v7 = vld [vmem:[#allocation28_spill] sm:$0xff] }
 0xc20   :  { %5113 = vtanh.f32 %v7188_v62 }
 0xc2d   :  { %v5114_v47 = vpop.eup %5113 }
 0xc2e   :  { %v7191_v43 = vmul.f32 %v5114_v47, %v5112_v37  ;;  %v7921_v37 = vld [vmem:[#allocation20_spill] sm:$0xff]  ;;  %v7922_v47 = vld [vmem:[#allocation31_spill] sm:$0xff] }
 0xc30   :  { %7904 = vst [vmem:[#allocation48_spill] sm:$0xff] %v7191_v43  ;;  %3809 = vmatmul.mubr.f32.vlgmr.msra.gmra.mxu0 %v7191_v43  ;;  %3880 = vmatmul.mubr.f32.vlgmr.msra.gmra.mxu1 %v7191_v43  ;;  %v7923_v43 = vld [vmem:[#allocation19_spill] sm:$0xff] }
 0xc31   :  { %3984 = vmatpush1.msra.mxu0 %v6909_v20  ;;  %4055 = vmatpush1.msra.mxu1 %v6911_v41 }
 0xc32   :  { %3985 = vmatprep.subr.mxu0 %v6915_v24  ;;  %4056 = vmatprep.subr.mxu1 %v6917_v45 }
 0xc33   :  { %3986 = vmatpush1.msra.mxu0 %v6921_v28  ;;  %4057 = vmatpush1.msra.mxu1 %v6923_v30 }
 0xc34   :  { %3987 = vmatprep.subr.mxu0 %v6927_v32  ;;  %4058 = vmatprep.subr.mxu1 %v6929_v48 }
 0xc35   :  { %3988 = vmatpush1.msra.mxu0 %v6933_v18  ;;  %4059 = vmatpush1.msra.mxu1 %v6935_v39 }
 0xc36   :  { %3989 = vmatprep.subr.mxu0 %v6939_v16  ;;  %4060 = vmatprep.subr.mxu1 %v6941_v51 }
 0xc37   :  { %3990 = vmatpush1.msra.mxu0 %v6945_v60  ;;  %4061 = vmatpush1.msra.mxu1 %v6947_v56 }
 0xc38   :  { %3991 = vmatprep.subr.mxu0 %v6951_v40  ;;  %4062 = vmatprep.subr.mxu1 %v6953_v38 }
 0xc39   :  { %3992 = vmatpush1.msra.mxu0 %v6957_v63  ;;  %4063 = vmatpush1.msra.mxu1 %v6959_v52 }
 0xc3a   :  { %3993 = vmatprep.subr.mxu0 %v6963_v13  ;;  %4064 = vmatprep.subr.mxu1 %v6965_v61 }
 0xc3b   :  { %3994 = vmatpush1.msra.mxu0 %v7873_v46  ;;  %4065 = vmatpush1.msra.mxu1 %v7874_v54 }
 0xc3c   :  { %3995 = vmatprep.subr.mxu0 %v7875_v6  ;;  %4066 = vmatprep.subr.mxu1 %v7876_v44 }
 0xc3d   :  { %3996 = vmatpush1.msra.mxu0 %v6981_v11  ;;  %4067 = vmatpush1.msra.mxu1 %v7877_v17 }
 0xc3e   :  { %3997 = vmatprep.subr.mxu0 %v6985_v35  ;;  %4068 = vmatprep.subr.mxu1 %v6989_v15 }
 0xc3f   :  { %3998 = vmatpush1.msra.mxu0 %v6991_v50  ;;  %4069 = vmatpush1.msra.mxu1 %v6993_v49 }
 0xc40   :  { %3999 = vmatprep.subr.mxu0 %v6997_v0  ;;  %4070 = vmatprep.subr.mxu1 %v6999_v26 }
 0xc41   :  { %4000 = vmatpush1.msra.mxu0 %v7001_v22  ;;  %4071 = vmatpush1.msra.mxu1 %v7005_v14 }
 0xc42   :  { %4001 = vmatprep.subr.mxu0 %v7093_v42  ;;  %4072 = vmatprep.subr.mxu1 %v7095_v55 }
 0xc43   :  { %4002 = vmatpush1.msra.mxu0 %v7097_v33  ;;  %4073 = vmatpush1.msra.mxu1 %v7101_v5 }
 0xc44   :  { %4003 = vmatprep.subr.mxu0 %v7103_v19  ;;  %4074 = vmatprep.subr.mxu1 %v7105_v8 }
 0xc45   :  { %4004 = vmatpush1.msra.mxu0 %v7109_v10  ;;  %4075 = vmatpush1.msra.mxu1 %v7905_v36 }
 0xc46   :  { %4005 = vmatprep.subr.mxu0 %v7906_v23  ;;  %4076 = vmatprep.subr.mxu1 %v7907_v25  ;;  %v7933_v25 = vld [vmem:[#allocation36_spill] sm:$0xff] }
 0xc47   :  { %4006 = vmatpush1.msra.mxu0 %v7908_v12  ;;  %4077 = vmatpush1.msra.mxu1 %v7909_v58 }
 0xc48   :  { %4007 = vmatprep.subr.mxu0 %v7910_v21  ;;  %4078 = vmatprep.subr.mxu1 %v7911_v57 }
 0xc49   :  { %4008 = vmatpush1.msra.mxu0 %v7912_v4  ;;  %4079 = vmatpush1.msra.mxu1 %v7913_v29  ;;  %v7924_v29 = vld [vmem:[#allocation47_spill] sm:$0xff] }
 0xc4a   :  { %4009 = vmatprep.subr.mxu0 %v7914_v27  ;;  %4080 = vmatprep.subr.mxu1 %v7915_v1  ;;  %v7925_v27 = vmov 0.0   ;;  %v7926_v1 = vld [vmem:[#allocation37_spill] sm:$0xff] }
 0xc4b   :  { %4010 = vmatpush1.msra.mxu0 %v7916_v31  ;;  %4081 = vmatpush1.msra.mxu1 %v7917_v53  ;;  %v7927_v53 = vld [vmem:[#allocation27_spill] sm:$0xff] }
 0xc4c   :  { %4011 = vmatprep.subr.mxu0 %v7918_v34  ;;  %4082 = vmatprep.subr.mxu1 %v7919_v2  ;;  %v7928_v34 = vld [vmem:[#allocation26_spill] sm:$0xff] }
 0xc4d   :  { %4012 = vmatpush1.msra.mxu0 %v7920_v7  ;;  %4083 = vmatpush1.msra.mxu1 %v7921_v37  ;;  %v7929_v2 = vld [vmem:[#allocation14_spill] sm:$0xff]  ;;  %v7930_v7 = vld [vmem:[#allocation32_spill] sm:$0xff] }
 0xc4e   :  { %4013 = vmatprep.subr.mxu0 %v7922_v47  ;;  %4084 = vmatprep.subr.mxu1 %v7923_v43  ;;  %v2549_v31 = vadd.f32 %v7930_v7, %v7929_v2  ;;  %v7931_v47 = vld [vmem:[#allocation45_spill] sm:$0xff]  ;;  %v2662_v7 = vadd.f32 %v7933_v25, %v6808_v9 }
 0xc4f   :  { %4014 = vmatpush1.msra.mxu0 %v7924_v29  ;;  %4047 = vmatprep.mubr.f32.mxu0 %v7925_v27  ;;  %v2551_v4 = vadd.f32 %v7931_v47, %v6791_v3 }
 0xc50   :  { %4085 = vmatpush1.msra.mxu1 %v7926_v1  ;;  %4118 = vmatprep.mubr.f32.mxu1 %v7925_v27 }
 0xc51   :  { %4222 = vmatprep.subr.mxu0 %v7927_v53  ;;  %4293 = vmatprep.subr.mxu1 %v7928_v34  ;;  %v7932_v53 = vld [vmem:[#allocation25_spill] sm:$0xff] }
 0xc52   :  { %v2664_v12 = vadd.f32 %v7932_v53, %v6803_v59 }
 0xcf0   :  { %v3810_v37 = vpop.f32.mrf.mxu0  ;;  %v3881_v58 = vpop.f32.mrf.mxu1 }
 0xcf1   :  { %v3886_v43 = vadd.f32 %v3810_v37, %v2549_v31  ;;  %v3888_v2 = vadd.f32 %v3881_v58, %v2662_v7 }
 0xcf2   :  { %v3812_v57 = vpop.f32.mrf.mxu0  ;;  %v3883_v27 = vpop.f32.mrf.mxu1 }
 0xcf3   :  { %v4833_v29 = vmul.f32 -1.442695, %v3886_v43  ;;  %v3887_v21 = vadd.f32 %v3812_v57, %v2551_v4  ;;  %v3889_v34 = vadd.f32 %v3883_v27, %v2664_v12 }
 0xcf5   :  { %5115 = vpow2.f32 %v4833_v29  ;;  %v4834_v1 = vmul.f32 -1.442695, %v3887_v21  ;;  %v4835_v23 = vmul.f32 -1.442695, %v3889_v34  ;;  %v7960_v34 = vld [vmem:[#allocation24_spill] sm:$0xff] }
 0xcf6   :  { %v2668_v7 = vadd.f32 %v7960_v34, %v6808_v9  ;;  %v4451_v34 = vld [vmem:[#allocation9 + $0x1b0] sm:$0xff] }
 0xcf7   :  { %5117 = vpow2.f32 %v4834_v1 }
 0xcf8   :  { %5119 = vtanh.f32 %v3888_v2 }
 0xcf9   :  { %5121 = vpow2.f32 %v4835_v23  ;;  %v7959_v23 = vld [vmem:[#allocation34_spill] sm:$0xff] }
 0xcfa   :  { %v2670_v2 = vadd.f32 %v7959_v23, %v6803_v59  ;;  %v4455_v23 = vld [vmem:[#allocation9 + $0x1d0] sm:$0xff] }
 0xd02   :  { %v5116_v36 = vpop.eup %5115 }
 0xd03   :  { %v3893_v47 = vadd.f32 1.0, %v5116_v36 }
 0xd04   :  { %v5118_v31 = vpop.eup %5117 }
 0xd05   :  { %5123 = vrcp.f32 %v3893_v47  ;;  %v3899_v43 = vadd.f32 1.0, %v5118_v31  ;;  %v5120_v21 = vpop.eup %5119 }
 0xd06   :  { %v5122_v57 = vpop.eup %5121 }
 0xd07   :  { %5125 = vrcp.f32 %v3899_v43  ;;  %v3906_v37 = vadd.f32 1.0, %v5122_v57 }
 0xd09   :  { %5127 = vrcp.f32 %v3906_v37 }
 0xd12   :  { %v5124_v4 = vpop.eup %5123 }
 0xd13   :  { %v3910_v29 = vmul.f32 %v5124_v4, %v5120_v21 }
 0xd14   :  { %v5126_v1 = vpop.eup %5125 }
 0xd15   :  { %v3909_v12 = vmul.f32 %v5126_v1, %v7188_v62 }
 0xd16   :  { %v5128_v36 = vpop.eup %5127 }
 0xd17   :  { %v7270_v27 = vadd.f32 %v3910_v29, %v3909_v12 }
 0xd19   :  { %5129 = vtanh.f32 %v7270_v27 }
 0xd26   :  { %v5130_v25 = vpop.eup %5129 }
 0xd27   :  { %v7273_v58 = vmul.f32 %v5130_v25, %v5128_v36 }
 0xd29   :  { %4048 = vmatmul.mubr.f32.vlgmr.msra.gmra.mxu0 %v7273_v58  ;;  %4119 = vmatmul.mubr.f32.vlgmr.msra.gmra.mxu1 %v7273_v58 }
 0xd2a   :  { %4223 = vmatpush1.msra.mxu0 %v6909_v20  ;;  %4294 = vmatpush1.msra.mxu1 %v6911_v41  ;;  %v7937_v20 = vld [vmem:[#allocation41_spill] sm:$0xff]  ;;  %v7938_v41 = vld [vmem:[#allocation52_spill] sm:$0xff] }
 0xd2b   :  { %4224 = vmatprep.subr.mxu0 %v6915_v24  ;;  %4295 = vmatprep.subr.mxu1 %v6917_v45  ;;  %v7939_v24 = vld [vmem:[#allocation42_spill] sm:$0xff]  ;;  %v7940_v45 = vld [vmem:[#allocation53_spill] sm:$0xff] }
 0xd2c   :  { %4225 = vmatpush1.msra.mxu0 %v6921_v28  ;;  %4296 = vmatpush1.msra.mxu1 %v6923_v30  ;;  %v7941_v28 = vld [vmem:[#allocation43_spill] sm:$0xff]  ;;  %v7942_v30 = vld [vmem:[#allocation54_spill] sm:$0xff] }
 0xd2d   :  { %4226 = vmatprep.subr.mxu0 %v6927_v32  ;;  %4297 = vmatprep.subr.mxu1 %v6929_v48  ;;  %v7943_v32 = vld [vmem:[#allocation44_spill] sm:$0xff]  ;;  %v7944_v48 = vld [vmem:[#allocation55_spill] sm:$0xff] }
 0xd2e   :  { %4227 = vmatpush1.msra.mxu0 %v6933_v18  ;;  %4298 = vmatpush1.msra.mxu1 %v6935_v39  ;;  %v7945_v18 = vld [vmem:[#allocation56_spill] sm:$0xff]  ;;  %v7946_v39 = vld [vmem:[#allocation18_spill] sm:$0xff] }
 0xd2f   :  { %4228 = vmatprep.subr.mxu0 %v6939_v16  ;;  %4299 = vmatprep.subr.mxu1 %v6941_v51  ;;  %v7947_v16 = vld [vmem:[#allocation29_spill] sm:$0xff] }
 0xd30   :  { %4229 = vmatpush1.msra.mxu0 %v6945_v60  ;;  %4300 = vmatpush1.msra.mxu1 %v6947_v56  ;;  %v7948_v51 = vld [vmem:[#allocation17_spill] sm:$0xff]  ;;  %v7949_v60 = vld [vmem:[#allocation28_spill] sm:$0xff] }
 0xd31   :  { %4230 = vmatprep.subr.mxu0 %v6951_v40  ;;  %4301 = vmatprep.subr.mxu1 %v6953_v38  ;;  %v7950_v56 = vld [vmem:[#allocation20_spill] sm:$0xff]  ;;  %v7951_v40 = vld [vmem:[#allocation31_spill] sm:$0xff] }
 0xd32   :  { %4231 = vmatpush1.msra.mxu0 %v6957_v63  ;;  %4302 = vmatpush1.msra.mxu1 %v6959_v52  ;;  %v7952_v38 = vld [vmem:[#allocation19_spill] sm:$0xff]  ;;  %v7954_v52 = vmov 0.0  }
 0xd33   :  { %4232 = vmatprep.subr.mxu0 %v6963_v13  ;;  %4303 = vmatprep.subr.mxu1 %v6965_v61  ;;  %v7953_v63 = vld [vmem:[#allocation47_spill] sm:$0xff]  ;;  %v7955_v13 = vld [vmem:[#allocation37_spill] sm:$0xff]  ;;  %v7956_v61 = vld [vmem:[#allocation14_spill] sm:$0xff] }
 0xd34   :  { %4233 = vmatpush1.msra.mxu0 %v7873_v46  ;;  %4304 = vmatpush1.msra.mxu1 %v7874_v54 }
 0xd35   :  { %4234 = vmatprep.subr.mxu0 %v7875_v6  ;;  %4305 = vmatprep.subr.mxu1 %v7876_v44 }
 0xd36   :  { %4235 = vmatpush1.msra.mxu0 %v6981_v11  ;;  %4306 = vmatpush1.msra.mxu1 %v7877_v17 }
 0xd37   :  { %4236 = vmatprep.subr.mxu0 %v6985_v35  ;;  %4307 = vmatprep.subr.mxu1 %v6989_v15  ;;  %v7934_v15 = vld [vmem:[#allocation50_spill] sm:$0xff]  ;;  %v7936_v35 = vld [vmem:[#allocation51_spill] sm:$0xff] }
 0xd38   :  { %4237 = vmatpush1.msra.mxu0 %v6991_v50  ;;  %4308 = vmatpush1.msra.mxu1 %v6993_v49  ;;  %v7935_v50 = vld [vmem:[#allocation40_spill] sm:$0xff] }
 0xd39   :  { %4238 = vmatprep.subr.mxu0 %v6997_v0  ;;  %4309 = vmatprep.subr.mxu1 %v6999_v26  ;;  %v7958_v0 = vld [vmem:[#allocation35_spill] sm:$0xff] }
 0xd3a   :  { %4239 = vmatpush1.msra.mxu0 %v7001_v22  ;;  %4310 = vmatpush1.msra.mxu1 %v7005_v14  ;;  %v7957_v22 = vld [vmem:[#allocation23_spill] sm:$0xff]  ;;  %v2557_v11 = vadd.f32 %v7958_v0, %v6791_v3 }
 0xd3b   :  { %4240 = vmatprep.subr.mxu0 %v7093_v42  ;;  %4311 = vmatprep.subr.mxu1 %v7095_v55  ;;  %v2555_v49 = vadd.f32 %v7957_v22, %v7956_v61 }
 0xd3c   :  { %4241 = vmatpush1.msra.mxu0 %v7097_v33  ;;  %4312 = vmatpush1.msra.mxu1 %v7101_v5 }
 0xd3d   :  { %4242 = vmatprep.subr.mxu0 %v7103_v19  ;;  %4313 = vmatprep.subr.mxu1 %v7105_v8 }
 0xd3e   :  { %4243 = vmatpush1.msra.mxu0 %v7109_v10  ;;  %4314 = vmatpush1.msra.mxu1 %v7934_v15 }
 0xd3f   :  { %4244 = vmatprep.subr.mxu0 %v7935_v50  ;;  %4315 = vmatprep.subr.mxu1 %v7936_v35 }
 0xd40   :  { %4245 = vmatpush1.msra.mxu0 %v7937_v20  ;;  %4316 = vmatpush1.msra.mxu1 %v7938_v41 }
 0xd41   :  { %4246 = vmatprep.subr.mxu0 %v7939_v24  ;;  %4317 = vmatprep.subr.mxu1 %v7940_v45 }
 0xd42   :  { %4247 = vmatpush1.msra.mxu0 %v7941_v28  ;;  %4318 = vmatpush1.msra.mxu1 %v7942_v30 }
 0xd43   :  { %4248 = vmatprep.subr.mxu0 %v7943_v32  ;;  %4319 = vmatprep.subr.mxu1 %v7944_v48 }
 0xd44   :  { %4249 = vmatpush1.msra.mxu0 %v7945_v18  ;;  %4320 = vmatpush1.msra.mxu1 %v7946_v39 }
 0xd45   :  { %4250 = vmatprep.subr.mxu0 %v7947_v16  ;;  %4321 = vmatprep.subr.mxu1 %v7948_v51 }
 0xd46   :  { %4251 = vmatpush1.msra.mxu0 %v7949_v60  ;;  %4322 = vmatpush1.msra.mxu1 %v7950_v56 }
 0xd47   :  { %4252 = vmatprep.subr.mxu0 %v7951_v40  ;;  %4323 = vmatprep.subr.mxu1 %v7952_v38 }
 0xd48   :  { %4253 = vmatpush1.msra.mxu0 %v7953_v63  ;;  %4286 = vmatprep.mubr.f32.mxu0 %v7954_v52 }
 0xd49   :  { %4324 = vmatpush1.msra.mxu1 %v7955_v13  ;;  %4357 = vmatprep.mubr.f32.mxu1 %v7954_v52 }
 0xde9   :  { %v4049_v26 = vpop.f32.mrf.mxu0  ;;  %v4120_v44 = vpop.f32.mrf.mxu1 }
 0xdea   :  { %v4125_v14 = vadd.f32 %v4049_v26, %v2555_v49  ;;  %v4127_v47 = vadd.f32 %v4120_v44, %v2668_v7  ;;  %v4453_v44 = vld [vmem:[#allocation9 + $0x1c0] sm:$0xff] }
 0xdeb   :  { %v4051_v46 = vpop.f32.mrf.mxu0  ;;  %v4122_v62 = vpop.f32.mrf.mxu1  ;;  %v4445_v7 = vld [vmem:[#allocation9 + $0x180] sm:$0xff] }
 0xdec   :  { %v4836_v54 = vmul.f32 -1.442695, %v4125_v14  ;;  %v4126_v6 = vadd.f32 %v4051_v46, %v2557_v11  ;;  %v4128_v53 = vadd.f32 %v4122_v62, %v2670_v2  ;;  %v4458_v14 = vld [vmem:[#allocation9 + $0x1e8] sm:$0xff]  ;;  %v4460_v46 = vld [vmem:[#allocation9 + $0x1f8] sm:$0xff]  ;;  %v4449_v2 = vld [vmem:[#allocation9 + $0x1a0] sm:$0xff] }
 0xded   :  { %4461 = vmatprep.subr.mxu0 %v4458_v14  ;;  %4532 = vmatprep.subr.mxu1 %v4460_v46  ;;  %v4450_v62 = vld [vmem:[#allocation9 + $0x1a8] sm:$0xff]  ;;  %v4429_v14 = vld [vmem:[#allocation9 + $0x100] sm:$0xff] }
 0xdee   :  { %5131 = vpow2.f32 %v4836_v54  ;;  %v4837_v17 = vmul.f32 -1.442695, %v4126_v6  ;;  %v4838_v31 = vmul.f32 -1.442695, %v4128_v53  ;;  %v4454_v54 = vld [vmem:[#allocation9 + $0x1c8] sm:$0xff]  ;;  %v4459_v6 = vld [vmem:[#allocation9 + $0x1f0] sm:$0xff] }
 0xdef   :  { %v4446_v53 = vld [vmem:[#allocation9 + $0x188] sm:$0xff] }
 0xdf0   :  { %5133 = vpow2.f32 %v4837_v17  ;;  %v4456_v17 = vld [vmem:[#allocation9 + $0x1d8] sm:$0xff]  ;;  %v4426_v46 = vld [vmem:[#allocation9 + $0xe8] sm:$0xff] }
 0xdf1   :  { %5135 = vtanh.f32 %v4127_v47  ;;  %v4448_v47 = vld [vmem:[#allocation9 + $0x198] sm:$0xff] }
 0xdf2   :  { %5137 = vpow2.f32 %v4838_v31  ;;  %v4442_v31 = vld [vmem:[#allocation9 + $0x168] sm:$0xff] }
 0xdfb   :  { %v5132_v43 = vpop.eup %5131 }
 0xdfc   :  { %v4132_v21 = vadd.f32 1.0, %v5132_v43  ;;  %v4447_v43 = vld [vmem:[#allocation9 + $0x190] sm:$0xff] }
 0xdfd   :  { %v5134_v57 = vpop.eup %5133 }
 0xdfe   :  { %5139 = vrcp.f32 %v4132_v21  ;;  %v4138_v4 = vadd.f32 1.0, %v5134_v57  ;;  %v5136_v29 = vpop.eup %5135  ;;  %v4441_v21 = vld [vmem:[#allocation9 + $0x160] sm:$0xff]  ;;  %v4444_v57 = vld [vmem:[#allocation9 + $0x178] sm:$0xff] }
 0xdff   :  { %v5138_v1 = vpop.eup %5137 }
 0xe00   :  { %5141 = vrcp.f32 %v4138_v4  ;;  %v4145_v25 = vadd.f32 1.0, %v5138_v1  ;;  %v4438_v4 = vld [vmem:[#allocation9 + $0x148] sm:$0xff]  ;;  %v4437_v1 = vld [vmem:[#allocation9 + $0x140] sm:$0xff] }
 0xe02   :  { %5143 = vrcp.f32 %v4145_v25  ;;  %v4433_v25 = vld [vmem:[#allocation9 + $0x120] sm:$0xff] }
 0xe0b   :  { %v5140_v37 = vpop.eup %5139 }
 0xe0c   :  { %v4149_v12 = vmul.f32 %v5140_v37, %v5136_v29  ;;  %v4443_v29 = vld [vmem:[#allocation9 + $0x170] sm:$0xff]  ;;  %v4440_v37 = vld [vmem:[#allocation9 + $0x158] sm:$0xff] }
 0xe0d   :  { %v5142_v36 = vpop.eup %5141 }
 0xe0e   :  { %v4148_v22 = vmul.f32 %v5142_v36, %v7270_v27  ;;  %v4457_v27 = vld [vmem:[#allocation9 + $0x1e0] sm:$0xff]  ;;  %v4439_v36 = vld [vmem:[#allocation9 + $0x150] sm:$0xff] }
 0xe0f   :  { %v5144_v26 = vpop.eup %5143 }
 0xe10   :  { %v7350_v49 = vadd.f32 %v4149_v12, %v4148_v22  ;;  %v4434_v12 = vld [vmem:[#allocation9 + $0x128] sm:$0xff]  ;;  %v4436_v22 = vld [vmem:[#allocation9 + $0x138] sm:$0xff] }
 0xe12   :  { %5145 = vtanh.f32 %v7350_v49 }
 0xe1f   :  { %v5146_v0 = vpop.eup %5145 }
 0xe20   :  { %v7353_v11 = vmul.f32 %v5146_v0, %v5144_v26  ;;  %v4430_v26 = vld [vmem:[#allocation9 + $0x108] sm:$0xff]  ;;  %v4435_v0 = vld [vmem:[#allocation9 + $0x130] sm:$0xff] }
 0xe22   :  { %4287 = vmatmul.mubr.f32.vlgmr.msra.gmra.mxu0 %v7353_v11  ;;  %4358 = vmatmul.mubr.f32.vlgmr.msra.gmra.mxu1 %v7353_v11 }
 0xe23   :  { %4525 = vmatprep.mubr.f32.mxu0 %v7954_v52  ;;  %4596 = vmatprep.mubr.f32.mxu1 %v7954_v52  ;;  %v4452_v52 = vld [vmem:[#allocation9 + $0x1b8] sm:$0xff] }
 0xe24   :  { %4462 = vmatpush1.msra.mxu0 %v4457_v27  ;;  %4533 = vmatpush1.msra.mxu1 %v4459_v6  ;;  %v4432_v27 = vld [vmem:[#allocation9 + $0x118] sm:$0xff]  ;;  %v4425_v6 = vld [vmem:[#allocation9 + $0xe0] sm:$0xff] }
 0xe25   :  { %4463 = vmatprep.subr.mxu0 %v4454_v54  ;;  %4534 = vmatprep.subr.mxu1 %v4456_v17  ;;  %v4431_v54 = vld [vmem:[#allocation9 + $0x110] sm:$0xff] }
 0xe26   :  { %4464 = vmatpush1.msra.mxu0 %v4453_v44  ;;  %4535 = vmatpush1.msra.mxu1 %v4455_v23  ;;  %v4428_v44 = vld [vmem:[#allocation9 + $0xf8] sm:$0xff]  ;;  %v4427_v17 = vld [vmem:[#allocation9 + $0xf0] sm:$0xff] }
 0xe27   :  { %4465 = vmatprep.subr.mxu0 %v4450_v62  ;;  %4536 = vmatprep.subr.mxu1 %v4452_v52 }
 0xe28   :  { %4466 = vmatpush1.msra.mxu0 %v4449_v2  ;;  %4537 = vmatpush1.msra.mxu1 %v4451_v34 }
 0xe29   :  { %4467 = vmatprep.subr.mxu0 %v4446_v53  ;;  %4538 = vmatprep.subr.mxu1 %v4448_v47  ;;  %v4658_v47 = vld [vmem:[%s7504_s9 + $0x70] sm:$0xff] }
 0xe2a   :  { %4468 = vmatpush1.msra.mxu0 %v4445_v7  ;;  %4539 = vmatpush1.msra.mxu1 %v4447_v43  ;;  %v4656_v43 = vld [vmem:[%s7504_s9 + $0x60] sm:$0xff] }
 0xe2b   :  { %4469 = vmatprep.subr.mxu0 %v4442_v31  ;;  %4540 = vmatprep.subr.mxu1 %v4444_v57  ;;  %v7965_v31 = vld [vmem:[#allocation63_spill] sm:$0xff]  ;;  %v4654_v57 = vld [vmem:[%s7504_s9 + $0x50] sm:$0xff] }
 0xe2c   :  { %4470 = vmatpush1.msra.mxu0 %v4441_v21  ;;  %4541 = vmatpush1.msra.mxu1 %v4443_v29  ;;  %v4655_v21 = vld [vmem:[%s7504_s9 + $0x58] sm:$0xff]  ;;  %v4652_v29 = vld [vmem:[%s7504_s9 + $0x40] sm:$0xff] }
 0xe2d   :  { %4471 = vmatprep.subr.mxu0 %v4438_v4  ;;  %4542 = vmatprep.subr.mxu1 %v4440_v37  ;;  %v4653_v4 = vld [vmem:[%s7504_s9 + $0x48] sm:$0xff]  ;;  %v4650_v37 = vld [vmem:[%s7504_s9 + $0x30] sm:$0xff] }
 0xe2e   :  { %4472 = vmatpush1.msra.mxu0 %v4437_v1  ;;  %4543 = vmatpush1.msra.mxu1 %v4439_v36  ;;  %v4651_v1 = vld [vmem:[%s7504_s9 + $0x38] sm:$0xff]  ;;  %v4648_v36 = vld [vmem:[%s7504_s9 + $0x20] sm:$0xff] }
 0xe2f   :  { %4473 = vmatprep.subr.mxu0 %v4434_v12  ;;  %4544 = vmatprep.subr.mxu1 %v4436_v22  ;;  %v4649_v12 = vld [vmem:[%s7504_s9 + $0x28] sm:$0xff]  ;;  %v4646_v22 = vld [vmem:[%s7504_s9 + $0x10] sm:$0xff] }
 0xe30   :  { %4474 = vmatpush1.msra.mxu0 %v4433_v25  ;;  %4545 = vmatpush1.msra.mxu1 %v4435_v0  ;;  %v4647_v25 = vld [vmem:[%s7504_s9 + $0x18] sm:$0xff]  ;;  %v4644_v0 = vld [vmem:[%s7504_s9] sm:$0xff] }
 0xe31   :  { %4475 = vmatprep.subr.mxu0 %v4430_v26  ;;  %4546 = vmatprep.subr.mxu1 %v4432_v27  ;;  %v4645_v26 = vld [vmem:[%s7504_s9 + $0x8] sm:$0xff] }
 0xe32   :  { %4476 = vmatpush1.msra.mxu0 %v4429_v14  ;;  %4547 = vmatpush1.msra.mxu1 %v4431_v54  ;;  %v7966_v14 = vld [vmem:[#allocation16_spill] sm:$0xff]  ;;  %v7967_v27 = vld [vmem:[#allocation39_spill] sm:$0xff] }
 0xe33   :  { %4477 = vmatprep.subr.mxu0 %v4426_v46  ;;  %4548 = vmatprep.subr.mxu1 %v4428_v44  ;;  %v7968_v46 = vld [vmem:[#allocation48_spill] sm:$0xff]  ;;  %v7969_v54 = vld [vmem:[#allocation59_spill] sm:$0xff] }
 0xe34   :  { %4478 = vmatpush1.msra.mxu0 %v4425_v6  ;;  %4549 = vmatpush1.msra.mxu1 %v4427_v17  ;;  %v2567_v6 = vadd.f32 %v7969_v54, %v7956_v61  ;;  %v7970_v17 = vld [vmem:[#allocation61_spill] sm:$0xff] }
 0xe35   :  { %4479 = vmatprep.subr.mxu0 %v7093_v42  ;;  %4550 = vmatprep.subr.mxu1 %v7095_v55  ;;  %v4659_v42 = vld [vmem:[%s7504_s9 + $0x78] sm:$0xff]  ;;  %v7961_v55 = vld [vmem:[#allocation46_spill] sm:$0xff] }
 0xe36   :  { %4480 = vmatpush1.msra.mxu0 %v7097_v33  ;;  %4551 = vmatpush1.msra.mxu1 %v7101_v5  ;;  %v2561_v33 = vadd.f32 %v7961_v55, %v7956_v61 }
 0xe37   :  { %4481 = vmatprep.subr.mxu0 %v7103_v19  ;;  %4552 = vmatprep.subr.mxu1 %v7105_v8  ;;  %v7962_v19 = vld [vmem:[#allocation57_spill] sm:$0xff] }
 0xe38   :  { %4482 = vmatpush1.msra.mxu0 %v7109_v10  ;;  %4553 = vmatpush1.msra.mxu1 %v7934_v15  ;;  %v2563_v8 = vadd.f32 %v7962_v19, %v6791_v3 }
 0xe39   :  { %4483 = vmatprep.subr.mxu0 %v7935_v50  ;;  %4554 = vmatprep.subr.mxu1 %v7936_v35 }
 0xe3a   :  { %4484 = vmatpush1.msra.mxu0 %v7937_v20  ;;  %4555 = vmatpush1.msra.mxu1 %v7938_v41 }
 0xe3b   :  { %4485 = vmatprep.subr.mxu0 %v7939_v24  ;;  %4556 = vmatprep.subr.mxu1 %v7940_v45  ;;  %v7963_v45 = vld [vmem:[#allocation58_spill] sm:$0xff] }
 0xe3c   :  { %4486 = vmatpush1.msra.mxu0 %v7941_v28  ;;  %4557 = vmatpush1.msra.mxu1 %v7942_v30  ;;  %v2676_v28 = vadd.f32 %v7963_v45, %v6803_v59 }
 0xe3d   :  { %4487 = vmatprep.subr.mxu0 %v7943_v32  ;;  %4558 = vmatprep.subr.mxu1 %v7944_v48  ;;  %v7964_v32 = vld [vmem:[#allocation15_spill] sm:$0xff] }
 0xe3e   :  { %4488 = vmatpush1.msra.mxu0 %v7945_v18  ;;  %4559 = vmatpush1.msra.mxu1 %v7946_v39  ;;  %v2674_v48 = vadd.f32 %v7964_v32, %v6808_v9 }
 0xe3f   :  { %4489 = vmatprep.subr.mxu0 %v7947_v16  ;;  %4560 = vmatprep.subr.mxu1 %v7948_v51 }
 0xe40   :  { %4490 = vmatpush1.msra.mxu0 %v7949_v60  ;;  %4561 = vmatpush1.msra.mxu1 %v7950_v56 }
 0xe41   :  { %4491 = vmatprep.subr.mxu0 %v7951_v40  ;;  %4562 = vmatprep.subr.mxu1 %v7952_v38 }
 0xe42   :  { %4492 = vmatpush1.msra.mxu0 %v7953_v63  ;;  %4563 = vmatpush1.msra.mxu1 %v7955_v13 }
 0xe43   :  { %4872 = vmatprep.subr.mxu0 %v4659_v42 }
 0xee2   :  { %v4288_v5 = vpop.f32.mrf.mxu0  ;;  %v4359_v20 = vpop.f32.mrf.mxu1 }
 0xee3   :  { %v4364_v10 = vadd.f32 %v4288_v5, %v2561_v33  ;;  %v4366_v18 = vadd.f32 %v4359_v20, %v2674_v48 }
 0xee4   :  { %v4290_v15 = vpop.f32.mrf.mxu0  ;;  %v4361_v24 = vpop.f32.mrf.mxu1 }
 0xee5   :  { %v4839_v50 = vmul.f32 -1.442695, %v4364_v10  ;;  %v4365_v35 = vadd.f32 %v4290_v15, %v2563_v8  ;;  %v4367_v30 = vadd.f32 %v4361_v24, %v2676_v28 }
 0xee7   :  { %5147 = vpow2.f32 %v4839_v50  ;;  %v4840_v41 = vmul.f32 -1.442695, %v4365_v35  ;;  %v4841_v39 = vmul.f32 -1.442695, %v4367_v30  ;;  %v7972_v35 = vld [vmem:[#allocation60_spill] sm:$0xff] }
 0xee8   :  { %v2680_v61 = vadd.f32 %v7972_v35, %v6808_v9  ;;  %v4847_v30 = vld [vmem:[%s7505_s10] ss:$0 sm:$0xff] }
 0xee9   :  { %5149 = vpow2.f32 %v4840_v41 }
 0xeea   :  { %5151 = vtanh.f32 %v4366_v18 }
 0xeeb   :  { %5153 = vpow2.f32 %v4841_v39 }
 0xef4   :  { %v5148_v16 = vpop.eup %5147 }
 0xef5   :  { %v4371_v51 = vadd.f32 1.0, %v5148_v16 }
 0xef6   :  { %v5150_v60 = vpop.eup %5149 }
 0xef7   :  { %5155 = vrcp.f32 %v4371_v51  ;;  %v4377_v56 = vadd.f32 1.0, %v5150_v60  ;;  %v5152_v40 = vpop.eup %5151 }
 0xef8   :  { %v5154_v38 = vpop.eup %5153 }
 0xef9   :  { %5157 = vrcp.f32 %v4377_v56  ;;  %v4384_v23 = vadd.f32 1.0, %v5154_v38 }
 0xefb   :  { %5159 = vrcp.f32 %v4384_v23 }
 0xf04   :  { %v5156_v63 = vpop.eup %5155 }
 0xf05   :  { %v4388_v13 = vmul.f32 %v5156_v63, %v5152_v40 }
 0xf06   :  { %v5158_v62 = vpop.eup %5157 }
 0xf07   :  { %v4387_v2 = vmul.f32 %v5158_v62, %v7350_v49  ;;  %v4657_v49 = vld [vmem:[%s7504_s9 + $0x68] sm:$0xff] }
 0xf08   :  { %v5160_v53 = vpop.eup %5159 }
 0xf09   :  { %v7399_v52 = vadd.f32 %v4388_v13, %v4387_v2 }
 0xf0b   :  { %5161 = vtanh.f32 %v7399_v52 }
 0xf18   :  { %v5162_v34 = vpop.eup %5161 }
 0xf19   :  { %v4391_v7 = vmul.f32 %v5162_v34, %v5160_v53 }
 0xf1b   :  { %4526 = vmatmul.mubr.f32.vlgmr.msra.gmra.mxu0 %v4391_v7  ;;  %4597 = vmatmul.mubr.f32.vlgmr.msra.gmra.mxu1 %v4391_v7 }
 0xf1c   :  { %4873 = vmatpush3.msra.mxu0 %v4659_v42  ;;  %4904 = vmatprep.mubr.f32.mxu0 %v7965_v31  ;;  %v2569_v42 = vadd.f32 %v7970_v17, %v6791_v3 }
 0xf1d   :  { %4874 = vmatprep.subr.mxu0 %v4658_v47 }
 0xf1e   :  { %4875 = vmatpush3.msra.mxu0 %v4658_v47 }
 0xf1f   :  { %4876 = vmatprep.subr.mxu0 %v4657_v49 }
 0xf20   :  { %4877 = vmatpush3.msra.mxu0 %v4657_v49 }
 0xf21   :  { %4878 = vmatprep.subr.mxu0 %v4656_v43 }
 0xf22   :  { %4879 = vmatpush3.msra.mxu0 %v4656_v43 }
 0xf23   :  { %4880 = vmatprep.subr.mxu0 %v4655_v21 }
 0xf24   :  { %4881 = vmatpush3.msra.mxu0 %v4655_v21 }
 0xf25   :  { %4882 = vmatprep.subr.mxu0 %v4654_v57 }
 0xf26   :  { %4883 = vmatpush3.msra.mxu0 %v4654_v57 }
 0xf27   :  { %4884 = vmatprep.subr.mxu0 %v4653_v4 }
 0xf28   :  { %4885 = vmatpush3.msra.mxu0 %v4653_v4 }
 0xf29   :  { %4886 = vmatprep.subr.mxu0 %v4652_v29 }
 0xf2a   :  { %4887 = vmatpush3.msra.mxu0 %v4652_v29 }
 0xf2b   :  { %4888 = vmatprep.subr.mxu0 %v4651_v1 }
 0xf2c   :  { %4889 = vmatpush3.msra.mxu0 %v4651_v1 }
 0xf2d   :  { %4890 = vmatprep.subr.mxu0 %v4650_v37 }
 0xf2e   :  { %4891 = vmatpush3.msra.mxu0 %v4650_v37 }
 0xf2f   :  { %4892 = vmatprep.subr.mxu0 %v4649_v12 }
 0xf30   :  { %4893 = vmatpush3.msra.mxu0 %v4649_v12 }
 0xf31   :  { %4894 = vmatprep.subr.mxu0 %v4648_v36 }
 0xf32   :  { %4895 = vmatpush3.msra.mxu0 %v4648_v36 }
 0xf33   :  { %4896 = vmatprep.subr.mxu0 %v4647_v25 }
 0xf34   :  { %4897 = vmatpush3.msra.mxu0 %v4647_v25 }
 0xf35   :  { %4898 = vmatprep.subr.mxu0 %v4646_v22 }
 0xf36   :  { %4899 = vmatpush3.msra.mxu0 %v4646_v22 }
 0xf37   :  { %4900 = vmatprep.subr.mxu0 %v4645_v26 }
 0xf38   :  { %4901 = vmatpush3.msra.mxu0 %v4645_v26 }
 0xf39   :  { %4902 = vmatprep.subr.mxu0 %v4644_v0 }
 0xf3a   :  { %4903 = vmatpush3.msra.mxu0 %v4644_v0 }
 0xf3b   :  { %4905 = vmatmul.mubr.f32.vlgmr.msra.gmra.mxu0 %v7966_v14 }
 0xf3c   :  { %4907 = vmatprep.mubr.f32.mxu0 %v7967_v27 }
 0xf3f   :  { %4908 = vmatmul.mubr.f32.gmra.mxu0 %v7968_v46 }
 0xf40   :  { %4910 = vmatprep.mubr.f32.mxu0 %v7273_v58  ;;  %v7971_v58 = vld [vmem:[#allocation62_spill] sm:$0xff] }
 0xf43   :  { %4911 = vmatmul.mubr.f32.gmra.mxu0 %v7353_v11  ;;  %v2682_v11 = vadd.f32 %v7971_v58, %v6803_v59 }
 0xf44   :  { %4913 = vmatprep.mubr.f32.mxu0 %v4391_v7 }
 0xfdb   :  { %v4527_v44 = vpop.f32.mrf.mxu0  ;;  %v4598_v8 = vpop.f32.mrf.mxu1 }
 0xfdc   :  { %v4603_v55 = vadd.f32 %v4527_v44, %v2567_v6  ;;  %v4605_v20 = vadd.f32 %v4598_v8, %v2680_v61 }
 0xfdd   :  { %v4529_v33 = vpop.f32.mrf.mxu0  ;;  %v4600_v15 = vpop.f32.mrf.mxu1 }
 0xfde   :  { %v4842_v5 = vmul.f32 -1.442695, %v4603_v55  ;;  %v4604_v19 = vadd.f32 %v4529_v33, %v2569_v42  ;;  %v4606_v50 = vadd.f32 %v4600_v15, %v2682_v11 }
 0xfe0   :  { %5163 = vpow2.f32 %v4842_v5  ;;  %v4843_v10 = vmul.f32 -1.442695, %v4604_v19  ;;  %v4844_v41 = vmul.f32 -1.442695, %v4606_v50 }
 0xfe2   :  { %5165 = vpow2.f32 %v4843_v10 }
 0xfe3   :  { %5167 = vtanh.f32 %v4605_v20 }
 0xfe4   :  { %5169 = vpow2.f32 %v4844_v41 }
 0xfed   :  { %v5164_v24 = vpop.eup %5163 }
 0xfee   :  { %v4610_v3 = vadd.f32 1.0, %v5164_v24 }
 0xfef   :  { %v5166_v45 = vpop.eup %5165 }
 0xff0   :  { %5171 = vrcp.f32 %v4610_v3  ;;  %v4616_v28 = vadd.f32 1.0, %v5166_v45  ;;  %v5168_v32 = vpop.eup %5167 }
 0xff1   :  { %v5170_v48 = vpop.eup %5169 }
 0xff2   :  { %5173 = vrcp.f32 %v4616_v28  ;;  %v4623_v56 = vadd.f32 1.0, %v5170_v48 }
 0xff4   :  { %5175 = vrcp.f32 %v4623_v56 }
 0xffb   :  { %v4906_v59 = vpop.f32.mrf.mxu0 }
 0xffc   :  { %v4739_v18 = vadd.f32 %v4906_v59, %v4847_v30 }
 0xffd   :  { %v5172_v39 = vpop.eup %5171  ;;  %v4733_v9 = vpop.f32.mrf.mxu0 }
 0xffe   :  { %v4627_v16 = vmul.f32 %v5172_v39, %v5168_v32  ;;  %4773 = vst [vmem:[%s7506_s11 + $0x8] sm:$0xff] %v4739_v18  ;;  %v4734_v51 = vadd.f32 %v4847_v30, %v4733_v9 }
 0xfff   :  { %v5174_v60 = vpop.eup %5173  ;;  %v4909_v40 = vpop.f32.mrf.mxu0 }
0x1000   :  { %v4626_v38 = vmul.f32 %v5174_v60, %v7399_v52  ;;  %4772 = vst [vmem:[%s7506_s11] sm:$0xff] %v4734_v51  ;;  %v4749_v63 = vadd.f32 %v4909_v40, %v4847_v30 }
0x1001   :  { %v4743_v13 = vpop.f32.mrf.mxu0  ;;  %v5176_v7 = vpop.eup %5175 }
0x1002   :  { %4775 = vst [vmem:[%s7506_s11 + $0x18] sm:$0xff] %v4749_v63  ;;  %v4744_v62 = vadd.f32 %v4847_v30, %v4743_v13  ;;  %v4628_v23 = vadd.f32 %v4627_v16, %v4626_v38 }
0x1003   :  { %v4912_v2 = vpop.f32.mrf.mxu0 }
0x1004   :  { %4774 = vst [vmem:[%s7506_s11 + $0x10] sm:$0xff] %v4744_v62  ;;  %v4759_v53 = vadd.f32 %v4912_v2, %v4847_v30  ;;  %5177 = vtanh.f32 %v4628_v23  ;;  %4846 = vst [vmem:[%s7508_s13 + $0x8] sm:$0xff] %v4628_v23 }
0x1005   :  { %v4753_v52 = vpop.f32.mrf.mxu0 }
0x1006   :  { %4777 = vst [vmem:[%s7506_s11 + $0x28] sm:$0xff] %v4759_v53  ;;  %v4754_v34 = vadd.f32 %v4847_v30, %v4753_v52 }
0x1008   :  { %4776 = vst [vmem:[%s7506_s11 + $0x20] sm:$0xff] %v4754_v34 }
0x1011   :  { %v5178_v47 = vpop.eup %5177 }
0x1012   :  { %v4630_v31 = vmul.f32 %v5178_v47, %v5176_v7 }
0x1014   :  { %4845 = vst [vmem:[%s7507_s12 + $0x8] sm:$0xff] %v4630_v31  ;;  %4914 = vmatmul.mubr.f32.gmra.mxu0 %v4630_v31 }
0x10d4   :  { %v4915_v49 = vpop.f32.mrf.mxu0 }
0x10d5   :  { %v4769_v43 = vadd.f32 %v4915_v49, %v4847_v30 }
0x10d6   :  { %v4763_v21 = vpop.f32.mrf.mxu0 }
0x10d7   :  { %4779 = vst [vmem:[%s7506_s11 + $0x38] sm:$0xff] %v4769_v43  ;;  %v4764_v57 = vadd.f32 %v4847_v30, %v4763_v21 }
0x10d9   :  { %4778 = vst [vmem:[%s7506_s11 + $0x30] sm:$0xff] %v4764_v57 }
0x10da   :  { %4792 = vsyncpa [#allocation5], 1 }
0x10db   :  { %4793 = vsyncpa [#allocation7], 1 }
0x10dc   :  { %4794 = vsyncpa [#allocation10], 1 }

</bundles_post_ra>
